<compile_context>
chip_gen: v5e
topology: v5e:2x2
jax: 0.10.0
libtpu: 0.0.40
codegen_flags: <defaults>
</compile_context>

<pallas_src>
import math

import jax
import jax.numpy as jnp
import numpy as np
from jax import lax
from jax.experimental import pallas as pl
from jax.experimental.pallas import tpu as pltpu

# ---- toy hyper-parameters consistent with the PyTorch module ----
VOCAB = 128
D_MODEL = 32
N_HEADS = 4
D_K = D_MODEL // N_HEADS
D_FF = 64
N_LAYERS = 2
EPS = 1e-5      # nn.LayerNorm default eps
NEG = -1e10     # masked_fill value


# ---------------- positional encoding (same formula as the PyTorch module) ----------------

def positional_encoding(T, d_model):
    pos = np.arange(T, dtype=np.float32)[:, None]
    div = np.exp(np.arange(0, d_model, 2, dtype=np.float32)
                 * (-math.log(10000.0) / d_model))
    pe = np.zeros((T, d_model), dtype=np.float32)
    pe[:, 0::2] = np.sin(pos * div)
    pe[:, 1::2] = np.cos(pos * div)
    return jnp.asarray(pe)


# ---------------- the kernel (one batch element per grid step) ----------------

def decoder_kernel(
    ids_ref, enc_ref, tbias_ref, sbias_ref, pe_ref, emb_ref,
    sa_wqkv, sa_bqkv, sa_wo, sa_bo,
    ea_wq, ea_bq, ea_wkv, ea_bkv, ea_wo, ea_bo,
    ff_w1, ff_b1, ff_w2, ff_b2,
    ln_g, ln_b, fcw_ref, fcb_ref,
    logits_ref, attn_ref,
):
    T = ids_ref.shape[0]
    V = emb_ref.shape[0]
    D = D_MODEL
    scale = 1.0 / math.sqrt(D_K)

    def layernorm(y, g, b):
        mu = jnp.mean(y, axis=-1, keepdims=True)
        var = jnp.mean((y - mu) ** 2, axis=-1, keepdims=True)
        return (y - mu) * lax.rsqrt(var + EPS) * g + b

    def softmax_rows(e):
        m = jnp.max(e, axis=-1, keepdims=True)
        p = jnp.exp(e - m)
        s = jnp.sum(p, axis=-1, keepdims=True)
        r = pl.reciprocal(s, approx=True)
        r = r * (2.0 - s * r)          # one Newton step -> f32-accurate, EUP-based
        return p * r

    def attend(q, k, v, bias, wo, want_attn):
        # q: (Tq, D); k, v: (Tk, D); bias broadcastable to (Tq, Tk).
        # Per-head contributions are summed straight into the output projection
        # (no lane-wise concat of the context).
        ctx = None
        attns = []
        for h in range(N_HEADS):
            sl = slice(h * D_K, (h + 1) * D_K)
            e = jnp.dot(q[:, sl], k[:, sl].T,
                        preferred_element_type=jnp.float32) * scale + bias
            a = softmax_rows(e)
            if want_attn:
                attns.append(a)
            o_h = jnp.dot(jnp.dot(a, v[:, sl], preferred_element_type=jnp.float32),
                          wo[sl, :], preferred_element_type=jnp.float32)
            ctx = o_h if ctx is None else ctx + o_h
        attn = jnp.concatenate(attns, axis=-1) if want_attn else None
        return ctx, attn

    # token embedding via one-hot matmul (MXU-friendly gather), scale, add pos-enc
    onehot = (ids_ref[...] ==
              lax.broadcasted_iota(jnp.int32, (T, V), 1)).astype(jnp.float32)
    x = jnp.dot(onehot, emb_ref[...], preferred_element_type=jnp.float32)
    x = x * math.sqrt(D) + pe_ref[...]
    # TODO(synk): all nn.Dropout layers are stochastic; implemented as identity (eval mode).

    enc = enc_ref[...]          # (S, D)
    tbias = tbias_ref[...]      # (T, T) additive mask bias (0 / -1e10)
    sbias = sbias_ref[...]      # (1, S) additive mask bias

    for l in range(N_LAYERS):
        # ---- masked self-attention (fused QKV projection) + add & norm ----
        qkv = jnp.dot(x, sa_wqkv[l], preferred_element_type=jnp.float32) + sa_bqkv[l]
        ctx, _ = attend(qkv[:, :D], qkv[:, D:2 * D], qkv[:, 2 * D:],
                        tbias, sa_wo[l], want_attn=False)
        x = layernorm(x + ctx + sa_bo[l], ln_g[l, 0], ln_b[l, 0])

        # ---- encoder-decoder attention (fused KV projection) + add & norm ----
        q = jnp.dot(x, ea_wq[l], preferred_element_type=jnp.float32) + ea_bq[l]
        kv = jnp.dot(enc, ea_wkv[l], preferred_element_type=jnp.float32) + ea_bkv[l]
        ctx, attn = attend(q, kv[:, :D], kv[:, D:], sbias, ea_wo[l], want_attn=True)
        attn_ref[l] = attn                       # single lane-dense (T, H*S) store
        x = layernorm(x + ctx + ea_bo[l], ln_g[l, 1], ln_b[l, 1])

        # ---- position-wise feed-forward + add & norm ----
        h1 = jnp.maximum(
            jnp.dot(x, ff_w1[l], preferred_element_type=jnp.float32) + ff_b1[l], 0.0)
        ff = jnp.dot(h1, ff_w2[l], preferred_element_type=jnp.float32) + ff_b2[l]
        x = layernorm(x + ff, ln_g[l, 2], ln_b[l, 2])

    # final vocab projection (lane-dense: V = 128)
    logits_ref[...] = (jnp.dot(x, fcw_ref[...], preferred_element_type=jnp.float32)
                       + fcb_ref[...])


# ---------------- wrapper ----------------

def decoder_forward(trg_ids, enc_src, trg_mask, src_mask, params):
    B, T = trg_ids.shape
    S = enc_src.shape[1]
    L, H, V, D = N_LAYERS, N_HEADS, VOCAB, D_MODEL

    # wrapper-side prep: additive mask bias, fused QKV/KV weights, per-layer stacking
    tbias = jnp.where(trg_mask == 0, NEG, 0.0).astype(jnp.float32).reshape(B, T, T)
    sbias = jnp.where(src_mask == 0, NEG, 0.0).astype(jnp.float32).reshape(B, 1, S)
    ids = trg_ids.astype(jnp.int32).reshape(B, T, 1)
    pe = positional_encoding(T, D)

    Ls = params['layers']
    stk = lambda name: jnp.stack([Ls[l][name] for l in range(L)])
    sa_wqkv = jnp.stack([jnp.concatenate(
        [Ls[l]['sa_wq'], Ls[l]['sa_wk'], Ls[l]['sa_wv']], axis=1) for l in range(L)])
    sa_bqkv = jnp.stack([jnp.concatenate(
        [Ls[l]['sa_bq'], Ls[l]['sa_bk'], Ls[l]['sa_bv']], axis=1) for l in range(L)])
    ea_wkv = jnp.stack([jnp.concatenate(
        [Ls[l]['ea_wk'], Ls[l]['ea_wv']], axis=1) for l in range(L)])
    ea_bkv = jnp.stack([jnp.concatenate(
        [Ls[l]['ea_bk'], Ls[l]['ea_bv']], axis=1) for l in range(L)])
    ln_g = jnp.stack([jnp.stack([Ls[l]['n1_g'], Ls[l]['n2_g'], Ls[l]['n3_g']])
                      for l in range(L)])                      # (L, 3, 1, D)
    ln_b = jnp.stack([jnp.stack([Ls[l]['n1_b'], Ls[l]['n2_b'], Ls[l]['n3_b']])
                      for l in range(L)])

    weights = [pe, params['emb'],
               sa_wqkv, sa_bqkv, stk('sa_wo'), stk('sa_bo'),
               stk('ea_wq'), stk('ea_bq'), ea_wkv, ea_bkv, stk('ea_wo'), stk('ea_bo'),
               stk('ff_w1'), stk('ff_b1'), stk('ff_w2'), stk('ff_b2'),
               ln_g, ln_b, params['fc_w'], params['fc_b']]

    def full_spec(a):
        zeros = (0,) * a.ndim
        return pl.BlockSpec(a.shape, lambda b: zeros)

    in_specs = [
        pl.BlockSpec((None, T, 1), lambda b: (b, 0, 0)),
        pl.BlockSpec((None, S, D), lambda b: (b, 0, 0)),
        pl.BlockSpec((None, T, T), lambda b: (b, 0, 0)),
        pl.BlockSpec((None, 1, S), lambda b: (b, 0, 0)),
    ] + [full_spec(w) for w in weights]

    out_specs = (
        pl.BlockSpec((None, T, V), lambda b: (b, 0, 0)),
        pl.BlockSpec((None, L, T, H * S), lambda b: (b, 0, 0, 0)),
    )
    out_shape = (
        jax.ShapeDtypeStruct((B, T, V), jnp.float32),
        jax.ShapeDtypeStruct((B, L, T, H * S), jnp.float32),
    )

    logits, attn_slab = pl.pallas_call(
        decoder_kernel,
        out_shape=out_shape,
        grid=(B,),
        in_specs=in_specs,
        out_specs=out_specs,
        compiler_params=pltpu.CompilerParams(dimension_semantics=("parallel",)),
    )(ids, enc_src, tbias, sbias, *weights)

    attn = attn_slab.reshape(B, L, T, H, S).transpose(1, 0, 3, 2, 4)  # (L, B, H, T, S)
    return logits, [attn[l] for l in range(L)]


# ---------------- params & pure-JAX reference ----------------

def init_params(key):
    kemb, kfc, *klayers = jax.random.split(key, 2 + N_LAYERS)

    def linear(k, din, dout):
        bound = 1.0 / math.sqrt(din)
        kw, kb = jax.random.split(k)
        w = jax.random.uniform(kw, (din, dout), jnp.float32, -bound, bound)
        b = jax.random.uniform(kb, (1, dout), jnp.float32, -bound, bound)
        return w, b

    params = {'emb': jax.random.normal(kemb, (VOCAB, D_MODEL), jnp.float32)}
    params['fc_w'], params['fc_b'] = linear(kfc, D_MODEL, VOCAB)
    layers = []
    for kl in klayers:
        ks = jax.random.split(kl, 10)
        p = {}
        p['sa_wq'], p['sa_bq'] = linear(ks[0], D_MODEL, D_MODEL)
        p['sa_wk'], p['sa_bk'] = linear(ks[1], D_MODEL, D_MODEL)
        p['sa_wv'], p['sa_bv'] = linear(ks[2], D_MODEL, D_MODEL)
        p['sa_wo'], p['sa_bo'] = linear(ks[3], D_MODEL, D_MODEL)
        p['ea_wq'], p['ea_bq'] = linear(ks[4], D_MODEL, D_MODEL)
        p['ea_wk'], p['ea_bk'] = linear(ks[5], D_MODEL, D_MODEL)
        p['ea_wv'], p['ea_bv'] = linear(ks[6], D_MODEL, D_MODEL)
        p['ea_wo'], p['ea_bo'] = linear(ks[7], D_MODEL, D_MODEL)
        p['ff_w1'], p['ff_b1'] = linear(ks[8], D_MODEL, D_FF)
        p['ff_w2'], p['ff_b2'] = linear(ks[9], D_FF, D_MODEL)
        for n in ('n1', 'n2', 'n3'):
            p[f'{n}_g'] = jnp.ones((1, D_MODEL), jnp.float32)
            p[f'{n}_b'] = jnp.zeros((1, D_MODEL), jnp.float32)
        layers.append(p)
    params['layers'] = layers
    return params


def _ref_mha(q_in, kv_in, mask, wq, bq, wk, bk, wv, bv, wo, bo):
    B, Tq, _ = q_in.shape
    Tk = kv_in.shape[1]
    Q = (q_in @ wq + bq).reshape(B, Tq, N_HEADS, D_K).transpose(0, 2, 1, 3)
    K = (kv_in @ wk + bk).reshape(B, Tk, N_HEADS, D_K).transpose(0, 2, 1, 3)
    V = (kv_in @ wv + bv).reshape(B, Tk, N_HEADS, D_K).transpose(0, 2, 1, 3)
    e = Q @ K.transpose(0, 1, 3, 2) / math.sqrt(D_K)
    e = jnp.where(mask == 0, NEG, e)
    a = jax.nn.softmax(e, axis=-1)
    x = (a @ V).transpose(0, 2, 1, 3).reshape(B, Tq, D_MODEL)
    return x @ wo + bo, a


def _ref_ln(x, g, b):
    mu = x.mean(-1, keepdims=True)
    var = ((x - mu) ** 2).mean(-1, keepdims=True)
    return (x - mu) / jnp.sqrt(var + EPS) * g + b


def ref_decoder(trg_ids, enc, tmask, smask, params):
    B, T = trg_ids.shape
    x = params['emb'][trg_ids] * math.sqrt(D_MODEL)
    x = x + positional_encoding(T, D_MODEL)[None]
    attns = []
    for p in params['layers']:
        sa, _ = _ref_mha(x, x, tmask, p['sa_wq'], p['sa_bq'], p['sa_wk'], p['sa_bk'],
                         p['sa_wv'], p['sa_bv'], p['sa_wo'], p['sa_bo'])
        x = _ref_ln(x + sa, p['n1_g'], p['n1_b'])
        ea, a = _ref_mha(x, enc, smask, p['ea_wq'], p['ea_bq'], p['ea_wk'], p['ea_bk'],
                         p['ea_wv'], p['ea_bv'], p['ea_wo'], p['ea_bo'])
        x = _ref_ln(x + ea, p['n2_g'], p['n2_b'])
        ff = jnp.maximum(x @ p['ff_w1'] + p['ff_b1'], 0.0) @ p['ff_w2'] + p['ff_b2']
        x = _ref_ln(x + ff, p['n3_g'], p['n3_b'])
        attns.append(a)
    logits = x @ params['fc_w'] + params['fc_b']
    return logits, attns


# ---------------- main ----------------

if __name__ == "__main__":
    key = jax.random.PRNGKey(0)
    kp, kt, ke = jax.random.split(key, 3)

    B, T, S = 2, 8, 8
    params = init_params(kp)
    trg_ids = jax.random.randint(kt, (B, T), 0, VOCAB)
    enc_src = jax.random.normal(ke, (B, S, D_MODEL), jnp.float32)
    trg_mask = jnp.broadcast_to(
        jnp.tril(jnp.ones((T, T), jnp.float32))[None, None], (B, 1, T, T))
    src_mask = jnp.ones((B, 1, 1, S), jnp.float32)

    logits, attns = decoder_forward(trg_ids, enc_src, trg_mask, src_mask, params)
    logits = jax.block_until_ready(logits)
    attns = [jax.block_until_ready(a) for a in attns]

    ref_logits, ref_attns = ref_decoder(trg_ids, enc_src, trg_mask, src_mask, params)
    np.testing.assert_allclose(np.asarray(logits), np.asarray(ref_logits),
                               rtol=1e-3, atol=1e-3)
    for a, ra in zip(attns, ref_attns):
        np.testing.assert_allclose(np.asarray(a), np.asarray(ra),
                                   rtol=1e-3, atol=1e-3)

    print("KERNEL_OK")
</pallas_src>

<mosaic_0001>
module attributes {stable_mosaic.version = 11 : i64} {
  func.func @decoder_kernel(%arg0: i32, %arg1: memref<1x8x1xi32, #tpu.memory_space<vmem>>, %arg2: memref<1x8x32xf32, #tpu.memory_space<vmem>>, %arg3: memref<1x8x8xf32, #tpu.memory_space<vmem>>, %arg4: memref<1x1x8xf32, #tpu.memory_space<vmem>>, %arg5: memref<8x32xf32, #tpu.memory_space<vmem>>, %arg6: memref<128x32xf32, #tpu.memory_space<vmem>>, %arg7: memref<2x32x96xf32, #tpu.memory_space<vmem>>, %arg8: memref<2x1x96xf32, #tpu.memory_space<vmem>>, %arg9: memref<2x32x32xf32, #tpu.memory_space<vmem>>, %arg10: memref<2x1x32xf32, #tpu.memory_space<vmem>>, %arg11: memref<2x32x32xf32, #tpu.memory_space<vmem>>, %arg12: memref<2x1x32xf32, #tpu.memory_space<vmem>>, %arg13: memref<2x32x64xf32, #tpu.memory_space<vmem>>, %arg14: memref<2x1x64xf32, #tpu.memory_space<vmem>>, %arg15: memref<2x32x32xf32, #tpu.memory_space<vmem>>, %arg16: memref<2x1x32xf32, #tpu.memory_space<vmem>>, %arg17: memref<2x32x64xf32, #tpu.memory_space<vmem>>, %arg18: memref<2x1x64xf32, #tpu.memory_space<vmem>>, %arg19: memref<2x64x32xf32, #tpu.memory_space<vmem>>, %arg20: memref<2x1x32xf32, #tpu.memory_space<vmem>>, %arg21: memref<2x3x1x32xf32, #tpu.memory_space<vmem>>, %arg22: memref<2x3x1x32xf32, #tpu.memory_space<vmem>>, %arg23: memref<32x128xf32, #tpu.memory_space<vmem>>, %arg24: memref<1x128xf32, #tpu.memory_space<vmem>>, %arg25: memref<1x8x128xf32, #tpu.memory_space<vmem>>, %arg26: memref<1x2x8x32xf32, #tpu.memory_space<vmem>>) attributes {dimension_semantics = [#tpu.dimension_semantics<parallel>], iteration_bounds = array<i64: 2>, scalar_prefetch = 0 : i64, scratch_operands = 0 : i64, tpu.core_type = #tpu.core_type<tc>, window_params = [{transform_indices = @transform_0, window_bounds = array<i64: 1, 8, 1>}, {transform_indices = @transform_1, window_bounds = array<i64: 1, 8, 32>}, {transform_indices = @transform_2, window_bounds = array<i64: 1, 8, 8>}, {transform_indices = @transform_3, window_bounds = array<i64: 1, 1, 8>}, {pipeline_mode = #tpu.pipeline_mode<synchronous>, transform_indices = @transform_4, window_bounds = array<i64: 8, 32>}, {pipeline_mode = #tpu.pipeline_mode<synchronous>, transform_indices = @transform_5, window_bounds = array<i64: 128, 32>}, {pipeline_mode = #tpu.pipeline_mode<synchronous>, transform_indices = @transform_6, window_bounds = array<i64: 2, 32, 96>}, {pipeline_mode = #tpu.pipeline_mode<synchronous>, transform_indices = @transform_7, window_bounds = array<i64: 2, 1, 96>}, {pipeline_mode = #tpu.pipeline_mode<synchronous>, transform_indices = @transform_8, window_bounds = array<i64: 2, 32, 32>}, {pipeline_mode = #tpu.pipeline_mode<synchronous>, transform_indices = @transform_9, window_bounds = array<i64: 2, 1, 32>}, {pipeline_mode = #tpu.pipeline_mode<synchronous>, transform_indices = @transform_10, window_bounds = array<i64: 2, 32, 32>}, {pipeline_mode = #tpu.pipeline_mode<synchronous>, transform_indices = @transform_11, window_bounds = array<i64: 2, 1, 32>}, {pipeline_mode = #tpu.pipeline_mode<synchronous>, transform_indices = @transform_12, window_bounds = array<i64: 2, 32, 64>}, {pipeline_mode = #tpu.pipeline_mode<synchronous>, transform_indices = @transform_13, window_bounds = array<i64: 2, 1, 64>}, {pipeline_mode = #tpu.pipeline_mode<synchronous>, transform_indices = @transform_14, window_bounds = array<i64: 2, 32, 32>}, {pipeline_mode = #tpu.pipeline_mode<synchronous>, transform_indices = @transform_15, window_bounds = array<i64: 2, 1, 32>}, {pipeline_mode = #tpu.pipeline_mode<synchronous>, transform_indices = @transform_16, window_bounds = array<i64: 2, 32, 64>}, {pipeline_mode = #tpu.pipeline_mode<synchronous>, transform_indices = @transform_17, window_bounds = array<i64: 2, 1, 64>}, {pipeline_mode = #tpu.pipeline_mode<synchronous>, transform_indices = @transform_18, window_bounds = array<i64: 2, 64, 32>}, {pipeline_mode = #tpu.pipeline_mode<synchronous>, transform_indices = @transform_19, window_bounds = array<i64: 2, 1, 32>}, {pipeline_mode = #tpu.pipeline_mode<synchronous>, transform_indices = @transform_20, window_bounds = array<i64: 2, 3, 1, 32>}, {pipeline_mode = #tpu.pipeline_mode<synchronous>, transform_indices = @transform_21, window_bounds = array<i64: 2, 3, 1, 32>}, {pipeline_mode = #tpu.pipeline_mode<synchronous>, transform_indices = @transform_22, window_bounds = array<i64: 32, 128>}, {pipeline_mode = #tpu.pipeline_mode<synchronous>, transform_indices = @transform_23, window_bounds = array<i64: 1, 128>}, {transform_indices = @transform_24, window_bounds = array<i64: 1, 8, 128>}, {transform_indices = @transform_25, window_bounds = array<i64: 1, 2, 8, 32>}]} {
    %c0 = arith.constant 0 : index
    %c0_0 = arith.constant 0 : index
    %c0_1 = arith.constant 0 : index
    %0 = vector.load %arg1[%c0, %c0_0, %c0_1] : memref<1x8x1xi32, #tpu.memory_space<vmem>>, vector<1x8x1xi32>
    %1 = vector.shape_cast %0 : vector<1x8x1xi32> to vector<8x1xi32>
    %2 = tpu.iota {dimensions = array<i32: 1>} : vector<8x128xi32>
    %3 = vector.broadcast %1 : vector<8x1xi32> to vector<8x128xi32>
    %4 = arith.cmpi eq, %3, %2 : vector<8x128xi32>
    %5 = arith.extui %4 : vector<8x128xi1> to vector<8x128xi32>
    %6 = arith.sitofp %5 : vector<8x128xi32> to vector<8x128xf32>
    %c0_2 = arith.constant 0 : index
    %c0_3 = arith.constant 0 : index
    %7 = vector.load %arg6[%c0_2, %c0_3] : memref<128x32xf32, #tpu.memory_space<vmem>>, vector<128x32xf32>
    %cst = arith.constant dense<0.000000e+00> : vector<8x32xf32>
    %8 = tpu.matmul %6, %7, %cst {dimension_numbers = #tpu.dot_dimension_numbers<[1], [0], [0], [1], [0, 0, 1, 1], [], []>} : vector<8x128xf32>, vector<128x32xf32>, vector<8x32xf32> -> vector<8x32xf32>
    %cst_4 = arith.constant 5.65685415 : f32
    %9 = vector.broadcast %cst_4 : f32 to vector<8x32xf32>
    %10 = arith.mulf %8, %9 : vector<8x32xf32>
    %c0_5 = arith.constant 0 : index
    %c0_6 = arith.constant 0 : index
    %11 = vector.load %arg5[%c0_5, %c0_6] : memref<8x32xf32, #tpu.memory_space<vmem>>, vector<8x32xf32>
    %12 = arith.addf %10, %11 : vector<8x32xf32>
    %c0_7 = arith.constant 0 : index
    %c0_8 = arith.constant 0 : index
    %c0_9 = arith.constant 0 : index
    %13 = vector.load %arg2[%c0_7, %c0_8, %c0_9] : memref<1x8x32xf32, #tpu.memory_space<vmem>>, vector<1x8x32xf32>
    %14 = vector.shape_cast %13 : vector<1x8x32xf32> to vector<8x32xf32>
    %c0_10 = arith.constant 0 : index
    %c0_11 = arith.constant 0 : index
    %c0_12 = arith.constant 0 : index
    %15 = vector.load %arg3[%c0_10, %c0_11, %c0_12] : memref<1x8x8xf32, #tpu.memory_space<vmem>>, vector<1x8x8xf32>
    %16 = vector.shape_cast %15 : vector<1x8x8xf32> to vector<8x8xf32>
    %c0_13 = arith.constant 0 : index
    %c0_14 = arith.constant 0 : index
    %c0_15 = arith.constant 0 : index
    %17 = vector.load %arg4[%c0_13, %c0_14, %c0_15] : memref<1x1x8xf32, #tpu.memory_space<vmem>>, vector<1x1x8xf32>
    %18 = vector.shape_cast %17 : vector<1x1x8xf32> to vector<1x8xf32>
    %c0_16 = arith.constant 0 : index
    %c0_17 = arith.constant 0 : index
    %c0_18 = arith.constant 0 : index
    %19 = vector.load %arg7[%c0_16, %c0_17, %c0_18] : memref<2x32x96xf32, #tpu.memory_space<vmem>>, vector<1x32x96xf32>
    %20 = vector.shape_cast %19 : vector<1x32x96xf32> to vector<32x96xf32>
    %cst_19 = arith.constant dense<0.000000e+00> : vector<8x96xf32>
    %21 = tpu.matmul %12, %20, %cst_19 {dimension_numbers = #tpu.dot_dimension_numbers<[1], [0], [0], [1], [0, 0, 1, 1], [], []>} : vector<8x32xf32>, vector<32x96xf32>, vector<8x96xf32> -> vector<8x96xf32>
    %c0_20 = arith.constant 0 : index
    %c0_21 = arith.constant 0 : index
    %c0_22 = arith.constant 0 : index
    %22 = vector.load %arg8[%c0_20, %c0_21, %c0_22] : memref<2x1x96xf32, #tpu.memory_space<vmem>>, vector<1x1x96xf32>
    %23 = vector.shape_cast %22 : vector<1x1x96xf32> to vector<1x96xf32>
    %24 = vector.broadcast %23 : vector<1x96xf32> to vector<8x96xf32>
    %25 = arith.addf %21, %24 : vector<8x96xf32>
    %26 = vector.extract_strided_slice %25 {offsets = [0, 0], sizes = [8, 32], strides = [1, 1]} : vector<8x96xf32> to vector<8x32xf32>
    %27 = vector.extract_strided_slice %25 {offsets = [0, 32], sizes = [8, 32], strides = [1, 1]} : vector<8x96xf32> to vector<8x32xf32>
    %28 = vector.extract_strided_slice %25 {offsets = [0, 64], sizes = [8, 32], strides = [1, 1]} : vector<8x96xf32> to vector<8x32xf32>
    %c0_23 = arith.constant 0 : index
    %c0_24 = arith.constant 0 : index
    %c0_25 = arith.constant 0 : index
    %29 = vector.load %arg9[%c0_23, %c0_24, %c0_25] : memref<2x32x32xf32, #tpu.memory_space<vmem>>, vector<1x32x32xf32>
    %30 = vector.shape_cast %29 : vector<1x32x32xf32> to vector<32x32xf32>
    %31 = vector.extract_strided_slice %26 {offsets = [0, 0], sizes = [8, 8], strides = [1, 1]} : vector<8x32xf32> to vector<8x8xf32>
    %32 = vector.extract_strided_slice %27 {offsets = [0, 0], sizes = [8, 8], strides = [1, 1]} : vector<8x32xf32> to vector<8x8xf32>
    %33 = tpu.transpose %32, [1, 0] : vector<8x8xf32> -> vector<8x8xf32>
    %cst_26 = arith.constant dense<0.000000e+00> : vector<8x8xf32>
    %34 = tpu.matmul %31, %33, %cst_26 {dimension_numbers = #tpu.dot_dimension_numbers<[1], [0], [0], [1], [0, 0, 1, 1], [], []>} : vector<8x8xf32>, vector<8x8xf32>, vector<8x8xf32> -> vector<8x8xf32>
    %cst_27 = arith.constant 0.353553385 : f32
    %35 = vector.broadcast %cst_27 : f32 to vector<8x8xf32>
    %36 = arith.mulf %34, %35 : vector<8x8xf32>
    %37 = arith.addf %36, %16 : vector<8x8xf32>
    %cst_28 = arith.constant dense<0xFF800000> : vector<8xf32>
    %38 = vector.multi_reduction <maximumf>, %37, %cst_28 [1] : vector<8x8xf32> to vector<8xf32>
    %39 = vector.shape_cast %38 : vector<8xf32> to vector<8x1xf32>
    %40 = vector.broadcast %39 : vector<8x1xf32> to vector<8x8xf32>
    %41 = arith.subf %37, %40 : vector<8x8xf32>
    %42 = math.exp %41 : vector<8x8xf32>
    %cst_29 = arith.constant dense<0.000000e+00> : vector<8xf32>
    %43 = vector.multi_reduction <add>, %42, %cst_29 [1] : vector<8x8xf32> to vector<8xf32>
    %44 = vector.shape_cast %43 : vector<8xf32> to vector<8x1xf32>
    %45 = tpu.reciprocal %44 {approx = true} : vector<8x1xf32> -> vector<8x1xf32>
    %46 = arith.mulf %44, %45 : vector<8x1xf32>
    %cst_30 = arith.constant 2.000000e+00 : f32
    %47 = vector.broadcast %cst_30 : f32 to vector<8x1xf32>
    %48 = arith.subf %47, %46 : vector<8x1xf32>
    %49 = arith.mulf %45, %48 : vector<8x1xf32>
    %50 = vector.broadcast %49 : vector<8x1xf32> to vector<8x8xf32>
    %51 = arith.mulf %42, %50 : vector<8x8xf32>
    %52 = vector.extract_strided_slice %28 {offsets = [0, 0], sizes = [8, 8], strides = [1, 1]} : vector<8x32xf32> to vector<8x8xf32>
    %cst_31 = arith.constant dense<0.000000e+00> : vector<8x8xf32>
    %53 = tpu.matmul %51, %52, %cst_31 {dimension_numbers = #tpu.dot_dimension_numbers<[1], [0], [0], [1], [0, 0, 1, 1], [], []>} : vector<8x8xf32>, vector<8x8xf32>, vector<8x8xf32> -> vector<8x8xf32>
    %54 = vector.extract_strided_slice %30 {offsets = [0, 0], sizes = [8, 32], strides = [1, 1]} : vector<32x32xf32> to vector<8x32xf32>
    %cst_32 = arith.constant dense<0.000000e+00> : vector<8x32xf32>
    %55 = tpu.matmul %53, %54, %cst_32 {dimension_numbers = #tpu.dot_dimension_numbers<[1], [0], [0], [1], [0, 0, 1, 1], [], []>} : vector<8x8xf32>, vector<8x32xf32>, vector<8x32xf32> -> vector<8x32xf32>
    %56 = vector.extract_strided_slice %26 {offsets = [0, 8], sizes = [8, 8], strides = [1, 1]} : vector<8x32xf32> to vector<8x8xf32>
    %57 = vector.extract_strided_slice %27 {offsets = [0, 8], sizes = [8, 8], strides = [1, 1]} : vector<8x32xf32> to vector<8x8xf32>
    %58 = tpu.transpose %57, [1, 0] : vector<8x8xf32> -> vector<8x8xf32>
    %cst_33 = arith.constant dense<0.000000e+00> : vector<8x8xf32>
    %59 = tpu.matmul %56, %58, %cst_33 {dimension_numbers = #tpu.dot_dimension_numbers<[1], [0], [0], [1], [0, 0, 1, 1], [], []>} : vector<8x8xf32>, vector<8x8xf32>, vector<8x8xf32> -> vector<8x8xf32>
    %cst_34 = arith.constant 0.353553385 : f32
    %60 = vector.broadcast %cst_34 : f32 to vector<8x8xf32>
    %61 = arith.mulf %59, %60 : vector<8x8xf32>
    %62 = arith.addf %61, %16 : vector<8x8xf32>
    %cst_35 = arith.constant dense<0xFF800000> : vector<8xf32>
    %63 = vector.multi_reduction <maximumf>, %62, %cst_35 [1] : vector<8x8xf32> to vector<8xf32>
    %64 = vector.shape_cast %63 : vector<8xf32> to vector<8x1xf32>
    %65 = vector.broadcast %64 : vector<8x1xf32> to vector<8x8xf32>
    %66 = arith.subf %62, %65 : vector<8x8xf32>
    %67 = math.exp %66 : vector<8x8xf32>
    %cst_36 = arith.constant dense<0.000000e+00> : vector<8xf32>
    %68 = vector.multi_reduction <add>, %67, %cst_36 [1] : vector<8x8xf32> to vector<8xf32>
    %69 = vector.shape_cast %68 : vector<8xf32> to vector<8x1xf32>
    %70 = tpu.reciprocal %69 {approx = true} : vector<8x1xf32> -> vector<8x1xf32>
    %71 = arith.mulf %69, %70 : vector<8x1xf32>
    %cst_37 = arith.constant 2.000000e+00 : f32
    %72 = vector.broadcast %cst_37 : f32 to vector<8x1xf32>
    %73 = arith.subf %72, %71 : vector<8x1xf32>
    %74 = arith.mulf %70, %73 : vector<8x1xf32>
    %75 = vector.broadcast %74 : vector<8x1xf32> to vector<8x8xf32>
    %76 = arith.mulf %67, %75 : vector<8x8xf32>
    %77 = vector.extract_strided_slice %28 {offsets = [0, 8], sizes = [8, 8], strides = [1, 1]} : vector<8x32xf32> to vector<8x8xf32>
    %cst_38 = arith.constant dense<0.000000e+00> : vector<8x8xf32>
    %78 = tpu.matmul %76, %77, %cst_38 {dimension_numbers = #tpu.dot_dimension_numbers<[1], [0], [0], [1], [0, 0, 1, 1], [], []>} : vector<8x8xf32>, vector<8x8xf32>, vector<8x8xf32> -> vector<8x8xf32>
    %79 = vector.extract_strided_slice %30 {offsets = [8, 0], sizes = [8, 32], strides = [1, 1]} : vector<32x32xf32> to vector<8x32xf32>
    %cst_39 = arith.constant dense<0.000000e+00> : vector<8x32xf32>
    %80 = tpu.matmul %78, %79, %cst_39 {dimension_numbers = #tpu.dot_dimension_numbers<[1], [0], [0], [1], [0, 0, 1, 1], [], []>} : vector<8x8xf32>, vector<8x32xf32>, vector<8x32xf32> -> vector<8x32xf32>
    %81 = arith.addf %55, %80 : vector<8x32xf32>
    %82 = vector.extract_strided_slice %26 {offsets = [0, 16], sizes = [8, 8], strides = [1, 1]} : vector<8x32xf32> to vector<8x8xf32>
    %83 = vector.extract_strided_slice %27 {offsets = [0, 16], sizes = [8, 8], strides = [1, 1]} : vector<8x32xf32> to vector<8x8xf32>
    %84 = tpu.transpose %83, [1, 0] : vector<8x8xf32> -> vector<8x8xf32>
    %cst_40 = arith.constant dense<0.000000e+00> : vector<8x8xf32>
    %85 = tpu.matmul %82, %84, %cst_40 {dimension_numbers = #tpu.dot_dimension_numbers<[1], [0], [0], [1], [0, 0, 1, 1], [], []>} : vector<8x8xf32>, vector<8x8xf32>, vector<8x8xf32> -> vector<8x8xf32>
    %cst_41 = arith.constant 0.353553385 : f32
    %86 = vector.broadcast %cst_41 : f32 to vector<8x8xf32>
    %87 = arith.mulf %85, %86 : vector<8x8xf32>
    %88 = arith.addf %87, %16 : vector<8x8xf32>
    %cst_42 = arith.constant dense<0xFF800000> : vector<8xf32>
    %89 = vector.multi_reduction <maximumf>, %88, %cst_42 [1] : vector<8x8xf32> to vector<8xf32>
    %90 = vector.shape_cast %89 : vector<8xf32> to vector<8x1xf32>
    %91 = vector.broadcast %90 : vector<8x1xf32> to vector<8x8xf32>
    %92 = arith.subf %88, %91 : vector<8x8xf32>
    %93 = math.exp %92 : vector<8x8xf32>
    %cst_43 = arith.constant dense<0.000000e+00> : vector<8xf32>
    %94 = vector.multi_reduction <add>, %93, %cst_43 [1] : vector<8x8xf32> to vector<8xf32>
    %95 = vector.shape_cast %94 : vector<8xf32> to vector<8x1xf32>
    %96 = tpu.reciprocal %95 {approx = true} : vector<8x1xf32> -> vector<8x1xf32>
    %97 = arith.mulf %95, %96 : vector<8x1xf32>
    %cst_44 = arith.constant 2.000000e+00 : f32
    %98 = vector.broadcast %cst_44 : f32 to vector<8x1xf32>
    %99 = arith.subf %98, %97 : vector<8x1xf32>
    %100 = arith.mulf %96, %99 : vector<8x1xf32>
    %101 = vector.broadcast %100 : vector<8x1xf32> to vector<8x8xf32>
    %102 = arith.mulf %93, %101 : vector<8x8xf32>
    %103 = vector.extract_strided_slice %28 {offsets = [0, 16], sizes = [8, 8], strides = [1, 1]} : vector<8x32xf32> to vector<8x8xf32>
    %cst_45 = arith.constant dense<0.000000e+00> : vector<8x8xf32>
    %104 = tpu.matmul %102, %103, %cst_45 {dimension_numbers = #tpu.dot_dimension_numbers<[1], [0], [0], [1], [0, 0, 1, 1], [], []>} : vector<8x8xf32>, vector<8x8xf32>, vector<8x8xf32> -> vector<8x8xf32>
    %105 = vector.extract_strided_slice %30 {offsets = [16, 0], sizes = [8, 32], strides = [1, 1]} : vector<32x32xf32> to vector<8x32xf32>
    %cst_46 = arith.constant dense<0.000000e+00> : vector<8x32xf32>
    %106 = tpu.matmul %104, %105, %cst_46 {dimension_numbers = #tpu.dot_dimension_numbers<[1], [0], [0], [1], [0, 0, 1, 1], [], []>} : vector<8x8xf32>, vector<8x32xf32>, vector<8x32xf32> -> vector<8x32xf32>
    %107 = arith.addf %81, %106 : vector<8x32xf32>
    %108 = vector.extract_strided_slice %26 {offsets = [0, 24], sizes = [8, 8], strides = [1, 1]} : vector<8x32xf32> to vector<8x8xf32>
    %109 = vector.extract_strided_slice %27 {offsets = [0, 24], sizes = [8, 8], strides = [1, 1]} : vector<8x32xf32> to vector<8x8xf32>
    %110 = tpu.transpose %109, [1, 0] : vector<8x8xf32> -> vector<8x8xf32>
    %cst_47 = arith.constant dense<0.000000e+00> : vector<8x8xf32>
    %111 = tpu.matmul %108, %110, %cst_47 {dimension_numbers = #tpu.dot_dimension_numbers<[1], [0], [0], [1], [0, 0, 1, 1], [], []>} : vector<8x8xf32>, vector<8x8xf32>, vector<8x8xf32> -> vector<8x8xf32>
    %cst_48 = arith.constant 0.353553385 : f32
    %112 = vector.broadcast %cst_48 : f32 to vector<8x8xf32>
    %113 = arith.mulf %111, %112 : vector<8x8xf32>
    %114 = arith.addf %113, %16 : vector<8x8xf32>
    %cst_49 = arith.constant dense<0xFF800000> : vector<8xf32>
    %115 = vector.multi_reduction <maximumf>, %114, %cst_49 [1] : vector<8x8xf32> to vector<8xf32>
    %116 = vector.shape_cast %115 : vector<8xf32> to vector<8x1xf32>
    %117 = vector.broadcast %116 : vector<8x1xf32> to vector<8x8xf32>
    %118 = arith.subf %114, %117 : vector<8x8xf32>
    %119 = math.exp %118 : vector<8x8xf32>
    %cst_50 = arith.constant dense<0.000000e+00> : vector<8xf32>
    %120 = vector.multi_reduction <add>, %119, %cst_50 [1] : vector<8x8xf32> to vector<8xf32>
    %121 = vector.shape_cast %120 : vector<8xf32> to vector<8x1xf32>
    %122 = tpu.reciprocal %121 {approx = true} : vector<8x1xf32> -> vector<8x1xf32>
    %123 = arith.mulf %121, %122 : vector<8x1xf32>
    %cst_51 = arith.constant 2.000000e+00 : f32
    %124 = vector.broadcast %cst_51 : f32 to vector<8x1xf32>
    %125 = arith.subf %124, %123 : vector<8x1xf32>
    %126 = arith.mulf %122, %125 : vector<8x1xf32>
    %127 = vector.broadcast %126 : vector<8x1xf32> to vector<8x8xf32>
    %128 = arith.mulf %119, %127 : vector<8x8xf32>
    %129 = vector.extract_strided_slice %28 {offsets = [0, 24], sizes = [8, 8], strides = [1, 1]} : vector<8x32xf32> to vector<8x8xf32>
    %cst_52 = arith.constant dense<0.000000e+00> : vector<8x8xf32>
    %130 = tpu.matmul %128, %129, %cst_52 {dimension_numbers = #tpu.dot_dimension_numbers<[1], [0], [0], [1], [0, 0, 1, 1], [], []>} : vector<8x8xf32>, vector<8x8xf32>, vector<8x8xf32> -> vector<8x8xf32>
    %131 = vector.extract_strided_slice %30 {offsets = [24, 0], sizes = [8, 32], strides = [1, 1]} : vector<32x32xf32> to vector<8x32xf32>
    %cst_53 = arith.constant dense<0.000000e+00> : vector<8x32xf32>
    %132 = tpu.matmul %130, %131, %cst_53 {dimension_numbers = #tpu.dot_dimension_numbers<[1], [0], [0], [1], [0, 0, 1, 1], [], []>} : vector<8x8xf32>, vector<8x32xf32>, vector<8x32xf32> -> vector<8x32xf32>
    %133 = arith.addf %107, %132 : vector<8x32xf32>
    %134 = arith.addf %12, %133 : vector<8x32xf32>
    %c0_54 = arith.constant 0 : index
    %c0_55 = arith.constant 0 : index
    %c0_56 = arith.constant 0 : index
    %135 = vector.load %arg10[%c0_54, %c0_55, %c0_56] : memref<2x1x32xf32, #tpu.memory_space<vmem>>, vector<1x1x32xf32>
    %136 = vector.shape_cast %135 : vector<1x1x32xf32> to vector<1x32xf32>
    %137 = vector.broadcast %136 : vector<1x32xf32> to vector<8x32xf32>
    %138 = arith.addf %134, %137 : vector<8x32xf32>
    %c0_57 = arith.constant 0 : index
    %c0_58 = arith.constant 0 : index
    %c0_59 = arith.constant 0 : index
    %c0_60 = arith.constant 0 : index
    %139 = vector.load %arg21[%c0_57, %c0_58, %c0_59, %c0_60] : memref<2x3x1x32xf32, #tpu.memory_space<vmem>>, vector<1x1x1x32xf32>
    %140 = vector.shape_cast %139 : vector<1x1x1x32xf32> to vector<1x32xf32>
    %c0_61 = arith.constant 0 : index
    %c0_62 = arith.constant 0 : index
    %c0_63 = arith.constant 0 : index
    %c0_64 = arith.constant 0 : index
    %141 = vector.load %arg22[%c0_61, %c0_62, %c0_63, %c0_64] : memref<2x3x1x32xf32, #tpu.memory_space<vmem>>, vector<1x1x1x32xf32>
    %142 = vector.shape_cast %141 : vector<1x1x1x32xf32> to vector<1x32xf32>
    %cst_65 = arith.constant dense<0.000000e+00> : vector<8xf32>
    %143 = vector.multi_reduction <add>, %138, %cst_65 [1] : vector<8x32xf32> to vector<8xf32>
    %144 = vector.shape_cast %143 : vector<8xf32> to vector<8x1xf32>
    %cst_66 = arith.constant 3.200000e+01 : f32
    %145 = vector.broadcast %cst_66 : f32 to vector<8x1xf32>
    %146 = arith.divf %144, %145 : vector<8x1xf32>
    %147 = vector.broadcast %146 : vector<8x1xf32> to vector<8x32xf32>
    %148 = arith.subf %138, %147 : vector<8x32xf32>
    %149 = arith.mulf %148, %148 : vector<8x32xf32>
    %cst_67 = arith.constant dense<0.000000e+00> : vector<8xf32>
    %150 = vector.multi_reduction <add>, %149, %cst_67 [1] : vector<8x32xf32> to vector<8xf32>
    %151 = vector.shape_cast %150 : vector<8xf32> to vector<8x1xf32>
    %cst_68 = arith.constant 3.200000e+01 : f32
    %152 = vector.broadcast %cst_68 : f32 to vector<8x1xf32>
    %153 = arith.divf %151, %152 : vector<8x1xf32>
    %154 = vector.broadcast %146 : vector<8x1xf32> to vector<8x32xf32>
    %155 = arith.subf %138, %154 : vector<8x32xf32>
    %cst_69 = arith.constant 9.99999974E-6 : f32
    %156 = vector.broadcast %cst_69 : f32 to vector<8x1xf32>
    %157 = arith.addf %153, %156 : vector<8x1xf32>
    %158 = math.rsqrt %157 : vector<8x1xf32>
    %159 = vector.broadcast %158 : vector<8x1xf32> to vector<8x32xf32>
    %160 = arith.mulf %155, %159 : vector<8x32xf32>
    %161 = vector.broadcast %140 : vector<1x32xf32> to vector<8x32xf32>
    %162 = arith.mulf %160, %161 : vector<8x32xf32>
    %163 = vector.broadcast %142 : vector<1x32xf32> to vector<8x32xf32>
    %164 = arith.addf %162, %163 : vector<8x32xf32>
    %c0_70 = arith.constant 0 : index
    %c0_71 = arith.constant 0 : index
    %c0_72 = arith.constant 0 : index
    %165 = vector.load %arg11[%c0_70, %c0_71, %c0_72] : memref<2x32x32xf32, #tpu.memory_space<vmem>>, vector<1x32x32xf32>
    %166 = vector.shape_cast %165 : vector<1x32x32xf32> to vector<32x32xf32>
    %cst_73 = arith.constant dense<0.000000e+00> : vector<8x32xf32>
    %167 = tpu.matmul %164, %166, %cst_73 {dimension_numbers = #tpu.dot_dimension_numbers<[1], [0], [0], [1], [0, 0, 1, 1], [], []>} : vector<8x32xf32>, vector<32x32xf32>, vector<8x32xf32> -> vector<8x32xf32>
    %c0_74 = arith.constant 0 : index
    %c0_75 = arith.constant 0 : index
    %c0_76 = arith.constant 0 : index
    %168 = vector.load %arg12[%c0_74, %c0_75, %c0_76] : memref<2x1x32xf32, #tpu.memory_space<vmem>>, vector<1x1x32xf32>
    %169 = vector.shape_cast %168 : vector<1x1x32xf32> to vector<1x32xf32>
    %170 = vector.broadcast %169 : vector<1x32xf32> to vector<8x32xf32>
    %171 = arith.addf %167, %170 : vector<8x32xf32>
    %c0_77 = arith.constant 0 : index
    %c0_78 = arith.constant 0 : index
    %c0_79 = arith.constant 0 : index
    %172 = vector.load %arg13[%c0_77, %c0_78, %c0_79] : memref<2x32x64xf32, #tpu.memory_space<vmem>>, vector<1x32x64xf32>
    %173 = vector.shape_cast %172 : vector<1x32x64xf32> to vector<32x64xf32>
    %cst_80 = arith.constant dense<0.000000e+00> : vector<8x64xf32>
    %174 = tpu.matmul %14, %173, %cst_80 {dimension_numbers = #tpu.dot_dimension_numbers<[1], [0], [0], [1], [0, 0, 1, 1], [], []>} : vector<8x32xf32>, vector<32x64xf32>, vector<8x64xf32> -> vector<8x64xf32>
    %c0_81 = arith.constant 0 : index
    %c0_82 = arith.constant 0 : index
    %c0_83 = arith.constant 0 : index
    %175 = vector.load %arg14[%c0_81, %c0_82, %c0_83] : memref<2x1x64xf32, #tpu.memory_space<vmem>>, vector<1x1x64xf32>
    %176 = vector.shape_cast %175 : vector<1x1x64xf32> to vector<1x64xf32>
    %177 = vector.broadcast %176 : vector<1x64xf32> to vector<8x64xf32>
    %178 = arith.addf %174, %177 : vector<8x64xf32>
    %179 = vector.extract_strided_slice %178 {offsets = [0, 0], sizes = [8, 32], strides = [1, 1]} : vector<8x64xf32> to vector<8x32xf32>
    %180 = vector.extract_strided_slice %178 {offsets = [0, 32], sizes = [8, 32], strides = [1, 1]} : vector<8x64xf32> to vector<8x32xf32>
    %c0_84 = arith.constant 0 : index
    %c0_85 = arith.constant 0 : index
    %c0_86 = arith.constant 0 : index
    %181 = vector.load %arg15[%c0_84, %c0_85, %c0_86] : memref<2x32x32xf32, #tpu.memory_space<vmem>>, vector<1x32x32xf32>
    %182 = vector.shape_cast %181 : vector<1x32x32xf32> to vector<32x32xf32>
    %183 = vector.extract_strided_slice %171 {offsets = [0, 0], sizes = [8, 8], strides = [1, 1]} : vector<8x32xf32> to vector<8x8xf32>
    %184 = vector.extract_strided_slice %179 {offsets = [0, 0], sizes = [8, 8], strides = [1, 1]} : vector<8x32xf32> to vector<8x8xf32>
    %185 = tpu.transpose %184, [1, 0] : vector<8x8xf32> -> vector<8x8xf32>
    %cst_87 = arith.constant dense<0.000000e+00> : vector<8x8xf32>
    %186 = tpu.matmul %183, %185, %cst_87 {dimension_numbers = #tpu.dot_dimension_numbers<[1], [0], [0], [1], [0, 0, 1, 1], [], []>} : vector<8x8xf32>, vector<8x8xf32>, vector<8x8xf32> -> vector<8x8xf32>
    %cst_88 = arith.constant 0.353553385 : f32
    %187 = vector.broadcast %cst_88 : f32 to vector<8x8xf32>
    %188 = arith.mulf %186, %187 : vector<8x8xf32>
    %189 = vector.broadcast %18 : vector<1x8xf32> to vector<8x8xf32>
    %190 = arith.addf %188, %189 : vector<8x8xf32>
    %cst_89 = arith.constant dense<0xFF800000> : vector<8xf32>
    %191 = vector.multi_reduction <maximumf>, %190, %cst_89 [1] : vector<8x8xf32> to vector<8xf32>
    %192 = vector.shape_cast %191 : vector<8xf32> to vector<8x1xf32>
    %193 = vector.broadcast %192 : vector<8x1xf32> to vector<8x8xf32>
    %194 = arith.subf %190, %193 : vector<8x8xf32>
    %195 = math.exp %194 : vector<8x8xf32>
    %cst_90 = arith.constant dense<0.000000e+00> : vector<8xf32>
    %196 = vector.multi_reduction <add>, %195, %cst_90 [1] : vector<8x8xf32> to vector<8xf32>
    %197 = vector.shape_cast %196 : vector<8xf32> to vector<8x1xf32>
    %198 = tpu.reciprocal %197 {approx = true} : vector<8x1xf32> -> vector<8x1xf32>
    %199 = arith.mulf %197, %198 : vector<8x1xf32>
    %cst_91 = arith.constant 2.000000e+00 : f32
    %200 = vector.broadcast %cst_91 : f32 to vector<8x1xf32>
    %201 = arith.subf %200, %199 : vector<8x1xf32>
    %202 = arith.mulf %198, %201 : vector<8x1xf32>
    %203 = vector.broadcast %202 : vector<8x1xf32> to vector<8x8xf32>
    %204 = arith.mulf %195, %203 : vector<8x8xf32>
    %205 = vector.extract_strided_slice %180 {offsets = [0, 0], sizes = [8, 8], strides = [1, 1]} : vector<8x32xf32> to vector<8x8xf32>
    %cst_92 = arith.constant dense<0.000000e+00> : vector<8x8xf32>
    %206 = tpu.matmul %204, %205, %cst_92 {dimension_numbers = #tpu.dot_dimension_numbers<[1], [0], [0], [1], [0, 0, 1, 1], [], []>} : vector<8x8xf32>, vector<8x8xf32>, vector<8x8xf32> -> vector<8x8xf32>
    %207 = vector.extract_strided_slice %182 {offsets = [0, 0], sizes = [8, 32], strides = [1, 1]} : vector<32x32xf32> to vector<8x32xf32>
    %cst_93 = arith.constant dense<0.000000e+00> : vector<8x32xf32>
    %208 = tpu.matmul %206, %207, %cst_93 {dimension_numbers = #tpu.dot_dimension_numbers<[1], [0], [0], [1], [0, 0, 1, 1], [], []>} : vector<8x8xf32>, vector<8x32xf32>, vector<8x32xf32> -> vector<8x32xf32>
    %209 = vector.extract_strided_slice %171 {offsets = [0, 8], sizes = [8, 8], strides = [1, 1]} : vector<8x32xf32> to vector<8x8xf32>
    %210 = vector.extract_strided_slice %179 {offsets = [0, 8], sizes = [8, 8], strides = [1, 1]} : vector<8x32xf32> to vector<8x8xf32>
    %211 = tpu.transpose %210, [1, 0] : vector<8x8xf32> -> vector<8x8xf32>
    %cst_94 = arith.constant dense<0.000000e+00> : vector<8x8xf32>
    %212 = tpu.matmul %209, %211, %cst_94 {dimension_numbers = #tpu.dot_dimension_numbers<[1], [0], [0], [1], [0, 0, 1, 1], [], []>} : vector<8x8xf32>, vector<8x8xf32>, vector<8x8xf32> -> vector<8x8xf32>
    %cst_95 = arith.constant 0.353553385 : f32
    %213 = vector.broadcast %cst_95 : f32 to vector<8x8xf32>
    %214 = arith.mulf %212, %213 : vector<8x8xf32>
    %215 = vector.broadcast %18 : vector<1x8xf32> to vector<8x8xf32>
    %216 = arith.addf %214, %215 : vector<8x8xf32>
    %cst_96 = arith.constant dense<0xFF800000> : vector<8xf32>
    %217 = vector.multi_reduction <maximumf>, %216, %cst_96 [1] : vector<8x8xf32> to vector<8xf32>
    %218 = vector.shape_cast %217 : vector<8xf32> to vector<8x1xf32>
    %219 = vector.broadcast %218 : vector<8x1xf32> to vector<8x8xf32>
    %220 = arith.subf %216, %219 : vector<8x8xf32>
    %221 = math.exp %220 : vector<8x8xf32>
    %cst_97 = arith.constant dense<0.000000e+00> : vector<8xf32>
    %222 = vector.multi_reduction <add>, %221, %cst_97 [1] : vector<8x8xf32> to vector<8xf32>
    %223 = vector.shape_cast %222 : vector<8xf32> to vector<8x1xf32>
    %224 = tpu.reciprocal %223 {approx = true} : vector<8x1xf32> -> vector<8x1xf32>
    %225 = arith.mulf %223, %224 : vector<8x1xf32>
    %cst_98 = arith.constant 2.000000e+00 : f32
    %226 = vector.broadcast %cst_98 : f32 to vector<8x1xf32>
    %227 = arith.subf %226, %225 : vector<8x1xf32>
    %228 = arith.mulf %224, %227 : vector<8x1xf32>
    %229 = vector.broadcast %228 : vector<8x1xf32> to vector<8x8xf32>
    %230 = arith.mulf %221, %229 : vector<8x8xf32>
    %231 = vector.extract_strided_slice %180 {offsets = [0, 8], sizes = [8, 8], strides = [1, 1]} : vector<8x32xf32> to vector<8x8xf32>
    %cst_99 = arith.constant dense<0.000000e+00> : vector<8x8xf32>
    %232 = tpu.matmul %230, %231, %cst_99 {dimension_numbers = #tpu.dot_dimension_numbers<[1], [0], [0], [1], [0, 0, 1, 1], [], []>} : vector<8x8xf32>, vector<8x8xf32>, vector<8x8xf32> -> vector<8x8xf32>
    %233 = vector.extract_strided_slice %182 {offsets = [8, 0], sizes = [8, 32], strides = [1, 1]} : vector<32x32xf32> to vector<8x32xf32>
    %cst_100 = arith.constant dense<0.000000e+00> : vector<8x32xf32>
    %234 = tpu.matmul %232, %233, %cst_100 {dimension_numbers = #tpu.dot_dimension_numbers<[1], [0], [0], [1], [0, 0, 1, 1], [], []>} : vector<8x8xf32>, vector<8x32xf32>, vector<8x32xf32> -> vector<8x32xf32>
    %235 = arith.addf %208, %234 : vector<8x32xf32>
    %236 = vector.extract_strided_slice %171 {offsets = [0, 16], sizes = [8, 8], strides = [1, 1]} : vector<8x32xf32> to vector<8x8xf32>
    %237 = vector.extract_strided_slice %179 {offsets = [0, 16], sizes = [8, 8], strides = [1, 1]} : vector<8x32xf32> to vector<8x8xf32>
    %238 = tpu.transpose %237, [1, 0] : vector<8x8xf32> -> vector<8x8xf32>
    %cst_101 = arith.constant dense<0.000000e+00> : vector<8x8xf32>
    %239 = tpu.matmul %236, %238, %cst_101 {dimension_numbers = #tpu.dot_dimension_numbers<[1], [0], [0], [1], [0, 0, 1, 1], [], []>} : vector<8x8xf32>, vector<8x8xf32>, vector<8x8xf32> -> vector<8x8xf32>
    %cst_102 = arith.constant 0.353553385 : f32
    %240 = vector.broadcast %cst_102 : f32 to vector<8x8xf32>
    %241 = arith.mulf %239, %240 : vector<8x8xf32>
    %242 = vector.broadcast %18 : vector<1x8xf32> to vector<8x8xf32>
    %243 = arith.addf %241, %242 : vector<8x8xf32>
    %cst_103 = arith.constant dense<0xFF800000> : vector<8xf32>
    %244 = vector.multi_reduction <maximumf>, %243, %cst_103 [1] : vector<8x8xf32> to vector<8xf32>
    %245 = vector.shape_cast %244 : vector<8xf32> to vector<8x1xf32>
    %246 = vector.broadcast %245 : vector<8x1xf32> to vector<8x8xf32>
    %247 = arith.subf %243, %246 : vector<8x8xf32>
    %248 = math.exp %247 : vector<8x8xf32>
    %cst_104 = arith.constant dense<0.000000e+00> : vector<8xf32>
    %249 = vector.multi_reduction <add>, %248, %cst_104 [1] : vector<8x8xf32> to vector<8xf32>
    %250 = vector.shape_cast %249 : vector<8xf32> to vector<8x1xf32>
    %251 = tpu.reciprocal %250 {approx = true} : vector<8x1xf32> -> vector<8x1xf32>
    %252 = arith.mulf %250, %251 : vector<8x1xf32>
    %cst_105 = arith.constant 2.000000e+00 : f32
    %253 = vector.broadcast %cst_105 : f32 to vector<8x1xf32>
    %254 = arith.subf %253, %252 : vector<8x1xf32>
    %255 = arith.mulf %251, %254 : vector<8x1xf32>
    %256 = vector.broadcast %255 : vector<8x1xf32> to vector<8x8xf32>
    %257 = arith.mulf %248, %256 : vector<8x8xf32>
    %258 = vector.extract_strided_slice %180 {offsets = [0, 16], sizes = [8, 8], strides = [1, 1]} : vector<8x32xf32> to vector<8x8xf32>
    %cst_106 = arith.constant dense<0.000000e+00> : vector<8x8xf32>
    %259 = tpu.matmul %257, %258, %cst_106 {dimension_numbers = #tpu.dot_dimension_numbers<[1], [0], [0], [1], [0, 0, 1, 1], [], []>} : vector<8x8xf32>, vector<8x8xf32>, vector<8x8xf32> -> vector<8x8xf32>
    %260 = vector.extract_strided_slice %182 {offsets = [16, 0], sizes = [8, 32], strides = [1, 1]} : vector<32x32xf32> to vector<8x32xf32>
    %cst_107 = arith.constant dense<0.000000e+00> : vector<8x32xf32>
    %261 = tpu.matmul %259, %260, %cst_107 {dimension_numbers = #tpu.dot_dimension_numbers<[1], [0], [0], [1], [0, 0, 1, 1], [], []>} : vector<8x8xf32>, vector<8x32xf32>, vector<8x32xf32> -> vector<8x32xf32>
    %262 = arith.addf %235, %261 : vector<8x32xf32>
    %263 = vector.extract_strided_slice %171 {offsets = [0, 24], sizes = [8, 8], strides = [1, 1]} : vector<8x32xf32> to vector<8x8xf32>
    %264 = vector.extract_strided_slice %179 {offsets = [0, 24], sizes = [8, 8], strides = [1, 1]} : vector<8x32xf32> to vector<8x8xf32>
    %265 = tpu.transpose %264, [1, 0] : vector<8x8xf32> -> vector<8x8xf32>
    %cst_108 = arith.constant dense<0.000000e+00> : vector<8x8xf32>
    %266 = tpu.matmul %263, %265, %cst_108 {dimension_numbers = #tpu.dot_dimension_numbers<[1], [0], [0], [1], [0, 0, 1, 1], [], []>} : vector<8x8xf32>, vector<8x8xf32>, vector<8x8xf32> -> vector<8x8xf32>
    %cst_109 = arith.constant 0.353553385 : f32
    %267 = vector.broadcast %cst_109 : f32 to vector<8x8xf32>
    %268 = arith.mulf %266, %267 : vector<8x8xf32>
    %269 = vector.broadcast %18 : vector<1x8xf32> to vector<8x8xf32>
    %270 = arith.addf %268, %269 : vector<8x8xf32>
    %cst_110 = arith.constant dense<0xFF800000> : vector<8xf32>
    %271 = vector.multi_reduction <maximumf>, %270, %cst_110 [1] : vector<8x8xf32> to vector<8xf32>
    %272 = vector.shape_cast %271 : vector<8xf32> to vector<8x1xf32>
    %273 = vector.broadcast %272 : vector<8x1xf32> to vector<8x8xf32>
    %274 = arith.subf %270, %273 : vector<8x8xf32>
    %275 = math.exp %274 : vector<8x8xf32>
    %cst_111 = arith.constant dense<0.000000e+00> : vector<8xf32>
    %276 = vector.multi_reduction <add>, %275, %cst_111 [1] : vector<8x8xf32> to vector<8xf32>
    %277 = vector.shape_cast %276 : vector<8xf32> to vector<8x1xf32>
    %278 = tpu.reciprocal %277 {approx = true} : vector<8x1xf32> -> vector<8x1xf32>
    %279 = arith.mulf %277, %278 : vector<8x1xf32>
    %cst_112 = arith.constant 2.000000e+00 : f32
    %280 = vector.broadcast %cst_112 : f32 to vector<8x1xf32>
    %281 = arith.subf %280, %279 : vector<8x1xf32>
    %282 = arith.mulf %278, %281 : vector<8x1xf32>
    %283 = vector.broadcast %282 : vector<8x1xf32> to vector<8x8xf32>
    %284 = arith.mulf %275, %283 : vector<8x8xf32>
    %285 = vector.extract_strided_slice %180 {offsets = [0, 24], sizes = [8, 8], strides = [1, 1]} : vector<8x32xf32> to vector<8x8xf32>
    %cst_113 = arith.constant dense<0.000000e+00> : vector<8x8xf32>
    %286 = tpu.matmul %284, %285, %cst_113 {dimension_numbers = #tpu.dot_dimension_numbers<[1], [0], [0], [1], [0, 0, 1, 1], [], []>} : vector<8x8xf32>, vector<8x8xf32>, vector<8x8xf32> -> vector<8x8xf32>
    %287 = vector.extract_strided_slice %182 {offsets = [24, 0], sizes = [8, 32], strides = [1, 1]} : vector<32x32xf32> to vector<8x32xf32>
    %cst_114 = arith.constant dense<0.000000e+00> : vector<8x32xf32>
    %288 = tpu.matmul %286, %287, %cst_114 {dimension_numbers = #tpu.dot_dimension_numbers<[1], [0], [0], [1], [0, 0, 1, 1], [], []>} : vector<8x8xf32>, vector<8x32xf32>, vector<8x32xf32> -> vector<8x32xf32>
    %289 = arith.addf %262, %288 : vector<8x32xf32>
    %290 = tpu.concatenate %204, %230, %257, %284 in 1 : vector<8x8xf32>, vector<8x8xf32>, vector<8x8xf32>, vector<8x8xf32> -> vector<8x32xf32>
    %c0_115 = arith.constant 0 : index
    %c0_116 = arith.constant 0 : index
    %c0_117 = arith.constant 0 : index
    %c0_118 = arith.constant 0 : index
    %291 = vector.load %arg26[%c0_115, %c0_116, %c0_117, %c0_118] : memref<1x2x8x32xf32, #tpu.memory_space<vmem>>, vector<1x1x8x32xf32>
    %292 = vector.shape_cast %291 : vector<1x1x8x32xf32> to vector<8x32xf32>
    %293 = vector.shape_cast %290 : vector<8x32xf32> to vector<1x1x8x32xf32>
    tpu.vector_store %arg26[%c0_115, %c0_116, %c0_117, %c0_118], %293 {strides = array<i32>} : memref<1x2x8x32xf32, #tpu.memory_space<vmem>>, vector<1x1x8x32xf32>,
    %294 = arith.addf %164, %289 : vector<8x32xf32>
    %c0_119 = arith.constant 0 : index
    %c0_120 = arith.constant 0 : index
    %c0_121 = arith.constant 0 : index
    %295 = vector.load %arg16[%c0_119, %c0_120, %c0_121] : memref<2x1x32xf32, #tpu.memory_space<vmem>>, vector<1x1x32xf32>
    %296 = vector.shape_cast %295 : vector<1x1x32xf32> to vector<1x32xf32>
    %297 = vector.broadcast %296 : vector<1x32xf32> to vector<8x32xf32>
    %298 = arith.addf %294, %297 : vector<8x32xf32>
    %c0_122 = arith.constant 0 : index
    %c1 = arith.constant 1 : index
    %c0_123 = arith.constant 0 : index
    %c0_124 = arith.constant 0 : index
    %299 = vector.load %arg21[%c0_122, %c1, %c0_123, %c0_124] : memref<2x3x1x32xf32, #tpu.memory_space<vmem>>, vector<1x1x1x32xf32>
    %300 = vector.shape_cast %299 : vector<1x1x1x32xf32> to vector<1x32xf32>
    %c0_125 = arith.constant 0 : index
    %c1_126 = arith.constant 1 : index
    %c0_127 = arith.constant 0 : index
    %c0_128 = arith.constant 0 : index
    %301 = vector.load %arg22[%c0_125, %c1_126, %c0_127, %c0_128] : memref<2x3x1x32xf32, #tpu.memory_space<vmem>>, vector<1x1x1x32xf32>
    %302 = vector.shape_cast %301 : vector<1x1x1x32xf32> to vector<1x32xf32>
    %cst_129 = arith.constant dense<0.000000e+00> : vector<8xf32>
    %303 = vector.multi_reduction <add>, %298, %cst_129 [1] : vector<8x32xf32> to vector<8xf32>
    %304 = vector.shape_cast %303 : vector<8xf32> to vector<8x1xf32>
    %cst_130 = arith.constant 3.200000e+01 : f32
    %305 = vector.broadcast %cst_130 : f32 to vector<8x1xf32>
    %306 = arith.divf %304, %305 : vector<8x1xf32>
    %307 = vector.broadcast %306 : vector<8x1xf32> to vector<8x32xf32>
    %308 = arith.subf %298, %307 : vector<8x32xf32>
    %309 = arith.mulf %308, %308 : vector<8x32xf32>
    %cst_131 = arith.constant dense<0.000000e+00> : vector<8xf32>
    %310 = vector.multi_reduction <add>, %309, %cst_131 [1] : vector<8x32xf32> to vector<8xf32>
    %311 = vector.shape_cast %310 : vector<8xf32> to vector<8x1xf32>
    %cst_132 = arith.constant 3.200000e+01 : f32
    %312 = vector.broadcast %cst_132 : f32 to vector<8x1xf32>
    %313 = arith.divf %311, %312 : vector<8x1xf32>
    %314 = vector.broadcast %306 : vector<8x1xf32> to vector<8x32xf32>
    %315 = arith.subf %298, %314 : vector<8x32xf32>
    %cst_133 = arith.constant 9.99999974E-6 : f32
    %316 = vector.broadcast %cst_133 : f32 to vector<8x1xf32>
    %317 = arith.addf %313, %316 : vector<8x1xf32>
    %318 = math.rsqrt %317 : vector<8x1xf32>
    %319 = vector.broadcast %318 : vector<8x1xf32> to vector<8x32xf32>
    %320 = arith.mulf %315, %319 : vector<8x32xf32>
    %321 = vector.broadcast %300 : vector<1x32xf32> to vector<8x32xf32>
    %322 = arith.mulf %320, %321 : vector<8x32xf32>
    %323 = vector.broadcast %302 : vector<1x32xf32> to vector<8x32xf32>
    %324 = arith.addf %322, %323 : vector<8x32xf32>
    %c0_134 = arith.constant 0 : index
    %c0_135 = arith.constant 0 : index
    %c0_136 = arith.constant 0 : index
    %325 = vector.load %arg17[%c0_134, %c0_135, %c0_136] : memref<2x32x64xf32, #tpu.memory_space<vmem>>, vector<1x32x64xf32>
    %326 = vector.shape_cast %325 : vector<1x32x64xf32> to vector<32x64xf32>
    %cst_137 = arith.constant dense<0.000000e+00> : vector<8x64xf32>
    %327 = tpu.matmul %324, %326, %cst_137 {dimension_numbers = #tpu.dot_dimension_numbers<[1], [0], [0], [1], [0, 0, 1, 1], [], []>} : vector<8x32xf32>, vector<32x64xf32>, vector<8x64xf32> -> vector<8x64xf32>
    %c0_138 = arith.constant 0 : index
    %c0_139 = arith.constant 0 : index
    %c0_140 = arith.constant 0 : index
    %328 = vector.load %arg18[%c0_138, %c0_139, %c0_140] : memref<2x1x64xf32, #tpu.memory_space<vmem>>, vector<1x1x64xf32>
    %329 = vector.shape_cast %328 : vector<1x1x64xf32> to vector<1x64xf32>
    %330 = vector.broadcast %329 : vector<1x64xf32> to vector<8x64xf32>
    %331 = arith.addf %327, %330 : vector<8x64xf32>
    %cst_141 = arith.constant 0.000000e+00 : f32
    %332 = vector.broadcast %cst_141 : f32 to vector<8x64xf32>
    %333 = arith.maximumf %331, %332 : vector<8x64xf32>
    %c0_142 = arith.constant 0 : index
    %c0_143 = arith.constant 0 : index
    %c0_144 = arith.constant 0 : index
    %334 = vector.load %arg19[%c0_142, %c0_143, %c0_144] : memref<2x64x32xf32, #tpu.memory_space<vmem>>, vector<1x64x32xf32>
    %335 = vector.shape_cast %334 : vector<1x64x32xf32> to vector<64x32xf32>
    %cst_145 = arith.constant dense<0.000000e+00> : vector<8x32xf32>
    %336 = tpu.matmul %333, %335, %cst_145 {dimension_numbers = #tpu.dot_dimension_numbers<[1], [0], [0], [1], [0, 0, 1, 1], [], []>} : vector<8x64xf32>, vector<64x32xf32>, vector<8x32xf32> -> vector<8x32xf32>
    %c0_146 = arith.constant 0 : index
    %c0_147 = arith.constant 0 : index
    %c0_148 = arith.constant 0 : index
    %337 = vector.load %arg20[%c0_146, %c0_147, %c0_148] : memref<2x1x32xf32, #tpu.memory_space<vmem>>, vector<1x1x32xf32>
    %338 = vector.shape_cast %337 : vector<1x1x32xf32> to vector<1x32xf32>
    %339 = vector.broadcast %338 : vector<1x32xf32> to vector<8x32xf32>
    %340 = arith.addf %336, %339 : vector<8x32xf32>
    %341 = arith.addf %324, %340 : vector<8x32xf32>
    %c0_149 = arith.constant 0 : index
    %c2 = arith.constant 2 : index
    %c0_150 = arith.constant 0 : index
    %c0_151 = arith.constant 0 : index
    %342 = vector.load %arg21[%c0_149, %c2, %c0_150, %c0_151] : memref<2x3x1x32xf32, #tpu.memory_space<vmem>>, vector<1x1x1x32xf32>
    %343 = vector.shape_cast %342 : vector<1x1x1x32xf32> to vector<1x32xf32>
    %c0_152 = arith.constant 0 : index
    %c2_153 = arith.constant 2 : index
    %c0_154 = arith.constant 0 : index
    %c0_155 = arith.constant 0 : index
    %344 = vector.load %arg22[%c0_152, %c2_153, %c0_154, %c0_155] : memref<2x3x1x32xf32, #tpu.memory_space<vmem>>, vector<1x1x1x32xf32>
    %345 = vector.shape_cast %344 : vector<1x1x1x32xf32> to vector<1x32xf32>
    %cst_156 = arith.constant dense<0.000000e+00> : vector<8xf32>
    %346 = vector.multi_reduction <add>, %341, %cst_156 [1] : vector<8x32xf32> to vector<8xf32>
    %347 = vector.shape_cast %346 : vector<8xf32> to vector<8x1xf32>
    %cst_157 = arith.constant 3.200000e+01 : f32
    %348 = vector.broadcast %cst_157 : f32 to vector<8x1xf32>
    %349 = arith.divf %347, %348 : vector<8x1xf32>
    %350 = vector.broadcast %349 : vector<8x1xf32> to vector<8x32xf32>
    %351 = arith.subf %341, %350 : vector<8x32xf32>
    %352 = arith.mulf %351, %351 : vector<8x32xf32>
    %cst_158 = arith.constant dense<0.000000e+00> : vector<8xf32>
    %353 = vector.multi_reduction <add>, %352, %cst_158 [1] : vector<8x32xf32> to vector<8xf32>
    %354 = vector.shape_cast %353 : vector<8xf32> to vector<8x1xf32>
    %cst_159 = arith.constant 3.200000e+01 : f32
    %355 = vector.broadcast %cst_159 : f32 to vector<8x1xf32>
    %356 = arith.divf %354, %355 : vector<8x1xf32>
    %357 = vector.broadcast %349 : vector<8x1xf32> to vector<8x32xf32>
    %358 = arith.subf %341, %357 : vector<8x32xf32>
    %cst_160 = arith.constant 9.99999974E-6 : f32
    %359 = vector.broadcast %cst_160 : f32 to vector<8x1xf32>
    %360 = arith.addf %356, %359 : vector<8x1xf32>
    %361 = math.rsqrt %360 : vector<8x1xf32>
    %362 = vector.broadcast %361 : vector<8x1xf32> to vector<8x32xf32>
    %363 = arith.mulf %358, %362 : vector<8x32xf32>
    %364 = vector.broadcast %343 : vector<1x32xf32> to vector<8x32xf32>
    %365 = arith.mulf %363, %364 : vector<8x32xf32>
    %366 = vector.broadcast %345 : vector<1x32xf32> to vector<8x32xf32>
    %367 = arith.addf %365, %366 : vector<8x32xf32>
    %c1_161 = arith.constant 1 : index
    %c0_162 = arith.constant 0 : index
    %c0_163 = arith.constant 0 : index
    %368 = vector.load %arg7[%c1_161, %c0_162, %c0_163] : memref<2x32x96xf32, #tpu.memory_space<vmem>>, vector<1x32x96xf32>
    %369 = vector.shape_cast %368 : vector<1x32x96xf32> to vector<32x96xf32>
    %cst_164 = arith.constant dense<0.000000e+00> : vector<8x96xf32>
    %370 = tpu.matmul %367, %369, %cst_164 {dimension_numbers = #tpu.dot_dimension_numbers<[1], [0], [0], [1], [0, 0, 1, 1], [], []>} : vector<8x32xf32>, vector<32x96xf32>, vector<8x96xf32> -> vector<8x96xf32>
    %c1_165 = arith.constant 1 : index
    %c0_166 = arith.constant 0 : index
    %c0_167 = arith.constant 0 : index
    %371 = vector.load %arg8[%c1_165, %c0_166, %c0_167] : memref<2x1x96xf32, #tpu.memory_space<vmem>>, vector<1x1x96xf32>
    %372 = vector.shape_cast %371 : vector<1x1x96xf32> to vector<1x96xf32>
    %373 = vector.broadcast %372 : vector<1x96xf32> to vector<8x96xf32>
    %374 = arith.addf %370, %373 : vector<8x96xf32>
    %375 = vector.extract_strided_slice %374 {offsets = [0, 0], sizes = [8, 32], strides = [1, 1]} : vector<8x96xf32> to vector<8x32xf32>
    %376 = vector.extract_strided_slice %374 {offsets = [0, 32], sizes = [8, 32], strides = [1, 1]} : vector<8x96xf32> to vector<8x32xf32>
    %377 = vector.extract_strided_slice %374 {offsets = [0, 64], sizes = [8, 32], strides = [1, 1]} : vector<8x96xf32> to vector<8x32xf32>
    %c1_168 = arith.constant 1 : index
    %c0_169 = arith.constant 0 : index
    %c0_170 = arith.constant 0 : index
    %378 = vector.load %arg9[%c1_168, %c0_169, %c0_170] : memref<2x32x32xf32, #tpu.memory_space<vmem>>, vector<1x32x32xf32>
    %379 = vector.shape_cast %378 : vector<1x32x32xf32> to vector<32x32xf32>
    %380 = vector.extract_strided_slice %375 {offsets = [0, 0], sizes = [8, 8], strides = [1, 1]} : vector<8x32xf32> to vector<8x8xf32>
    %381 = vector.extract_strided_slice %376 {offsets = [0, 0], sizes = [8, 8], strides = [1, 1]} : vector<8x32xf32> to vector<8x8xf32>
    %382 = tpu.transpose %381, [1, 0] : vector<8x8xf32> -> vector<8x8xf32>
    %cst_171 = arith.constant dense<0.000000e+00> : vector<8x8xf32>
    %383 = tpu.matmul %380, %382, %cst_171 {dimension_numbers = #tpu.dot_dimension_numbers<[1], [0], [0], [1], [0, 0, 1, 1], [], []>} : vector<8x8xf32>, vector<8x8xf32>, vector<8x8xf32> -> vector<8x8xf32>
    %cst_172 = arith.constant 0.353553385 : f32
    %384 = vector.broadcast %cst_172 : f32 to vector<8x8xf32>
    %385 = arith.mulf %383, %384 : vector<8x8xf32>
    %386 = arith.addf %385, %16 : vector<8x8xf32>
    %cst_173 = arith.constant dense<0xFF800000> : vector<8xf32>
    %387 = vector.multi_reduction <maximumf>, %386, %cst_173 [1] : vector<8x8xf32> to vector<8xf32>
    %388 = vector.shape_cast %387 : vector<8xf32> to vector<8x1xf32>
    %389 = vector.broadcast %388 : vector<8x1xf32> to vector<8x8xf32>
    %390 = arith.subf %386, %389 : vector<8x8xf32>
    %391 = math.exp %390 : vector<8x8xf32>
    %cst_174 = arith.constant dense<0.000000e+00> : vector<8xf32>
    %392 = vector.multi_reduction <add>, %391, %cst_174 [1] : vector<8x8xf32> to vector<8xf32>
    %393 = vector.shape_cast %392 : vector<8xf32> to vector<8x1xf32>
    %394 = tpu.reciprocal %393 {approx = true} : vector<8x1xf32> -> vector<8x1xf32>
    %395 = arith.mulf %393, %394 : vector<8x1xf32>
    %cst_175 = arith.constant 2.000000e+00 : f32
    %396 = vector.broadcast %cst_175 : f32 to vector<8x1xf32>
    %397 = arith.subf %396, %395 : vector<8x1xf32>
    %398 = arith.mulf %394, %397 : vector<8x1xf32>
    %399 = vector.broadcast %398 : vector<8x1xf32> to vector<8x8xf32>
    %400 = arith.mulf %391, %399 : vector<8x8xf32>
    %401 = vector.extract_strided_slice %377 {offsets = [0, 0], sizes = [8, 8], strides = [1, 1]} : vector<8x32xf32> to vector<8x8xf32>
    %cst_176 = arith.constant dense<0.000000e+00> : vector<8x8xf32>
    %402 = tpu.matmul %400, %401, %cst_176 {dimension_numbers = #tpu.dot_dimension_numbers<[1], [0], [0], [1], [0, 0, 1, 1], [], []>} : vector<8x8xf32>, vector<8x8xf32>, vector<8x8xf32> -> vector<8x8xf32>
    %403 = vector.extract_strided_slice %379 {offsets = [0, 0], sizes = [8, 32], strides = [1, 1]} : vector<32x32xf32> to vector<8x32xf32>
    %cst_177 = arith.constant dense<0.000000e+00> : vector<8x32xf32>
    %404 = tpu.matmul %402, %403, %cst_177 {dimension_numbers = #tpu.dot_dimension_numbers<[1], [0], [0], [1], [0, 0, 1, 1], [], []>} : vector<8x8xf32>, vector<8x32xf32>, vector<8x32xf32> -> vector<8x32xf32>
    %405 = vector.extract_strided_slice %375 {offsets = [0, 8], sizes = [8, 8], strides = [1, 1]} : vector<8x32xf32> to vector<8x8xf32>
    %406 = vector.extract_strided_slice %376 {offsets = [0, 8], sizes = [8, 8], strides = [1, 1]} : vector<8x32xf32> to vector<8x8xf32>
    %407 = tpu.transpose %406, [1, 0] : vector<8x8xf32> -> vector<8x8xf32>
    %cst_178 = arith.constant dense<0.000000e+00> : vector<8x8xf32>
    %408 = tpu.matmul %405, %407, %cst_178 {dimension_numbers = #tpu.dot_dimension_numbers<[1], [0], [0], [1], [0, 0, 1, 1], [], []>} : vector<8x8xf32>, vector<8x8xf32>, vector<8x8xf32> -> vector<8x8xf32>
    %cst_179 = arith.constant 0.353553385 : f32
    %409 = vector.broadcast %cst_179 : f32 to vector<8x8xf32>
    %410 = arith.mulf %408, %409 : vector<8x8xf32>
    %411 = arith.addf %410, %16 : vector<8x8xf32>
    %cst_180 = arith.constant dense<0xFF800000> : vector<8xf32>
    %412 = vector.multi_reduction <maximumf>, %411, %cst_180 [1] : vector<8x8xf32> to vector<8xf32>
    %413 = vector.shape_cast %412 : vector<8xf32> to vector<8x1xf32>
    %414 = vector.broadcast %413 : vector<8x1xf32> to vector<8x8xf32>
    %415 = arith.subf %411, %414 : vector<8x8xf32>
    %416 = math.exp %415 : vector<8x8xf32>
    %cst_181 = arith.constant dense<0.000000e+00> : vector<8xf32>
    %417 = vector.multi_reduction <add>, %416, %cst_181 [1] : vector<8x8xf32> to vector<8xf32>
    %418 = vector.shape_cast %417 : vector<8xf32> to vector<8x1xf32>
    %419 = tpu.reciprocal %418 {approx = true} : vector<8x1xf32> -> vector<8x1xf32>
    %420 = arith.mulf %418, %419 : vector<8x1xf32>
    %cst_182 = arith.constant 2.000000e+00 : f32
    %421 = vector.broadcast %cst_182 : f32 to vector<8x1xf32>
    %422 = arith.subf %421, %420 : vector<8x1xf32>
    %423 = arith.mulf %419, %422 : vector<8x1xf32>
    %424 = vector.broadcast %423 : vector<8x1xf32> to vector<8x8xf32>
    %425 = arith.mulf %416, %424 : vector<8x8xf32>
    %426 = vector.extract_strided_slice %377 {offsets = [0, 8], sizes = [8, 8], strides = [1, 1]} : vector<8x32xf32> to vector<8x8xf32>
    %cst_183 = arith.constant dense<0.000000e+00> : vector<8x8xf32>
    %427 = tpu.matmul %425, %426, %cst_183 {dimension_numbers = #tpu.dot_dimension_numbers<[1], [0], [0], [1], [0, 0, 1, 1], [], []>} : vector<8x8xf32>, vector<8x8xf32>, vector<8x8xf32> -> vector<8x8xf32>
    %428 = vector.extract_strided_slice %379 {offsets = [8, 0], sizes = [8, 32], strides = [1, 1]} : vector<32x32xf32> to vector<8x32xf32>
    %cst_184 = arith.constant dense<0.000000e+00> : vector<8x32xf32>
    %429 = tpu.matmul %427, %428, %cst_184 {dimension_numbers = #tpu.dot_dimension_numbers<[1], [0], [0], [1], [0, 0, 1, 1], [], []>} : vector<8x8xf32>, vector<8x32xf32>, vector<8x32xf32> -> vector<8x32xf32>
    %430 = arith.addf %404, %429 : vector<8x32xf32>
    %431 = vector.extract_strided_slice %375 {offsets = [0, 16], sizes = [8, 8], strides = [1, 1]} : vector<8x32xf32> to vector<8x8xf32>
    %432 = vector.extract_strided_slice %376 {offsets = [0, 16], sizes = [8, 8], strides = [1, 1]} : vector<8x32xf32> to vector<8x8xf32>
    %433 = tpu.transpose %432, [1, 0] : vector<8x8xf32> -> vector<8x8xf32>
    %cst_185 = arith.constant dense<0.000000e+00> : vector<8x8xf32>
    %434 = tpu.matmul %431, %433, %cst_185 {dimension_numbers = #tpu.dot_dimension_numbers<[1], [0], [0], [1], [0, 0, 1, 1], [], []>} : vector<8x8xf32>, vector<8x8xf32>, vector<8x8xf32> -> vector<8x8xf32>
    %cst_186 = arith.constant 0.353553385 : f32
    %435 = vector.broadcast %cst_186 : f32 to vector<8x8xf32>
    %436 = arith.mulf %434, %435 : vector<8x8xf32>
    %437 = arith.addf %436, %16 : vector<8x8xf32>
    %cst_187 = arith.constant dense<0xFF800000> : vector<8xf32>
    %438 = vector.multi_reduction <maximumf>, %437, %cst_187 [1] : vector<8x8xf32> to vector<8xf32>
    %439 = vector.shape_cast %438 : vector<8xf32> to vector<8x1xf32>
    %440 = vector.broadcast %439 : vector<8x1xf32> to vector<8x8xf32>
    %441 = arith.subf %437, %440 : vector<8x8xf32>
    %442 = math.exp %441 : vector<8x8xf32>
    %cst_188 = arith.constant dense<0.000000e+00> : vector<8xf32>
    %443 = vector.multi_reduction <add>, %442, %cst_188 [1] : vector<8x8xf32> to vector<8xf32>
    %444 = vector.shape_cast %443 : vector<8xf32> to vector<8x1xf32>
    %445 = tpu.reciprocal %444 {approx = true} : vector<8x1xf32> -> vector<8x1xf32>
    %446 = arith.mulf %444, %445 : vector<8x1xf32>
    %cst_189 = arith.constant 2.000000e+00 : f32
    %447 = vector.broadcast %cst_189 : f32 to vector<8x1xf32>
    %448 = arith.subf %447, %446 : vector<8x1xf32>
    %449 = arith.mulf %445, %448 : vector<8x1xf32>
    %450 = vector.broadcast %449 : vector<8x1xf32> to vector<8x8xf32>
    %451 = arith.mulf %442, %450 : vector<8x8xf32>
    %452 = vector.extract_strided_slice %377 {offsets = [0, 16], sizes = [8, 8], strides = [1, 1]} : vector<8x32xf32> to vector<8x8xf32>
    %cst_190 = arith.constant dense<0.000000e+00> : vector<8x8xf32>
    %453 = tpu.matmul %451, %452, %cst_190 {dimension_numbers = #tpu.dot_dimension_numbers<[1], [0], [0], [1], [0, 0, 1, 1], [], []>} : vector<8x8xf32>, vector<8x8xf32>, vector<8x8xf32> -> vector<8x8xf32>
    %454 = vector.extract_strided_slice %379 {offsets = [16, 0], sizes = [8, 32], strides = [1, 1]} : vector<32x32xf32> to vector<8x32xf32>
    %cst_191 = arith.constant dense<0.000000e+00> : vector<8x32xf32>
    %455 = tpu.matmul %453, %454, %cst_191 {dimension_numbers = #tpu.dot_dimension_numbers<[1], [0], [0], [1], [0, 0, 1, 1], [], []>} : vector<8x8xf32>, vector<8x32xf32>, vector<8x32xf32> -> vector<8x32xf32>
    %456 = arith.addf %430, %455 : vector<8x32xf32>
    %457 = vector.extract_strided_slice %375 {offsets = [0, 24], sizes = [8, 8], strides = [1, 1]} : vector<8x32xf32> to vector<8x8xf32>
    %458 = vector.extract_strided_slice %376 {offsets = [0, 24], sizes = [8, 8], strides = [1, 1]} : vector<8x32xf32> to vector<8x8xf32>
    %459 = tpu.transpose %458, [1, 0] : vector<8x8xf32> -> vector<8x8xf32>
    %cst_192 = arith.constant dense<0.000000e+00> : vector<8x8xf32>
    %460 = tpu.matmul %457, %459, %cst_192 {dimension_numbers = #tpu.dot_dimension_numbers<[1], [0], [0], [1], [0, 0, 1, 1], [], []>} : vector<8x8xf32>, vector<8x8xf32>, vector<8x8xf32> -> vector<8x8xf32>
    %cst_193 = arith.constant 0.353553385 : f32
    %461 = vector.broadcast %cst_193 : f32 to vector<8x8xf32>
    %462 = arith.mulf %460, %461 : vector<8x8xf32>
    %463 = arith.addf %462, %16 : vector<8x8xf32>
    %cst_194 = arith.constant dense<0xFF800000> : vector<8xf32>
    %464 = vector.multi_reduction <maximumf>, %463, %cst_194 [1] : vector<8x8xf32> to vector<8xf32>
    %465 = vector.shape_cast %464 : vector<8xf32> to vector<8x1xf32>
    %466 = vector.broadcast %465 : vector<8x1xf32> to vector<8x8xf32>
    %467 = arith.subf %463, %466 : vector<8x8xf32>
    %468 = math.exp %467 : vector<8x8xf32>
    %cst_195 = arith.constant dense<0.000000e+00> : vector<8xf32>
    %469 = vector.multi_reduction <add>, %468, %cst_195 [1] : vector<8x8xf32> to vector<8xf32>
    %470 = vector.shape_cast %469 : vector<8xf32> to vector<8x1xf32>
    %471 = tpu.reciprocal %470 {approx = true} : vector<8x1xf32> -> vector<8x1xf32>
    %472 = arith.mulf %470, %471 : vector<8x1xf32>
    %cst_196 = arith.constant 2.000000e+00 : f32
    %473 = vector.broadcast %cst_196 : f32 to vector<8x1xf32>
    %474 = arith.subf %473, %472 : vector<8x1xf32>
    %475 = arith.mulf %471, %474 : vector<8x1xf32>
    %476 = vector.broadcast %475 : vector<8x1xf32> to vector<8x8xf32>
    %477 = arith.mulf %468, %476 : vector<8x8xf32>
    %478 = vector.extract_strided_slice %377 {offsets = [0, 24], sizes = [8, 8], strides = [1, 1]} : vector<8x32xf32> to vector<8x8xf32>
    %cst_197 = arith.constant dense<0.000000e+00> : vector<8x8xf32>
    %479 = tpu.matmul %477, %478, %cst_197 {dimension_numbers = #tpu.dot_dimension_numbers<[1], [0], [0], [1], [0, 0, 1, 1], [], []>} : vector<8x8xf32>, vector<8x8xf32>, vector<8x8xf32> -> vector<8x8xf32>
    %480 = vector.extract_strided_slice %379 {offsets = [24, 0], sizes = [8, 32], strides = [1, 1]} : vector<32x32xf32> to vector<8x32xf32>
    %cst_198 = arith.constant dense<0.000000e+00> : vector<8x32xf32>
    %481 = tpu.matmul %479, %480, %cst_198 {dimension_numbers = #tpu.dot_dimension_numbers<[1], [0], [0], [1], [0, 0, 1, 1], [], []>} : vector<8x8xf32>, vector<8x32xf32>, vector<8x32xf32> -> vector<8x32xf32>
    %482 = arith.addf %456, %481 : vector<8x32xf32>
    %483 = arith.addf %367, %482 : vector<8x32xf32>
    %c1_199 = arith.constant 1 : index
    %c0_200 = arith.constant 0 : index
    %c0_201 = arith.constant 0 : index
    %484 = vector.load %arg10[%c1_199, %c0_200, %c0_201] : memref<2x1x32xf32, #tpu.memory_space<vmem>>, vector<1x1x32xf32>
    %485 = vector.shape_cast %484 : vector<1x1x32xf32> to vector<1x32xf32>
    %486 = vector.broadcast %485 : vector<1x32xf32> to vector<8x32xf32>
    %487 = arith.addf %483, %486 : vector<8x32xf32>
    %c1_202 = arith.constant 1 : index
    %c0_203 = arith.constant 0 : index
    %c0_204 = arith.constant 0 : index
    %c0_205 = arith.constant 0 : index
    %488 = vector.load %arg21[%c1_202, %c0_203, %c0_204, %c0_205] : memref<2x3x1x32xf32, #tpu.memory_space<vmem>>, vector<1x1x1x32xf32>
    %489 = vector.shape_cast %488 : vector<1x1x1x32xf32> to vector<1x32xf32>
    %c1_206 = arith.constant 1 : index
    %c0_207 = arith.constant 0 : index
    %c0_208 = arith.constant 0 : index
    %c0_209 = arith.constant 0 : index
    %490 = vector.load %arg22[%c1_206, %c0_207, %c0_208, %c0_209] : memref<2x3x1x32xf32, #tpu.memory_space<vmem>>, vector<1x1x1x32xf32>
    %491 = vector.shape_cast %490 : vector<1x1x1x32xf32> to vector<1x32xf32>
    %cst_210 = arith.constant dense<0.000000e+00> : vector<8xf32>
    %492 = vector.multi_reduction <add>, %487, %cst_210 [1] : vector<8x32xf32> to vector<8xf32>
    %493 = vector.shape_cast %492 : vector<8xf32> to vector<8x1xf32>
    %cst_211 = arith.constant 3.200000e+01 : f32
    %494 = vector.broadcast %cst_211 : f32 to vector<8x1xf32>
    %495 = arith.divf %493, %494 : vector<8x1xf32>
    %496 = vector.broadcast %495 : vector<8x1xf32> to vector<8x32xf32>
    %497 = arith.subf %487, %496 : vector<8x32xf32>
    %498 = arith.mulf %497, %497 : vector<8x32xf32>
    %cst_212 = arith.constant dense<0.000000e+00> : vector<8xf32>
    %499 = vector.multi_reduction <add>, %498, %cst_212 [1] : vector<8x32xf32> to vector<8xf32>
    %500 = vector.shape_cast %499 : vector<8xf32> to vector<8x1xf32>
    %cst_213 = arith.constant 3.200000e+01 : f32
    %501 = vector.broadcast %cst_213 : f32 to vector<8x1xf32>
    %502 = arith.divf %500, %501 : vector<8x1xf32>
    %503 = vector.broadcast %495 : vector<8x1xf32> to vector<8x32xf32>
    %504 = arith.subf %487, %503 : vector<8x32xf32>
    %cst_214 = arith.constant 9.99999974E-6 : f32
    %505 = vector.broadcast %cst_214 : f32 to vector<8x1xf32>
    %506 = arith.addf %502, %505 : vector<8x1xf32>
    %507 = math.rsqrt %506 : vector<8x1xf32>
    %508 = vector.broadcast %507 : vector<8x1xf32> to vector<8x32xf32>
    %509 = arith.mulf %504, %508 : vector<8x32xf32>
    %510 = vector.broadcast %489 : vector<1x32xf32> to vector<8x32xf32>
    %511 = arith.mulf %509, %510 : vector<8x32xf32>
    %512 = vector.broadcast %491 : vector<1x32xf32> to vector<8x32xf32>
    %513 = arith.addf %511, %512 : vector<8x32xf32>
    %c1_215 = arith.constant 1 : index
    %c0_216 = arith.constant 0 : index
    %c0_217 = arith.constant 0 : index
    %514 = vector.load %arg11[%c1_215, %c0_216, %c0_217] : memref<2x32x32xf32, #tpu.memory_space<vmem>>, vector<1x32x32xf32>
    %515 = vector.shape_cast %514 : vector<1x32x32xf32> to vector<32x32xf32>
    %cst_218 = arith.constant dense<0.000000e+00> : vector<8x32xf32>
    %516 = tpu.matmul %513, %515, %cst_218 {dimension_numbers = #tpu.dot_dimension_numbers<[1], [0], [0], [1], [0, 0, 1, 1], [], []>} : vector<8x32xf32>, vector<32x32xf32>, vector<8x32xf32> -> vector<8x32xf32>
    %c1_219 = arith.constant 1 : index
    %c0_220 = arith.constant 0 : index
    %c0_221 = arith.constant 0 : index
    %517 = vector.load %arg12[%c1_219, %c0_220, %c0_221] : memref<2x1x32xf32, #tpu.memory_space<vmem>>, vector<1x1x32xf32>
    %518 = vector.shape_cast %517 : vector<1x1x32xf32> to vector<1x32xf32>
    %519 = vector.broadcast %518 : vector<1x32xf32> to vector<8x32xf32>
    %520 = arith.addf %516, %519 : vector<8x32xf32>
    %c1_222 = arith.constant 1 : index
    %c0_223 = arith.constant 0 : index
    %c0_224 = arith.constant 0 : index
    %521 = vector.load %arg13[%c1_222, %c0_223, %c0_224] : memref<2x32x64xf32, #tpu.memory_space<vmem>>, vector<1x32x64xf32>
    %522 = vector.shape_cast %521 : vector<1x32x64xf32> to vector<32x64xf32>
    %cst_225 = arith.constant dense<0.000000e+00> : vector<8x64xf32>
    %523 = tpu.matmul %14, %522, %cst_225 {dimension_numbers = #tpu.dot_dimension_numbers<[1], [0], [0], [1], [0, 0, 1, 1], [], []>} : vector<8x32xf32>, vector<32x64xf32>, vector<8x64xf32> -> vector<8x64xf32>
    %c1_226 = arith.constant 1 : index
    %c0_227 = arith.constant 0 : index
    %c0_228 = arith.constant 0 : index
    %524 = vector.load %arg14[%c1_226, %c0_227, %c0_228] : memref<2x1x64xf32, #tpu.memory_space<vmem>>, vector<1x1x64xf32>
    %525 = vector.shape_cast %524 : vector<1x1x64xf32> to vector<1x64xf32>
    %526 = vector.broadcast %525 : vector<1x64xf32> to vector<8x64xf32>
    %527 = arith.addf %523, %526 : vector<8x64xf32>
    %528 = vector.extract_strided_slice %527 {offsets = [0, 0], sizes = [8, 32], strides = [1, 1]} : vector<8x64xf32> to vector<8x32xf32>
    %529 = vector.extract_strided_slice %527 {offsets = [0, 32], sizes = [8, 32], strides = [1, 1]} : vector<8x64xf32> to vector<8x32xf32>
    %c1_229 = arith.constant 1 : index
    %c0_230 = arith.constant 0 : index
    %c0_231 = arith.constant 0 : index
    %530 = vector.load %arg15[%c1_229, %c0_230, %c0_231] : memref<2x32x32xf32, #tpu.memory_space<vmem>>, vector<1x32x32xf32>
    %531 = vector.shape_cast %530 : vector<1x32x32xf32> to vector<32x32xf32>
    %532 = vector.extract_strided_slice %520 {offsets = [0, 0], sizes = [8, 8], strides = [1, 1]} : vector<8x32xf32> to vector<8x8xf32>
    %533 = vector.extract_strided_slice %528 {offsets = [0, 0], sizes = [8, 8], strides = [1, 1]} : vector<8x32xf32> to vector<8x8xf32>
    %534 = tpu.transpose %533, [1, 0] : vector<8x8xf32> -> vector<8x8xf32>
    %cst_232 = arith.constant dense<0.000000e+00> : vector<8x8xf32>
    %535 = tpu.matmul %532, %534, %cst_232 {dimension_numbers = #tpu.dot_dimension_numbers<[1], [0], [0], [1], [0, 0, 1, 1], [], []>} : vector<8x8xf32>, vector<8x8xf32>, vector<8x8xf32> -> vector<8x8xf32>
    %cst_233 = arith.constant 0.353553385 : f32
    %536 = vector.broadcast %cst_233 : f32 to vector<8x8xf32>
    %537 = arith.mulf %535, %536 : vector<8x8xf32>
    %538 = vector.broadcast %18 : vector<1x8xf32> to vector<8x8xf32>
    %539 = arith.addf %537, %538 : vector<8x8xf32>
    %cst_234 = arith.constant dense<0xFF800000> : vector<8xf32>
    %540 = vector.multi_reduction <maximumf>, %539, %cst_234 [1] : vector<8x8xf32> to vector<8xf32>
    %541 = vector.shape_cast %540 : vector<8xf32> to vector<8x1xf32>
    %542 = vector.broadcast %541 : vector<8x1xf32> to vector<8x8xf32>
    %543 = arith.subf %539, %542 : vector<8x8xf32>
    %544 = math.exp %543 : vector<8x8xf32>
    %cst_235 = arith.constant dense<0.000000e+00> : vector<8xf32>
    %545 = vector.multi_reduction <add>, %544, %cst_235 [1] : vector<8x8xf32> to vector<8xf32>
    %546 = vector.shape_cast %545 : vector<8xf32> to vector<8x1xf32>
    %547 = tpu.reciprocal %546 {approx = true} : vector<8x1xf32> -> vector<8x1xf32>
    %548 = arith.mulf %546, %547 : vector<8x1xf32>
    %cst_236 = arith.constant 2.000000e+00 : f32
    %549 = vector.broadcast %cst_236 : f32 to vector<8x1xf32>
    %550 = arith.subf %549, %548 : vector<8x1xf32>
    %551 = arith.mulf %547, %550 : vector<8x1xf32>
    %552 = vector.broadcast %551 : vector<8x1xf32> to vector<8x8xf32>
    %553 = arith.mulf %544, %552 : vector<8x8xf32>
    %554 = vector.extract_strided_slice %529 {offsets = [0, 0], sizes = [8, 8], strides = [1, 1]} : vector<8x32xf32> to vector<8x8xf32>
    %cst_237 = arith.constant dense<0.000000e+00> : vector<8x8xf32>
    %555 = tpu.matmul %553, %554, %cst_237 {dimension_numbers = #tpu.dot_dimension_numbers<[1], [0], [0], [1], [0, 0, 1, 1], [], []>} : vector<8x8xf32>, vector<8x8xf32>, vector<8x8xf32> -> vector<8x8xf32>
    %556 = vector.extract_strided_slice %531 {offsets = [0, 0], sizes = [8, 32], strides = [1, 1]} : vector<32x32xf32> to vector<8x32xf32>
    %cst_238 = arith.constant dense<0.000000e+00> : vector<8x32xf32>
    %557 = tpu.matmul %555, %556, %cst_238 {dimension_numbers = #tpu.dot_dimension_numbers<[1], [0], [0], [1], [0, 0, 1, 1], [], []>} : vector<8x8xf32>, vector<8x32xf32>, vector<8x32xf32> -> vector<8x32xf32>
    %558 = vector.extract_strided_slice %520 {offsets = [0, 8], sizes = [8, 8], strides = [1, 1]} : vector<8x32xf32> to vector<8x8xf32>
    %559 = vector.extract_strided_slice %528 {offsets = [0, 8], sizes = [8, 8], strides = [1, 1]} : vector<8x32xf32> to vector<8x8xf32>
    %560 = tpu.transpose %559, [1, 0] : vector<8x8xf32> -> vector<8x8xf32>
    %cst_239 = arith.constant dense<0.000000e+00> : vector<8x8xf32>
    %561 = tpu.matmul %558, %560, %cst_239 {dimension_numbers = #tpu.dot_dimension_numbers<[1], [0], [0], [1], [0, 0, 1, 1], [], []>} : vector<8x8xf32>, vector<8x8xf32>, vector<8x8xf32> -> vector<8x8xf32>
    %cst_240 = arith.constant 0.353553385 : f32
    %562 = vector.broadcast %cst_240 : f32 to vector<8x8xf32>
    %563 = arith.mulf %561, %562 : vector<8x8xf32>
    %564 = vector.broadcast %18 : vector<1x8xf32> to vector<8x8xf32>
    %565 = arith.addf %563, %564 : vector<8x8xf32>
    %cst_241 = arith.constant dense<0xFF800000> : vector<8xf32>
    %566 = vector.multi_reduction <maximumf>, %565, %cst_241 [1] : vector<8x8xf32> to vector<8xf32>
    %567 = vector.shape_cast %566 : vector<8xf32> to vector<8x1xf32>
    %568 = vector.broadcast %567 : vector<8x1xf32> to vector<8x8xf32>
    %569 = arith.subf %565, %568 : vector<8x8xf32>
    %570 = math.exp %569 : vector<8x8xf32>
    %cst_242 = arith.constant dense<0.000000e+00> : vector<8xf32>
    %571 = vector.multi_reduction <add>, %570, %cst_242 [1] : vector<8x8xf32> to vector<8xf32>
    %572 = vector.shape_cast %571 : vector<8xf32> to vector<8x1xf32>
    %573 = tpu.reciprocal %572 {approx = true} : vector<8x1xf32> -> vector<8x1xf32>
    %574 = arith.mulf %572, %573 : vector<8x1xf32>
    %cst_243 = arith.constant 2.000000e+00 : f32
    %575 = vector.broadcast %cst_243 : f32 to vector<8x1xf32>
    %576 = arith.subf %575, %574 : vector<8x1xf32>
    %577 = arith.mulf %573, %576 : vector<8x1xf32>
    %578 = vector.broadcast %577 : vector<8x1xf32> to vector<8x8xf32>
    %579 = arith.mulf %570, %578 : vector<8x8xf32>
    %580 = vector.extract_strided_slice %529 {offsets = [0, 8], sizes = [8, 8], strides = [1, 1]} : vector<8x32xf32> to vector<8x8xf32>
    %cst_244 = arith.constant dense<0.000000e+00> : vector<8x8xf32>
    %581 = tpu.matmul %579, %580, %cst_244 {dimension_numbers = #tpu.dot_dimension_numbers<[1], [0], [0], [1], [0, 0, 1, 1], [], []>} : vector<8x8xf32>, vector<8x8xf32>, vector<8x8xf32> -> vector<8x8xf32>
    %582 = vector.extract_strided_slice %531 {offsets = [8, 0], sizes = [8, 32], strides = [1, 1]} : vector<32x32xf32> to vector<8x32xf32>
    %cst_245 = arith.constant dense<0.000000e+00> : vector<8x32xf32>
    %583 = tpu.matmul %581, %582, %cst_245 {dimension_numbers = #tpu.dot_dimension_numbers<[1], [0], [0], [1], [0, 0, 1, 1], [], []>} : vector<8x8xf32>, vector<8x32xf32>, vector<8x32xf32> -> vector<8x32xf32>
    %584 = arith.addf %557, %583 : vector<8x32xf32>
    %585 = vector.extract_strided_slice %520 {offsets = [0, 16], sizes = [8, 8], strides = [1, 1]} : vector<8x32xf32> to vector<8x8xf32>
    %586 = vector.extract_strided_slice %528 {offsets = [0, 16], sizes = [8, 8], strides = [1, 1]} : vector<8x32xf32> to vector<8x8xf32>
    %587 = tpu.transpose %586, [1, 0] : vector<8x8xf32> -> vector<8x8xf32>
    %cst_246 = arith.constant dense<0.000000e+00> : vector<8x8xf32>
    %588 = tpu.matmul %585, %587, %cst_246 {dimension_numbers = #tpu.dot_dimension_numbers<[1], [0], [0], [1], [0, 0, 1, 1], [], []>} : vector<8x8xf32>, vector<8x8xf32>, vector<8x8xf32> -> vector<8x8xf32>
    %cst_247 = arith.constant 0.353553385 : f32
    %589 = vector.broadcast %cst_247 : f32 to vector<8x8xf32>
    %590 = arith.mulf %588, %589 : vector<8x8xf32>
    %591 = vector.broadcast %18 : vector<1x8xf32> to vector<8x8xf32>
    %592 = arith.addf %590, %591 : vector<8x8xf32>
    %cst_248 = arith.constant dense<0xFF800000> : vector<8xf32>
    %593 = vector.multi_reduction <maximumf>, %592, %cst_248 [1] : vector<8x8xf32> to vector<8xf32>
    %594 = vector.shape_cast %593 : vector<8xf32> to vector<8x1xf32>
    %595 = vector.broadcast %594 : vector<8x1xf32> to vector<8x8xf32>
    %596 = arith.subf %592, %595 : vector<8x8xf32>
    %597 = math.exp %596 : vector<8x8xf32>
    %cst_249 = arith.constant dense<0.000000e+00> : vector<8xf32>
    %598 = vector.multi_reduction <add>, %597, %cst_249 [1] : vector<8x8xf32> to vector<8xf32>
    %599 = vector.shape_cast %598 : vector<8xf32> to vector<8x1xf32>
    %600 = tpu.reciprocal %599 {approx = true} : vector<8x1xf32> -> vector<8x1xf32>
    %601 = arith.mulf %599, %600 : vector<8x1xf32>
    %cst_250 = arith.constant 2.000000e+00 : f32
    %602 = vector.broadcast %cst_250 : f32 to vector<8x1xf32>
    %603 = arith.subf %602, %601 : vector<8x1xf32>
    %604 = arith.mulf %600, %603 : vector<8x1xf32>
    %605 = vector.broadcast %604 : vector<8x1xf32> to vector<8x8xf32>
    %606 = arith.mulf %597, %605 : vector<8x8xf32>
    %607 = vector.extract_strided_slice %529 {offsets = [0, 16], sizes = [8, 8], strides = [1, 1]} : vector<8x32xf32> to vector<8x8xf32>
    %cst_251 = arith.constant dense<0.000000e+00> : vector<8x8xf32>
    %608 = tpu.matmul %606, %607, %cst_251 {dimension_numbers = #tpu.dot_dimension_numbers<[1], [0], [0], [1], [0, 0, 1, 1], [], []>} : vector<8x8xf32>, vector<8x8xf32>, vector<8x8xf32> -> vector<8x8xf32>
    %609 = vector.extract_strided_slice %531 {offsets = [16, 0], sizes = [8, 32], strides = [1, 1]} : vector<32x32xf32> to vector<8x32xf32>
    %cst_252 = arith.constant dense<0.000000e+00> : vector<8x32xf32>
    %610 = tpu.matmul %608, %609, %cst_252 {dimension_numbers = #tpu.dot_dimension_numbers<[1], [0], [0], [1], [0, 0, 1, 1], [], []>} : vector<8x8xf32>, vector<8x32xf32>, vector<8x32xf32> -> vector<8x32xf32>
    %611 = arith.addf %584, %610 : vector<8x32xf32>
    %612 = vector.extract_strided_slice %520 {offsets = [0, 24], sizes = [8, 8], strides = [1, 1]} : vector<8x32xf32> to vector<8x8xf32>
    %613 = vector.extract_strided_slice %528 {offsets = [0, 24], sizes = [8, 8], strides = [1, 1]} : vector<8x32xf32> to vector<8x8xf32>
    %614 = tpu.transpose %613, [1, 0] : vector<8x8xf32> -> vector<8x8xf32>
    %cst_253 = arith.constant dense<0.000000e+00> : vector<8x8xf32>
    %615 = tpu.matmul %612, %614, %cst_253 {dimension_numbers = #tpu.dot_dimension_numbers<[1], [0], [0], [1], [0, 0, 1, 1], [], []>} : vector<8x8xf32>, vector<8x8xf32>, vector<8x8xf32> -> vector<8x8xf32>
    %cst_254 = arith.constant 0.353553385 : f32
    %616 = vector.broadcast %cst_254 : f32 to vector<8x8xf32>
    %617 = arith.mulf %615, %616 : vector<8x8xf32>
    %618 = vector.broadcast %18 : vector<1x8xf32> to vector<8x8xf32>
    %619 = arith.addf %617, %618 : vector<8x8xf32>
    %cst_255 = arith.constant dense<0xFF800000> : vector<8xf32>
    %620 = vector.multi_reduction <maximumf>, %619, %cst_255 [1] : vector<8x8xf32> to vector<8xf32>
    %621 = vector.shape_cast %620 : vector<8xf32> to vector<8x1xf32>
    %622 = vector.broadcast %621 : vector<8x1xf32> to vector<8x8xf32>
    %623 = arith.subf %619, %622 : vector<8x8xf32>
    %624 = math.exp %623 : vector<8x8xf32>
    %cst_256 = arith.constant dense<0.000000e+00> : vector<8xf32>
    %625 = vector.multi_reduction <add>, %624, %cst_256 [1] : vector<8x8xf32> to vector<8xf32>
    %626 = vector.shape_cast %625 : vector<8xf32> to vector<8x1xf32>
    %627 = tpu.reciprocal %626 {approx = true} : vector<8x1xf32> -> vector<8x1xf32>
    %628 = arith.mulf %626, %627 : vector<8x1xf32>
    %cst_257 = arith.constant 2.000000e+00 : f32
    %629 = vector.broadcast %cst_257 : f32 to vector<8x1xf32>
    %630 = arith.subf %629, %628 : vector<8x1xf32>
    %631 = arith.mulf %627, %630 : vector<8x1xf32>
    %632 = vector.broadcast %631 : vector<8x1xf32> to vector<8x8xf32>
    %633 = arith.mulf %624, %632 : vector<8x8xf32>
    %634 = vector.extract_strided_slice %529 {offsets = [0, 24], sizes = [8, 8], strides = [1, 1]} : vector<8x32xf32> to vector<8x8xf32>
    %cst_258 = arith.constant dense<0.000000e+00> : vector<8x8xf32>
    %635 = tpu.matmul %633, %634, %cst_258 {dimension_numbers = #tpu.dot_dimension_numbers<[1], [0], [0], [1], [0, 0, 1, 1], [], []>} : vector<8x8xf32>, vector<8x8xf32>, vector<8x8xf32> -> vector<8x8xf32>
    %636 = vector.extract_strided_slice %531 {offsets = [24, 0], sizes = [8, 32], strides = [1, 1]} : vector<32x32xf32> to vector<8x32xf32>
    %cst_259 = arith.constant dense<0.000000e+00> : vector<8x32xf32>
    %637 = tpu.matmul %635, %636, %cst_259 {dimension_numbers = #tpu.dot_dimension_numbers<[1], [0], [0], [1], [0, 0, 1, 1], [], []>} : vector<8x8xf32>, vector<8x32xf32>, vector<8x32xf32> -> vector<8x32xf32>
    %638 = arith.addf %611, %637 : vector<8x32xf32>
    %639 = tpu.concatenate %553, %579, %606, %633 in 1 : vector<8x8xf32>, vector<8x8xf32>, vector<8x8xf32>, vector<8x8xf32> -> vector<8x32xf32>
    %c0_260 = arith.constant 0 : index
    %c1_261 = arith.constant 1 : index
    %c0_262 = arith.constant 0 : index
    %c0_263 = arith.constant 0 : index
    %640 = vector.load %arg26[%c0_260, %c1_261, %c0_262, %c0_263] : memref<1x2x8x32xf32, #tpu.memory_space<vmem>>, vector<1x1x8x32xf32>
    %641 = vector.shape_cast %640 : vector<1x1x8x32xf32> to vector<8x32xf32>
    %642 = vector.shape_cast %639 : vector<8x32xf32> to vector<1x1x8x32xf32>
    tpu.vector_store %arg26[%c0_260, %c1_261, %c0_262, %c0_263], %642 {strides = array<i32>} : memref<1x2x8x32xf32, #tpu.memory_space<vmem>>, vector<1x1x8x32xf32>,
    %643 = arith.addf %513, %638 : vector<8x32xf32>
    %c1_264 = arith.constant 1 : index
    %c0_265 = arith.constant 0 : index
    %c0_266 = arith.constant 0 : index
    %644 = vector.load %arg16[%c1_264, %c0_265, %c0_266] : memref<2x1x32xf32, #tpu.memory_space<vmem>>, vector<1x1x32xf32>
    %645 = vector.shape_cast %644 : vector<1x1x32xf32> to vector<1x32xf32>
    %646 = vector.broadcast %645 : vector<1x32xf32> to vector<8x32xf32>
    %647 = arith.addf %643, %646 : vector<8x32xf32>
    %c1_267 = arith.constant 1 : index
    %c1_268 = arith.constant 1 : index
    %c0_269 = arith.constant 0 : index
    %c0_270 = arith.constant 0 : index
    %648 = vector.load %arg21[%c1_267, %c1_268, %c0_269, %c0_270] : memref<2x3x1x32xf32, #tpu.memory_space<vmem>>, vector<1x1x1x32xf32>
    %649 = vector.shape_cast %648 : vector<1x1x1x32xf32> to vector<1x32xf32>
    %c1_271 = arith.constant 1 : index
    %c1_272 = arith.constant 1 : index
    %c0_273 = arith.constant 0 : index
    %c0_274 = arith.constant 0 : index
    %650 = vector.load %arg22[%c1_271, %c1_272, %c0_273, %c0_274] : memref<2x3x1x32xf32, #tpu.memory_space<vmem>>, vector<1x1x1x32xf32>
    %651 = vector.shape_cast %650 : vector<1x1x1x32xf32> to vector<1x32xf32>
    %cst_275 = arith.constant dense<0.000000e+00> : vector<8xf32>
    %652 = vector.multi_reduction <add>, %647, %cst_275 [1] : vector<8x32xf32> to vector<8xf32>
    %653 = vector.shape_cast %652 : vector<8xf32> to vector<8x1xf32>
    %cst_276 = arith.constant 3.200000e+01 : f32
    %654 = vector.broadcast %cst_276 : f32 to vector<8x1xf32>
    %655 = arith.divf %653, %654 : vector<8x1xf32>
    %656 = vector.broadcast %655 : vector<8x1xf32> to vector<8x32xf32>
    %657 = arith.subf %647, %656 : vector<8x32xf32>
    %658 = arith.mulf %657, %657 : vector<8x32xf32>
    %cst_277 = arith.constant dense<0.000000e+00> : vector<8xf32>
    %659 = vector.multi_reduction <add>, %658, %cst_277 [1] : vector<8x32xf32> to vector<8xf32>
    %660 = vector.shape_cast %659 : vector<8xf32> to vector<8x1xf32>
    %cst_278 = arith.constant 3.200000e+01 : f32
    %661 = vector.broadcast %cst_278 : f32 to vector<8x1xf32>
    %662 = arith.divf %660, %661 : vector<8x1xf32>
    %663 = vector.broadcast %655 : vector<8x1xf32> to vector<8x32xf32>
    %664 = arith.subf %647, %663 : vector<8x32xf32>
    %cst_279 = arith.constant 9.99999974E-6 : f32
    %665 = vector.broadcast %cst_279 : f32 to vector<8x1xf32>
    %666 = arith.addf %662, %665 : vector<8x1xf32>
    %667 = math.rsqrt %666 : vector<8x1xf32>
    %668 = vector.broadcast %667 : vector<8x1xf32> to vector<8x32xf32>
    %669 = arith.mulf %664, %668 : vector<8x32xf32>
    %670 = vector.broadcast %649 : vector<1x32xf32> to vector<8x32xf32>
    %671 = arith.mulf %669, %670 : vector<8x32xf32>
    %672 = vector.broadcast %651 : vector<1x32xf32> to vector<8x32xf32>
    %673 = arith.addf %671, %672 : vector<8x32xf32>
    %c1_280 = arith.constant 1 : index
    %c0_281 = arith.constant 0 : index
    %c0_282 = arith.constant 0 : index
    %674 = vector.load %arg17[%c1_280, %c0_281, %c0_282] : memref<2x32x64xf32, #tpu.memory_space<vmem>>, vector<1x32x64xf32>
    %675 = vector.shape_cast %674 : vector<1x32x64xf32> to vector<32x64xf32>
    %cst_283 = arith.constant dense<0.000000e+00> : vector<8x64xf32>
    %676 = tpu.matmul %673, %675, %cst_283 {dimension_numbers = #tpu.dot_dimension_numbers<[1], [0], [0], [1], [0, 0, 1, 1], [], []>} : vector<8x32xf32>, vector<32x64xf32>, vector<8x64xf32> -> vector<8x64xf32>
    %c1_284 = arith.constant 1 : index
    %c0_285 = arith.constant 0 : index
    %c0_286 = arith.constant 0 : index
    %677 = vector.load %arg18[%c1_284, %c0_285, %c0_286] : memref<2x1x64xf32, #tpu.memory_space<vmem>>, vector<1x1x64xf32>
    %678 = vector.shape_cast %677 : vector<1x1x64xf32> to vector<1x64xf32>
    %679 = vector.broadcast %678 : vector<1x64xf32> to vector<8x64xf32>
    %680 = arith.addf %676, %679 : vector<8x64xf32>
    %cst_287 = arith.constant 0.000000e+00 : f32
    %681 = vector.broadcast %cst_287 : f32 to vector<8x64xf32>
    %682 = arith.maximumf %680, %681 : vector<8x64xf32>
    %c1_288 = arith.constant 1 : index
    %c0_289 = arith.constant 0 : index
    %c0_290 = arith.constant 0 : index
    %683 = vector.load %arg19[%c1_288, %c0_289, %c0_290] : memref<2x64x32xf32, #tpu.memory_space<vmem>>, vector<1x64x32xf32>
    %684 = vector.shape_cast %683 : vector<1x64x32xf32> to vector<64x32xf32>
    %cst_291 = arith.constant dense<0.000000e+00> : vector<8x32xf32>
    %685 = tpu.matmul %682, %684, %cst_291 {dimension_numbers = #tpu.dot_dimension_numbers<[1], [0], [0], [1], [0, 0, 1, 1], [], []>} : vector<8x64xf32>, vector<64x32xf32>, vector<8x32xf32> -> vector<8x32xf32>
    %c1_292 = arith.constant 1 : index
    %c0_293 = arith.constant 0 : index
    %c0_294 = arith.constant 0 : index
    %686 = vector.load %arg20[%c1_292, %c0_293, %c0_294] : memref<2x1x32xf32, #tpu.memory_space<vmem>>, vector<1x1x32xf32>
    %687 = vector.shape_cast %686 : vector<1x1x32xf32> to vector<1x32xf32>
    %688 = vector.broadcast %687 : vector<1x32xf32> to vector<8x32xf32>
    %689 = arith.addf %685, %688 : vector<8x32xf32>
    %690 = arith.addf %673, %689 : vector<8x32xf32>
    %c1_295 = arith.constant 1 : index
    %c2_296 = arith.constant 2 : index
    %c0_297 = arith.constant 0 : index
    %c0_298 = arith.constant 0 : index
    %691 = vector.load %arg21[%c1_295, %c2_296, %c0_297, %c0_298] : memref<2x3x1x32xf32, #tpu.memory_space<vmem>>, vector<1x1x1x32xf32>
    %692 = vector.shape_cast %691 : vector<1x1x1x32xf32> to vector<1x32xf32>
    %c1_299 = arith.constant 1 : index
    %c2_300 = arith.constant 2 : index
    %c0_301 = arith.constant 0 : index
    %c0_302 = arith.constant 0 : index
    %693 = vector.load %arg22[%c1_299, %c2_300, %c0_301, %c0_302] : memref<2x3x1x32xf32, #tpu.memory_space<vmem>>, vector<1x1x1x32xf32>
    %694 = vector.shape_cast %693 : vector<1x1x1x32xf32> to vector<1x32xf32>
    %cst_303 = arith.constant dense<0.000000e+00> : vector<8xf32>
    %695 = vector.multi_reduction <add>, %690, %cst_303 [1] : vector<8x32xf32> to vector<8xf32>
    %696 = vector.shape_cast %695 : vector<8xf32> to vector<8x1xf32>
    %cst_304 = arith.constant 3.200000e+01 : f32
    %697 = vector.broadcast %cst_304 : f32 to vector<8x1xf32>
    %698 = arith.divf %696, %697 : vector<8x1xf32>
    %699 = vector.broadcast %698 : vector<8x1xf32> to vector<8x32xf32>
    %700 = arith.subf %690, %699 : vector<8x32xf32>
    %701 = arith.mulf %700, %700 : vector<8x32xf32>
    %cst_305 = arith.constant dense<0.000000e+00> : vector<8xf32>
    %702 = vector.multi_reduction <add>, %701, %cst_305 [1] : vector<8x32xf32> to vector<8xf32>
    %703 = vector.shape_cast %702 : vector<8xf32> to vector<8x1xf32>
    %cst_306 = arith.constant 3.200000e+01 : f32
    %704 = vector.broadcast %cst_306 : f32 to vector<8x1xf32>
    %705 = arith.divf %703, %704 : vector<8x1xf32>
    %706 = vector.broadcast %698 : vector<8x1xf32> to vector<8x32xf32>
    %707 = arith.subf %690, %706 : vector<8x32xf32>
    %cst_307 = arith.constant 9.99999974E-6 : f32
    %708 = vector.broadcast %cst_307 : f32 to vector<8x1xf32>
    %709 = arith.addf %705, %708 : vector<8x1xf32>
    %710 = math.rsqrt %709 : vector<8x1xf32>
    %711 = vector.broadcast %710 : vector<8x1xf32> to vector<8x32xf32>
    %712 = arith.mulf %707, %711 : vector<8x32xf32>
    %713 = vector.broadcast %692 : vector<1x32xf32> to vector<8x32xf32>
    %714 = arith.mulf %712, %713 : vector<8x32xf32>
    %715 = vector.broadcast %694 : vector<1x32xf32> to vector<8x32xf32>
    %716 = arith.addf %714, %715 : vector<8x32xf32>
    %c0_308 = arith.constant 0 : index
    %c0_309 = arith.constant 0 : index
    %717 = vector.load %arg23[%c0_308, %c0_309] : memref<32x128xf32, #tpu.memory_space<vmem>>, vector<32x128xf32>
    %cst_310 = arith.constant dense<0.000000e+00> : vector<8x128xf32>
    %718 = tpu.matmul %716, %717, %cst_310 {dimension_numbers = #tpu.dot_dimension_numbers<[1], [0], [0], [1], [0, 0, 1, 1], [], []>} : vector<8x32xf32>, vector<32x128xf32>, vector<8x128xf32> -> vector<8x128xf32>
    %c0_311 = arith.constant 0 : index
    %c0_312 = arith.constant 0 : index
    %719 = vector.load %arg24[%c0_311, %c0_312] : memref<1x128xf32, #tpu.memory_space<vmem>>, vector<1x128xf32>
    %720 = vector.broadcast %719 : vector<1x128xf32> to vector<8x128xf32>
    %721 = arith.addf %718, %720 : vector<8x128xf32>
    %c0_313 = arith.constant 0 : index
    %c0_314 = arith.constant 0 : index
    %c0_315 = arith.constant 0 : index
    %722 = vector.load %arg25[%c0_313, %c0_314, %c0_315] : memref<1x8x128xf32, #tpu.memory_space<vmem>>, vector<1x8x128xf32>
    %723 = vector.shape_cast %722 : vector<1x8x128xf32> to vector<8x128xf32>
    %724 = vector.shape_cast %721 : vector<8x128xf32> to vector<1x8x128xf32>
    tpu.vector_store %arg25[%c0_313, %c0_314, %c0_315], %724 {strides = array<i32>} : memref<1x8x128xf32, #tpu.memory_space<vmem>>, vector<1x8x128xf32>,
    return
  }
  func.func @transform_0(%arg0: i32) -> (i32, i32, i32) {
    %c0_i32 = arith.constant 0 : i32
    %c0_i32_0 = arith.constant 0 : i32
    %c0_i32_1 = arith.constant 0 : i32
    return %arg0, %c0_i32, %c0_i32_0 : i32, i32, i32
  }
  func.func @transform_1(%arg0: i32) -> (i32, i32, i32) {
    %c0_i32 = arith.constant 0 : i32
    %c0_i32_0 = arith.constant 0 : i32
    %c0_i32_1 = arith.constant 0 : i32
    return %arg0, %c0_i32, %c0_i32_0 : i32, i32, i32
  }
  func.func @transform_2(%arg0: i32) -> (i32, i32, i32) {
    %c0_i32 = arith.constant 0 : i32
    %c0_i32_0 = arith.constant 0 : i32
    %c0_i32_1 = arith.constant 0 : i32
    return %arg0, %c0_i32, %c0_i32_0 : i32, i32, i32
  }
  func.func @transform_3(%arg0: i32) -> (i32, i32, i32) {
    %c0_i32 = arith.constant 0 : i32
    %c0_i32_0 = arith.constant 0 : i32
    %c0_i32_1 = arith.constant 0 : i32
    return %arg0, %c0_i32, %c0_i32_0 : i32, i32, i32
  }
  func.func @transform_4(%arg0: i32) -> (i32, i32) {
    %c0_i32 = arith.constant 0 : i32
    %c0_i32_0 = arith.constant 0 : i32
    %c0_i32_1 = arith.constant 0 : i32
    return %c0_i32, %c0_i32_0 : i32, i32
  }
  func.func @transform_5(%arg0: i32) -> (i32, i32) {
    %c0_i32 = arith.constant 0 : i32
    %c0_i32_0 = arith.constant 0 : i32
    %c0_i32_1 = arith.constant 0 : i32
    return %c0_i32, %c0_i32_0 : i32, i32
  }
  func.func @transform_6(%arg0: i32) -> (i32, i32, i32) {
    %c0_i32 = arith.constant 0 : i32
    %c0_i32_0 = arith.constant 0 : i32
    %c0_i32_1 = arith.constant 0 : i32
    %c0_i32_2 = arith.constant 0 : i32
    return %c0_i32, %c0_i32_0, %c0_i32_1 : i32, i32, i32
  }
  func.func @transform_7(%arg0: i32) -> (i32, i32, i32) {
    %c0_i32 = arith.constant 0 : i32
    %c0_i32_0 = arith.constant 0 : i32
    %c0_i32_1 = arith.constant 0 : i32
    %c0_i32_2 = arith.constant 0 : i32
    return %c0_i32, %c0_i32_0, %c0_i32_1 : i32, i32, i32
  }
  func.func @transform_8(%arg0: i32) -> (i32, i32, i32) {
    %c0_i32 = arith.constant 0 : i32
    %c0_i32_0 = arith.constant 0 : i32
    %c0_i32_1 = arith.constant 0 : i32
    %c0_i32_2 = arith.constant 0 : i32
    return %c0_i32, %c0_i32_0, %c0_i32_1 : i32, i32, i32
  }
  func.func @transform_9(%arg0: i32) -> (i32, i32, i32) {
    %c0_i32 = arith.constant 0 : i32
    %c0_i32_0 = arith.constant 0 : i32
    %c0_i32_1 = arith.constant 0 : i32
    %c0_i32_2 = arith.constant 0 : i32
    return %c0_i32, %c0_i32_0, %c0_i32_1 : i32, i32, i32
  }
  func.func @transform_10(%arg0: i32) -> (i32, i32, i32) {
    %c0_i32 = arith.constant 0 : i32
    %c0_i32_0 = arith.constant 0 : i32
    %c0_i32_1 = arith.constant 0 : i32
    %c0_i32_2 = arith.constant 0 : i32
    return %c0_i32, %c0_i32_0, %c0_i32_1 : i32, i32, i32
  }
  func.func @transform_11(%arg0: i32) -> (i32, i32, i32) {
    %c0_i32 = arith.constant 0 : i32
    %c0_i32_0 = arith.constant 0 : i32
    %c0_i32_1 = arith.constant 0 : i32
    %c0_i32_2 = arith.constant 0 : i32
    return %c0_i32, %c0_i32_0, %c0_i32_1 : i32, i32, i32
  }
  func.func @transform_12(%arg0: i32) -> (i32, i32, i32) {
    %c0_i32 = arith.constant 0 : i32
    %c0_i32_0 = arith.constant 0 : i32
    %c0_i32_1 = arith.constant 0 : i32
    %c0_i32_2 = arith.constant 0 : i32
    return %c0_i32, %c0_i32_0, %c0_i32_1 : i32, i32, i32
  }
  func.func @transform_13(%arg0: i32) -> (i32, i32, i32) {
    %c0_i32 = arith.constant 0 : i32
    %c0_i32_0 = arith.constant 0 : i32
    %c0_i32_1 = arith.constant 0 : i32
    %c0_i32_2 = arith.constant 0 : i32
    return %c0_i32, %c0_i32_0, %c0_i32_1 : i32, i32, i32
  }
  func.func @transform_14(%arg0: i32) -> (i32, i32, i32) {
    %c0_i32 = arith.constant 0 : i32
    %c0_i32_0 = arith.constant 0 : i32
    %c0_i32_1 = arith.constant 0 : i32
    %c0_i32_2 = arith.constant 0 : i32
    return %c0_i32, %c0_i32_0, %c0_i32_1 : i32, i32, i32
  }
  func.func @transform_15(%arg0: i32) -> (i32, i32, i32) {
    %c0_i32 = arith.constant 0 : i32
    %c0_i32_0 = arith.constant 0 : i32
    %c0_i32_1 = arith.constant 0 : i32
    %c0_i32_2 = arith.constant 0 : i32
    return %c0_i32, %c0_i32_0, %c0_i32_1 : i32, i32, i32
  }
  func.func @transform_16(%arg0: i32) -> (i32, i32, i32) {
    %c0_i32 = arith.constant 0 : i32
    %c0_i32_0 = arith.constant 0 : i32
    %c0_i32_1 = arith.constant 0 : i32
    %c0_i32_2 = arith.constant 0 : i32
    return %c0_i32, %c0_i32_0, %c0_i32_1 : i32, i32, i32
  }
  func.func @transform_17(%arg0: i32) -> (i32, i32, i32) {
    %c0_i32 = arith.constant 0 : i32
    %c0_i32_0 = arith.constant 0 : i32
    %c0_i32_1 = arith.constant 0 : i32
    %c0_i32_2 = arith.constant 0 : i32
    return %c0_i32, %c0_i32_0, %c0_i32_1 : i32, i32, i32
  }
  func.func @transform_18(%arg0: i32) -> (i32, i32, i32) {
    %c0_i32 = arith.constant 0 : i32
    %c0_i32_0 = arith.constant 0 : i32
    %c0_i32_1 = arith.constant 0 : i32
    %c0_i32_2 = arith.constant 0 : i32
    return %c0_i32, %c0_i32_0, %c0_i32_1 : i32, i32, i32
  }
  func.func @transform_19(%arg0: i32) -> (i32, i32, i32) {
    %c0_i32 = arith.constant 0 : i32
    %c0_i32_0 = arith.constant 0 : i32
    %c0_i32_1 = arith.constant 0 : i32
    %c0_i32_2 = arith.constant 0 : i32
    return %c0_i32, %c0_i32_0, %c0_i32_1 : i32, i32, i32
  }
  func.func @transform_20(%arg0: i32) -> (i32, i32, i32, i32) {
    %c0_i32 = arith.constant 0 : i32
    %c0_i32_0 = arith.constant 0 : i32
    %c0_i32_1 = arith.constant 0 : i32
    %c0_i32_2 = arith.constant 0 : i32
    %c0_i32_3 = arith.constant 0 : i32
    return %c0_i32, %c0_i32_0, %c0_i32_1, %c0_i32_2 : i32, i32, i32, i32
  }
  func.func @transform_21(%arg0: i32) -> (i32, i32, i32, i32) {
    %c0_i32 = arith.constant 0 : i32
    %c0_i32_0 = arith.constant 0 : i32
    %c0_i32_1 = arith.constant 0 : i32
    %c0_i32_2 = arith.constant 0 : i32
    %c0_i32_3 = arith.constant 0 : i32
    return %c0_i32, %c0_i32_0, %c0_i32_1, %c0_i32_2 : i32, i32, i32, i32
  }
  func.func @transform_22(%arg0: i32) -> (i32, i32) {
    %c0_i32 = arith.constant 0 : i32
    %c0_i32_0 = arith.constant 0 : i32
    %c0_i32_1 = arith.constant 0 : i32
    return %c0_i32, %c0_i32_0 : i32, i32
  }
  func.func @transform_23(%arg0: i32) -> (i32, i32) {
    %c0_i32 = arith.constant 0 : i32
    %c0_i32_0 = arith.constant 0 : i32
    %c0_i32_1 = arith.constant 0 : i32
    return %c0_i32, %c0_i32_0 : i32, i32
  }
  func.func @transform_24(%arg0: i32) -> (i32, i32, i32) {
    %c0_i32 = arith.constant 0 : i32
    %c0_i32_0 = arith.constant 0 : i32
    %c0_i32_1 = arith.constant 0 : i32
    return %arg0, %c0_i32, %c0_i32_0 : i32, i32, i32
  }
  func.func @transform_25(%arg0: i32) -> (i32, i32, i32, i32) {
    %c0_i32 = arith.constant 0 : i32
    %c0_i32_0 = arith.constant 0 : i32
    %c0_i32_1 = arith.constant 0 : i32
    %c0_i32_2 = arith.constant 0 : i32
    return %arg0, %c0_i32, %c0_i32_0, %c0_i32_1 : i32, i32, i32, i32
  }
}

</mosaic_0001>

<bundles_post_ra>
// kernel: tpu_custom_call.1
= control target key start
LH: loop header
LB: loop body
LE: loop exit
PB: predicated region body
PF: predicated region fallthrough
CT: control target
= control target key end

     0   :  { %s5637_s0 = inlined_call_operand.vmem [shape: s32[2,8,1], index: 0, kind: input, shape index: {}]   ;;  %s5638_s1 = inlined_call_operand.hbm [shape: f32[2,8,32], index: 1, kind: input, shape index: {}]   ;;  %s5639_s2 = inlined_call_operand.hbm [shape: f32[2,8,8], index: 2, kind: input, shape index: {}]   ;;  %s5640_s3 = inlined_call_operand.hbm [shape: f32[2,1,8], index: 3, kind: input, shape index: {}]   ;;  %s5641_s4 = inlined_call_operand.hbm [shape: f32[8,32], index: 4, kind: input, shape index: {}]   ;;  %s5642_s5 = inlined_call_operand.vmem [shape: f32[128,32], index: 5, kind: input, shape index: {}]   ;;  %s5643_s6 = inlined_call_operand.vmem [shape: f32[2,32,96], index: 6, kind: input, shape index: {}]   ;;  %s5644_s7 = inlined_call_operand.hbm [shape: f32[2,1,96], index: 7, kind: input, shape index: {}]   ;;  %s5645_s8 = inlined_call_operand.vmem [shape: f32[2,32,32], index: 8, kind: input, shape index: {}]   ;;  %s5646_s9 = inlined_call_operand.hbm [shape: f32[2,1,32], index: 9, kind: input, shape index: {}]   ;;  %s5647_s10 = inlined_call_operand.vmem [shape: f32[2,32,32], index: 10, kind: input, shape index: {}]   ;;  %s5648_s11 = inlined_call_operand.hbm [shape: f32[2,1,32], index: 11, kind: input, shape index: {}]   ;;  %s5649_s12 = inlined_call_operand.vmem [shape: f32[2,32,64], index: 12, kind: input, shape index: {}]   ;;  %s5650_s13 = inlined_call_operand.hbm [shape: f32[2,1,64], index: 13, kind: input, shape index: {}]   ;;  %s5651_s14 = inlined_call_operand.hbm [shape: f32[2,32,32], index: 14, kind: input, shape index: {}]   ;;  %s5652_s15 = inlined_call_operand.hbm [shape: f32[2,1,32], index: 15, kind: input, shape index: {}]   ;;  %s5653_s16 = inlined_call_operand.vmem [shape: f32[2,32,64], index: 16, kind: input, shape index: {}]   ;;  %s5654_s17 = inlined_call_operand.hbm [shape: f32[2,1,64], index: 17, kind: input, shape index: {}]   ;;  %s5655_s18 = inlined_call_operand.vmem [shape: f32[2,64,32], index: 18, kind: input, shape index: {}]   ;;  %s5656_s19 = inlined_call_operand.hbm [shape: f32[2,1,32], index: 19, kind: input, shape index: {}]   ;;  %s5657_s20 = inlined_call_operand.hbm [shape: f32[2,3,1,32], index: 20, kind: input, shape index: {}]   ;;  %s5658_s21 = inlined_call_operand.hbm [shape: f32[2,3,1,32], index: 21, kind: input, shape index: {}]   ;;  %s5659_s22 = inlined_call_operand.hbm [shape: f32[32,128], index: 22, kind: input, shape index: {}]   ;;  %s5660_s23 = inlined_call_operand.vmem [shape: f32[1,128], index: 23, kind: input, shape index: {}]   ;;  %s5661_s24 = inlined_call_operand.hbm [shape: f32[2,8,128], index: 24, kind: output, shape index: {0}]   ;;  %s5662_s25 = inlined_call_operand.hbm [shape: f32[2,2,8,32], index: 25, kind: output, shape index: {1}]  }
   0x1   :  { %5697 = sst [smem:[#allocation45_spill]] %s5637_s0 }
   0x2   :  { %5698 = sst [smem:[#allocation46_spill]] %s5638_s1 }
   0x3   :  { %5699 = sst [smem:[#allocation47_spill]] %s5639_s2 }
   0x4   :  { %5700 = sst [smem:[#allocation48_spill]] %s5640_s3 }
   0x5   :  { %5701 = sst [smem:[#allocation49_spill]] %s5641_s4 }
   0x6   :  { %5702 = sst [smem:[#allocation50_spill]] %s5642_s5 }
   0x7   :  { %5703 = sst [smem:[#allocation51_spill]] %s5643_s6 }
   0x8   :  { %5704 = sst [smem:[#allocation52_spill]] %s5644_s7 }
   0x9   :  { %5705 = sst [smem:[#allocation53_spill]] %s5645_s8 }
   0xa   :  { %5706 = sst [smem:[#allocation54_spill]] %s5646_s9 }
   0xb   :  { %5707 = sst [smem:[#allocation55_spill]] %s5648_s11 }
   0xc   :  { %5708 = sst [smem:[#allocation56_spill]] %s5650_s13 }
   0xd   :  { %5709 = sst [smem:[#allocation57_spill]] %s5651_s14 }
   0xe   :  { %5710 = sst [smem:[#allocation58_spill]] %s5652_s15 }
   0xf   :  { %5711 = sst [smem:[#allocation59_spill]] %s5653_s16 }
  0x10   :  { %5712 = sst [smem:[#allocation60_spill]] %s5654_s17 }
  0x11   :  { %5713 = sst [smem:[#allocation61_spill]] %s5655_s18 }
  0x12   :  { %5714 = sst [smem:[#allocation62_spill]] %s5656_s19 }
  0x13   :  { %5715 = sst [smem:[#allocation63_spill]] %s5657_s20 }
  0x14   :  { %5716 = sst [smem:[#allocation64_spill]] %s5658_s21 }
  0x15   :  { %5717 = sst [smem:[#allocation65_spill]] %s5659_s22 }
  0x16   :  { %5718 = sst [smem:[#allocation66_spill]] %s5660_s23 }
  0x17   :  { %5719 = sst [smem:[#allocation67_spill]] %s5661_s24 }
  0x18   :  { %5720 = sst [smem:[#allocation68_spill]] %s5662_s25 }
  0x19   :  { %31 = vsyncpa [#allocation3], 0 }
  0x1a   :  { %33 = vsyncpa [#allocation3 + $0x1], 0 }
  0x1b   :  { %34 = vsyncpa [#allocation6], 0 }
  0x1c   :  { %36 = vsyncpa [#allocation6 + $0x1], 0 }
  0x1d   :  { %37 = vsyncpa [#allocation9], 0 }
  0x1e   :  { %38 = vsyncpa [#allocation12], 0 }
  0x1f   :  { %39 = vsyncpa [#allocation15], 0 }
  0x20   :  { %40 = vsyncpa [#allocation18], 0 }
  0x21   :  { %41 = vsyncpa [#allocation21], 0 }
  0x22   :  { %42 = vsyncpa [#allocation24], 0 }
  0x23   :  { %43 = vsyncpa [#allocation4], 0 }
  0x24   :  { %45 = vsyncpa [#allocation4 + $0x1], 0 }
  0x25   :  { %46 = vsyncpa [#allocation28], 0 }
  0x26   :  { %48 = vsyncpa [#allocation28 + $0x1], 0  ;;  %s4777_s29 = smov 0   ;;  %s4779_s2 = smov 0  }
  0x27   :  { %s4781_s6 = smov 0   ;;  %s4783_s30 = smov 0  }
  0x28 LB: > { %5721 = sst [smem:[#allocation39_spill]] %s4599_s29  ;;  %s4801_s8 = sadd.s32 4294967295, %s4611_s30   ;;  %s4611_s30 = sphi %s4783_s30, %s5783_s30   ;;  %s4607_s6 = sphi %s4781_s6, %s5785_s6   ;;  %s4603_s2 = sphi %s4779_s2, %s5787_s2   ;;  %s4599_s29 = sphi %s4777_s29, %s5786_s29  }
  0x29   : > { %5722 = sst [smem:[#allocation40_spill]] %s4607_s6  ;;  %p3574_p0 = scmp.ge.s32.totalorder %s4611_s30, 1 }
  0x2a   : > { %s5723_s26 = sld [smem:[#allocation49_spill]]  ;;  %p5681_p1 = scmp.eq.s32.totalorder %s4801_s8, 0 }
  0x2b   : > { %p635_p2 = scmp.lt.s32.totalorder %s4611_s30, 3  ;;  %s4613_s4 = smov [#allocation8]  }
  0x2c   : > { %s649_s28 = sshll.u32 %s4613_s4, 4  ;;  %s5725_s0 = sld [smem:[#allocation54_spill]]  ;;  %s650_s28 = int_to_ptr.vmem [resolvable:$true] %s649_s28 }
  0x2d   : > { %p4806_p3 = pnand %p3574_p0, %p635_p2  ;;  %s5727_s13 = sld [smem:[#allocation56_spill]] }
  0x2e   : > { %s4614_s24 = smov [#allocation11]   ;;  %s5673_s9 = smov 16  }
  0x2f   : > { %p3782_p5 = pneg %p4806_p3  ;;  %s683_s25 = sshll.u32 %s4614_s24, 4  ;;  %s684_s25 = int_to_ptr.vmem [resolvable:$true] %s683_s25 }
  0x30   : > { %s647_s1 = sshll.u32 %s5723_s26, 4  ;;  %s5675_s5 = smov 1   ;;  %s648_s1 = int_to_ptr.hbm [resolvable:$true] %s647_s1 }
  0x31   : > { %p4818_p6 = pnand %p3782_p5, %p5681_p1  ;;  %s5728_s15 = sld [smem:[#allocation58_spill]] }
  0x32   : > { %s681_s7 = sshll.u32 %s5725_s0, 4  ;;  %s4617_s23 = smov [#allocation14]   ;;  %s682_s7 = int_to_ptr.hbm [resolvable:$true] %s681_s7 }
  0x33   : > { %s715_s4 = sshll.u32 %s5727_s13, 4  ;;  %s717_s26 = sshll.u32 %s4617_s23, 4  ;;  %s716_s4 = int_to_ptr.hbm [resolvable:$true] %s715_s4  ;;  %s718_s26 = int_to_ptr.vmem [resolvable:$true] %s717_s26 }
  0x34   : > { %3785 = dma.hbm_to_vmem [thread:$0]  (!%p4818_p6), %s648_s1, 128, %s650_s28, [#allocation9]  }
  0x35   : > { %3791 = dma.hbm_to_vmem [thread:$0]  (!%p4818_p6), %s682_s7, 32, %s684_s25, [#allocation12], %s5673_s9, %s5673_s9, %s5675_s5  }
  0x36   : > { %3797 = dma.hbm_to_vmem [thread:$0]  (!%p4818_p6), %s716_s4, 32, %s718_s26, [#allocation15], %s5673_s9, %s5673_s9, %s5675_s5  }
  0x37   : > { %s743_s16 = sshll.u32 %s5728_s15, 4  ;;  %s4618_s24 = smov [#allocation17]   ;;  %s744_s16 = int_to_ptr.hbm [resolvable:$true] %s743_s16 }
  0x38   : > { %s745_s1 = sshll.u32 %s4618_s24, 4  ;;  %s5729_s19 = sld [smem:[#allocation62_spill]]  ;;  %s746_s1 = int_to_ptr.vmem [resolvable:$true] %s745_s1 }
  0x39   : > { %3803 = dma.hbm_to_vmem [thread:$0]  (!%p4818_p6), %s744_s16, 32, %s746_s1, [#allocation18], %s5673_s9, %s5673_s9, %s5675_s5  }
  0x3a   : > { %s5730_s21 = sld [smem:[#allocation64_spill]]  ;;  %s4619_s23 = smov [#allocation20]  }
  0x3b   : > { %s779_s26 = sshll.u32 %s4619_s23, 4  ;;  %s4620_s16 = smov [#allocation23]   ;;  %s780_s26 = int_to_ptr.vmem [resolvable:$true] %s779_s26 }
  0x3c   : > { %s807_s24 = sshll.u32 %s4620_s16, 4  ;;  %s3573_s1 = sadd.s32 4294967294, %s4611_s30   ;;  %s808_s24 = int_to_ptr.vmem [resolvable:$true] %s807_s24 }
  0x3d   : > { %s4863_s28 = sadd.s32 1, %s4611_s30   ;;  %s87_s7 = sadd.s32 1, %s4607_s6 }
  0x3e   : > { %s777_s18 = sshll.u32 %s5729_s19, 4  ;;  %5731 = sst [smem:[#allocation41_spill]] %s4863_s28  ;;  %s778_s18 = int_to_ptr.hbm [resolvable:$true] %s777_s18 }
  0x3f   : > { %3809 = dma.hbm_to_vmem [thread:$0]  (!%p4818_p6), %s778_s18, 32, %s780_s26, [#allocation21], %s5673_s9, %s5673_s9, %s5675_s5  }
  0x40   : > { %s805_s0 = sshll.u32 %s5730_s21, 4  ;;  %s84_s25 = ssub.s32 %s4611_s30, %s4863_s28  ;;  %s806_s0 = int_to_ptr.hbm [resolvable:$true] %s805_s0 }
  0x41   : > { %3815 = dma.hbm_to_vmem [thread:$0]  (!%p4818_p6), %s806_s0, 96, %s808_s24, [#allocation24], %s5673_s9, %s5673_s9, %s5675_s5  }
  0x42   : > { %p85_p7 = scmp.eq.s32.totalorder %s84_s25, 0  ;;  %p94_p8 = scmp.ne.s32.totalorder %s4607_s6, %s4603_s2 }
  0x43   : > { %p95_p9 = scmp.eq.s32.totalorder %s4611_s30, 0  ;;  %p100_p10 = scmp.ne.s32.totalorder %s4603_s2, %s4599_s29 }
  0x44   : > { %s4874_s18 = scalar_select %p85_p7, %s4607_s6, %s87_s7  }
  0x45   : > { %p96_p11 = por %p95_p9, %p94_p8  ;;  %p4878_p12 = por %p5681_p1, %p100_p10 }
  0x46   : > { %5732 = sst [smem:[#allocation42_spill]] %s4874_s18  ;;  %p596_p13 = scmp.eq.s32.totalorder %s4801_s8, 1 }
  0x47   : > { %p602_p0 = scmp.eq.s32.totalorder %s3573_s1, 1  ;;  %p3848_p2 = scmp.lt.s32.totalorder %s4611_s30, 2 }
  0x48   : > { %s4885_s0 = sand.u32 1, %s4607_s6   ;;  %p4887_p5 = por %p596_p13, %p94_p8 }
  0x49   : > { %p4891_p4 = por %p602_p0, %p100_p10  ;;  %s5680_s16 = sshll.u32 %s4885_s0, 3 }
  0x4a   : > { %s5734_s23 = scalar_select %p4887_p5, 1, 0 }
  0x4b   : > { %s5736_s26 = scalar_select %p4891_p4, 1, 0 }
  0x4c   : > { %5735 = sst [smem:[#allocation43_spill]] %s5734_s23  ;;  %s5682_s24 = sshll.u32 %s4611_s30, 3 }
  0x4d   : > { %5737 = sst [smem:[#allocation44_spill]] %s5736_s26  ;;  %p4897_p7 = pnand %p3848_p2, %p96_p11 }
  0x4e   : > { %s864_s1 = sand.u32 1, %s4611_s30   ;;  %s5739_s5 = sld [smem:[#allocation47_spill]] }
  0x4f   : > { %s868_s19 = scalar_lea.vmem [#allocation5], %s5680_s16  ;;  %s4909_s18 = scalar_lea.sflag [#allocation6], %s864_s1 }
  0x50   : > { %s876_s21 = sshll.u32 %s868_s19, 4  ;;  %p4219_p9 = pneg %p4897_p7  ;;  %s877_s21 = int_to_ptr.vmem [resolvable:$true] %s876_s21 }
  0x54   : > { %s872_s13 = scalar_lea.hbm %s5739_s5, %s5682_s24 }
  0x55   : > { %s874_s15 = sshll.u32 %s872_s13, 4  ;;  %s4222_s13 = scalar_lea.hbm %s5739_s5, 16  ;;  %s875_s15 = int_to_ptr.hbm [resolvable:$true] %s874_s15 }
  0x56   : > { %s4215_s6 = sshra.s32 %s875_s15, 4  ;;  %s4216_s6 = int_to_ptr.hbm [resolvable:$true] %s4215_s6 }
  0x57   : > { %s4217_s28 = scalar_lea.hbm %s4216_s6, 8  ;;  %p4223_p13 = scmp.lt.s32.totalorder %s4216_s6, %s5739_s5 }
  0x58   : > { %p4218_p8 = scmp.ne.s32.totalorder %s4216_s6, %s4217_s28  ;;  %p4224_p0 = scmp.lt.s32.totalorder %s4222_s13, %s4217_s28 }
  0x5a   : > { %p4220_p10 = pnand %p4219_p9, %p4218_p8  ;;  %p4225_p2 = por %p4224_p0, %p4223_p13 }
  0x5c   : > { %p4221_p11 = pneg %p4220_p10 }
  0x5e   : > { %p4226_p1 = pnand %p4225_p2, %p4221_p11 }
  0x60   : > { %4229 = shalt.err (!%p4226_p1)
}
  0x61   : > { %3825 = dma.hbm_to_vmem [thread:$0]  (!%p4897_p7), %s875_s15, 128, %s877_s21, %s4909_s18  }
  0x62   : > { %s5740_s26 = sld [smem:[#allocation52_spill]]  ;;  %s4621_s9 = smov [#allocation10]  }
  0x63   : > { %s666_s7 = sshll.u32 %s4621_s9, 4  ;;  %s5741_s11 = sld [smem:[#allocation55_spill]]  ;;  %s667_s7 = int_to_ptr.vmem [resolvable:$true] %s666_s7 }
  0x64   : > { %s5742_s13 = smov 1   ;;  %s5743_s19 = smov 16  }
  0x65   : > { %s4622_s15 = smov [#allocation13]   ;;  %s5744_s14 = sld [smem:[#allocation57_spill]] }
  0x66   : > { %s700_s21 = sshll.u32 %s4622_s15, 4  ;;  %s4623_s1 = smov [#allocation16]   ;;  %s701_s21 = int_to_ptr.vmem [resolvable:$true] %s700_s21 }
  0x67   : > { %s731_s9 = sshll.u32 %s4623_s1, 4  ;;  %s5745_s17 = sld [smem:[#allocation60_spill]]  ;;  %s732_s9 = int_to_ptr.vmem [resolvable:$true] %s731_s9 }
  0x68   : > { %s664_s29 = sshll.u32 %s5740_s26, 4  ;;  %s4624_s6 = smov 128   ;;  %s665_s29 = int_to_ptr.hbm [resolvable:$true] %s664_s29 }
  0x69   : > { %s698_s28 = sshll.u32 %s5741_s11, 4  ;;  %s4625_s15 = smov 8   ;;  %s699_s28 = int_to_ptr.hbm [resolvable:$true] %s698_s28 }
  0x6a   : > { %3788 = dma.hbm_to_vmem [thread:$0]  (!%p4818_p6), %s665_s29, 32, %s667_s7, [#allocation9], %s5743_s19, %s5743_s19, %s5742_s13  }
  0x6b   : > { %s729_s26 = sshll.u32 %s5744_s14, 4  ;;  %s4626_s5 = smov [#allocation19]   ;;  %s730_s26 = int_to_ptr.hbm [resolvable:$true] %s729_s26 }
  0x6c   : > { %3794 = dma.hbm_to_vmem [thread:$0]  (!%p4818_p6), %s699_s28, 32, %s701_s21, [#allocation12], %s5743_s19, %s5743_s19, %s5742_s13  }
  0x6d   : > { %s760_s7 = sshll.u32 %s5745_s17, 4  ;;  %s762_s24 = sshll.u32 %s4626_s5, 4  ;;  %s761_s7 = int_to_ptr.hbm [resolvable:$true] %s760_s7  ;;  %s763_s24 = int_to_ptr.vmem [resolvable:$true] %s762_s24 }
  0x6e   : > { %3800 = dma.hbm_to_vmem [thread:$0]  (!%p4818_p6), %s730_s26, 1024, %s732_s9, [#allocation15], %s4624_s6, %s4624_s6, %s4625_s15  }
  0x6f   : > { %s5746_s20 = sld [smem:[#allocation63_spill]]  ;;  %s4627_s9 = smov [#allocation22]  }
  0x70   : > { %3806 = dma.hbm_to_vmem [thread:$0]  (!%p4818_p6), %s761_s7, 32, %s763_s24, [#allocation18], %s5743_s19, %s5743_s19, %s5742_s13  }
  0x71   : > { %s5747_s22 = sld [smem:[#allocation65_spill]]  ;;  %s793_s16 = sshll.u32 %s4627_s9, 4  ;;  %s794_s16 = int_to_ptr.vmem [resolvable:$true] %s793_s16 }
  0x72   : > { %s4628_s11 = smov [#allocation25]   ;;  %s5748_s29 = sshll.u32 %s4611_s30, 3 }
  0x73   : > { %s821_s14 = sshll.u32 %s4628_s11, 4  ;;  %s5749_s24 = sld [smem:[#allocation46_spill]]  ;;  %s822_s14 = int_to_ptr.vmem [resolvable:$true] %s821_s14 }
  0x74   : > { %s5750_s1 = sshll.u32 %s4885_s0, 3 }
  0x75   : > { %s791_s28 = sshll.u32 %s5746_s20, 4  ;;  %s849_s9 = scalar_lea.vmem [#allocation2], %s5750_s1  ;;  %s792_s28 = int_to_ptr.hbm [resolvable:$true] %s791_s28 }
  0x76   : > { %3812 = dma.hbm_to_vmem [thread:$0]  (!%p4818_p6), %s792_s28, 96, %s794_s16, [#allocation21], %s5743_s19, %s5743_s19, %s5742_s13  }
  0x77   : > { %s819_s26 = sshll.u32 %s5747_s22, 4  ;;  %s857_s17 = sshll.u32 %s849_s9, 4  ;;  %s820_s26 = int_to_ptr.hbm [resolvable:$true] %s819_s26  ;;  %s858_s17 = int_to_ptr.vmem [resolvable:$true] %s857_s17 }
  0x78   : > { %3818 = dma.hbm_to_vmem [thread:$0]  (!%p4818_p6), %s820_s26, 512, %s822_s14, [#allocation24], %s4624_s6, %s4624_s6, %s4625_s15  }
  0x79   : > { %s853_s21 = scalar_lea.hbm %s5749_s24, %s5748_s29  ;;  %s846_s22 = scalar_lea.sflag [#allocation3], %s4885_s0 }
  0x7a   : > { %s855_s20 = sshll.u32 %s853_s21, 4  ;;  %s4432_s6 = scalar_lea.hbm %s5749_s24, 16  ;;  %s856_s20 = int_to_ptr.hbm [resolvable:$true] %s855_s20 }
  0x7b   : > { %s4425_s23 = sshra.s32 %s856_s20, 4  ;;  %s4426_s23 = int_to_ptr.hbm [resolvable:$true] %s4425_s23 }
  0x7c   : > { %s4427_s13 = scalar_lea.hbm %s4426_s23, 8  ;;  %p4433_p10 = scmp.lt.s32.totalorder %s4426_s23, %s5749_s24 }
  0x7d   : > { %p4428_p1 = scmp.ne.s32.totalorder %s4426_s23, %s4427_s13  ;;  %p4434_p11 = scmp.lt.s32.totalorder %s4432_s6, %s4427_s13 }
  0x7f   : > { %p4430_p8 = pnand %p4428_p1, %p4219_p9  ;;  %p4435_p13 = por %p4434_p11, %p4433_p10 }
  0x81   : > { %p4431_p6 = pneg %p4430_p8 }
  0x83   : > { %p4436_p0 = pnand %p4435_p13, %p4431_p6 }
  0x85   : > { %4439 = shalt.err (!%p4436_p0)
}
  0x86   : > { %3822 = dma.hbm_to_vmem [thread:$0]  (!%p4897_p7), %s856_s20, 128, %s858_s17, %s846_s22  }
  0x87   : > { %s5751_s11 = sld [smem:[#allocation48_spill]]  ;;  %s886_s29 = scalar_lea.vmem [#allocation7], %s4885_s0 }
  0x88   : > { %s893_s7 = sshll.u32 %s886_s29, 4  ;;  %s894_s7 = int_to_ptr.vmem [resolvable:$true] %s893_s7 }
  0x8d   : > { %s889_s14 = scalar_lea.hbm %s5751_s11, %s4611_s30  ;;  %s4462_s17 = scalar_lea.hbm %s5751_s11, 2 }
  0x8e   : > { %s891_s5 = sshll.u32 %s889_s14, 4  ;;  %s892_s5 = int_to_ptr.hbm [resolvable:$true] %s891_s5 }
  0x8f   : > { %s4455_s23 = sshra.s32 %s892_s5, 4  ;;  %s4456_s23 = int_to_ptr.hbm [resolvable:$true] %s4455_s23 }
  0x90   : > { %s4457_s21 = scalar_lea.hbm %s4456_s23, 1  ;;  %p4463_p6 = scmp.lt.s32.totalorder %s4456_s23, %s5751_s11 }
  0x91   : > { %p4458_p2 = scmp.ne.s32.totalorder %s4456_s23, %s4457_s21  ;;  %p4464_p10 = scmp.lt.s32.totalorder %s4462_s17, %s4457_s21 }
  0x93   : > { %p4460_p1 = pnand %p4458_p2, %p4219_p9  ;;  %p4465_p11 = por %p4464_p10, %p4463_p6 }
  0x95   : > { %p4461_p8 = pneg %p4460_p1 }
  0x97   : > { %p4466_p13 = pnand %p4465_p11, %p4461_p8 }
  0x99   : > { %4469 = shalt.err (!%p4466_p13)
}
  0x9a   : > { %3828 = dma.hbm_to_vmem [thread:$0]  (!%p4897_p7), %s892_s5, 16, %s894_s7, %s4909_s18  }
  0x9b   : > { %902 = sbr.rel (%p4806_p3) target bundleno = 8495 (0x212f), region = 116  ;;  %s5006_s0 = sand.u32 (!%p4806_p3), 1, %s4603_s2  }
  0x9c   : > { %s5009_s13 = sshll.u32 (!%p4806_p3), %s5006_s0, 3  ;;  %s905_s3 = scalar_lea.sflag (!%p4806_p3), [#allocation3], %s5006_s0 }
  0x9d   : > { %s908_s19 = scalar_lea.vmem (!%p4806_p3), [#allocation2], %s5009_s13 }
  0xa0   : > { %4558 = dma.done.wait (%p4878_p12), %s905_s3, 128  }
  0xa1   : > { %4560 = vsyncadd (%p4878_p12), %s905_s3, 4294967168  ;;  %s914_s27 = sand.u32 1, %s4801_s8   ;;  %s918_s25 = scalar_lea.vmem [#allocation5], %s5009_s13 }
  0xa2   : > { %s915_s18 = scalar_lea.sflag [#allocation6], %s914_s27 }
  0xa3   : > { %4562 = dma.done.wait (%p4878_p12), %s915_s18, 144  }
  0xa4   : > { %4564 = vsyncadd (%p4878_p12), %s915_s18, 4294967152  ;;  %s927_s6 = scalar_lea.vmem [#allocation7], %s5006_s0  ;;  %p5752_p3 = scmp.eq.s32.totalorder %s4801_s8, 0 }
  0xa6   : > { %4566 = dma.done.wait (%p5752_p3), [#allocation9], 160   ;;  %p5753_p7 = pmov %p5752_p3 }
  0xa7   : > { %p5754_p9 = pmov %p5752_p3 }
  0xa8   : > { %4568 = vsyncadd (%p5753_p7), [#allocation9], 4294967136 }
  0xa9   : > { %4570 = dma.done.wait (%p5754_p9), [#allocation12], 64   ;;  %p5755_p0 = pmov %p5752_p3 }
  0xab   : > { %4572 = vsyncadd (%p5755_p0), [#allocation12], 4294967232  ;;  %p5756_p2 = pmov %p5755_p0 }
  0xac   : > { %p5757_p1 = pmov %p5755_p0 }
  0xad   : > { %4574 = dma.done.wait (%p5756_p2), [#allocation15], 1056  }
  0xae   : > { %4576 = vsyncadd (%p5757_p1), [#allocation15], 4294966240  ;;  %p5758_p12 = pmov %p5755_p0 }
  0xaf   : > { %p5759_p8 = pmov %p5755_p0 }
  0xb0   : > { %4578 = dma.done.wait (%p5758_p12), [#allocation18], 64  }
  0xb1   : > { %4580 = vsyncadd (%p5759_p8), [#allocation18], 4294967232  ;;  %p5760_p6 = pmov %p5755_p0 }
  0xb2   : > { %p5761_p10 = pmov %p5755_p0 }
  0xb3   : > { %4582 = dma.done.wait (%p5760_p6), [#allocation21], 128  }
  0xb4   : > { %4584 = vsyncadd (%p5761_p10), [#allocation21], 4294967168  ;;  %p5762_p11 = pmov %p5755_p0 }
  0xb5   : > { %p5763_p13 = pmov %p5755_p0 }
  0xb6   : > { %4586 = dma.done.wait (%p5762_p11), [#allocation24], 608  }
  0xb7   : > { %4588 = vsyncadd (%p5763_p13), [#allocation24], 4294966688  ;;  %p1073_p3 = scmp.lt.s32.totalorder %s4801_s8, 1  ;;  %v4629_v0 = vmov 0   ;;  %s5764_s16 = sld [smem:[#allocation45_spill]]  ;;  %v1078_v19 = vlaneseq  ;;  %v4630_v22 = vmov 1.0  }
  0xb8   : > { %3928 = vset.pattern.permute.xlu0 %v4629_v0  ;;  %s5765_s5 = sld [smem:[#allocation50_spill]]  ;;  %v1123_v27 = vld [vmem:[#allocation8] sm:$0xff]  ;;  %vm1136_vm1 = vcmask 261120   ;;  %v3929_v30 = vld [vmem:[#allocation10] ss:$0 sm:$0xff]  ;;  %s4631_s9 = smov 64  }
  0xb9   : > { %s1074_s4 = scalar_select %p1073_p3, %s4801_s8, 1  ;;  %v1079_v20 = vand.u32 127, %v1078_v19  ;;  %vm1167_vm2 = vcmask 64512   ;;  %v5141_v39 = vld [vmem:[%s918_s25] sm:$0xff]  ;;  %vm2123_vm10 = vcmask 523264  }
  0xba   : > { %s4632_s17 = smov 96   ;;  %s5693_s20 = smov 88  }
  0xbb   : > { %s3609_s15 = sshll.u32 %s1074_s4, 3  ;;  %s4634_s22 = smov 120  }
  0xbc   : > { %s5690_s3 = smov 56   ;;  %s5691_s27 = smov 112  }
  0xbd   : > { %s1076_s14 = scalar_lea.vmem %s5764_s16, %s3609_s15  ;;  %s5766_s16 = sld [smem:[#allocation51_spill]] }
  0xbe   : > { %v1077_v1 = vld [vmem:[%s1076_s14] sm:$0xff]  ;;  %v1101_v2 = vld [vmem:[%s5765_s5 + $0x78] sm:$0xff]  ;;  %v1100_v3 = vld [vmem:[%s5765_s5 + $0x70] sm:$0xff]  ;;  %s4637_s18 = smov 72   ;;  %s4638_s4 = smov 104  }
  0xbf   : > { %1081 = vperm.xlu0 %3928, %v1077_v1   ;;  %1102 = vmatpush.msra.mxu0 %v1101_v2  ;;  %v1099_v4 = vld [vmem:[%s5765_s5 + $0x68] sm:$0xff]  ;;  %v1098_v5 = vld [vmem:[%s5765_s5 + $0x60] sm:$0xff]  ;;  %v1097_v6 = vld [vmem:[%s5765_s5 + $0x58] sm:$0xff]  ;;  %s5767_s28 = sld [smem:[#allocation53_spill]]  ;;  %s4639_s26 = smov 80  }
  0xc0   : > { %v1096_v7 = vld [vmem:[%s5765_s5 + $0x50] sm:$0xff]  ;;  %v1095_v8 = vld [vmem:[%s5765_s5 + $0x48] sm:$0xff]  ;;  %v1094_v9 = vld [vmem:[%s5765_s5 + $0x40] sm:$0xff]  ;;  %s5688_s7 = smov 40   ;;  %s5689_s23 = smov 48  }
  0xc1   : > { %1103 = vmatpush.msra.mxu0 %v1100_v3  ;;  %v1093_v10 = vld [vmem:[%s5765_s5 + $0x38] sm:$0xff]  ;;  %v1092_v11 = vld [vmem:[%s5765_s5 + $0x30] sm:$0xff]  ;;  %v1091_v12 = vld [vmem:[%s5765_s5 + $0x28] sm:$0xff]  ;;  %s5768_s14 = sld [smem:[#allocation59_spill]]  ;;  %s5772_s29 = smov 112  }
  0xc2   : > { %v1090_v13 = vld [vmem:[%s5765_s5 + $0x20] sm:$0xff]  ;;  %v1089_v14 = vld [vmem:[%s5765_s5 + $0x18] sm:$0xff]  ;;  %v1088_v15 = vld [vmem:[%s5765_s5 + $0x10] sm:$0xff]  ;;  %s5773_s21 = smov 56   ;;  %s5774_s1 = smov 48  }
  0xc3   : > { %1104 = vmatpush.msra.mxu0 %v1099_v4  ;;  %v1087_v16 = vld [vmem:[%s5765_s5 + $0x8] sm:$0xff]  ;;  %v1086_v17 = vld [vmem:[%s5765_s5] sm:$0xff]  ;;  %v1131_v18 = vld [vmem:[%s5766_s16 + $0x18] sm:$0xff]  ;;  %s5775_s25 = smov 40  }
  0xc4   : > { %1152 = vmatpush.msra.mxu1 %v1131_v18  ;;  %v1130_v23 = vld [vmem:[%s5766_s16 + $0x10] sm:$0xff]  ;;  %v1129_v24 = vld [vmem:[%s5766_s16 + $0x8] sm:$0xff]  ;;  %v1128_v25 = vld [vmem:[%s5766_s16] sm:$0xff] }
  0xc5   : > { %1105 = vmatpush.msra.mxu0 %v1098_v5  ;;  %v1160_v54 = vld [vmem:[%s5767_s28] sm:$0xff] }
  0xc6   : > { %1153 = vmatpush.msra.mxu1 %v1130_v23 }
  0xc7   : > { %1106 = vmatpush.msra.mxu0 %v1097_v6 }
  0xc8   : > { %1154 = vmatpush.msra.mxu1 %v1129_v24 }
  0xc9   : > { %1107 = vmatpush.msra.mxu0 %v1096_v7 }
  0xca   : > { %1155 = vmatpush.msra.mxu1 %v1128_v25 }
  0xcb   : > { %1108 = vmatpush.msra.mxu0 %v1095_v8 }
  0xcd   : > { %1109 = vmatpush.msra.mxu0 %v1094_v9 }
  0xcf   : > { %1110 = vmatpush.msra.mxu0 %v1093_v10 }
  0xd1   : > { %1111 = vmatpush.msra.mxu0 %v1092_v11  ;;  %v1161_v11 = vld [vmem:[%s5767_s28 + $0x8] sm:$0xff] }
  0xd2   : > { %1322 = vmatpush.msrb.mxu1 %v1161_v11  ;;  %v1615_v11 = vld [vmem:[%s5649_s12 + $0x8] sm:$0xff] }
  0xd3   : > { %1112 = vmatpush.msra.mxu0 %v1091_v12 }
  0xd5   : > { %1113 = vmatpush.msra.mxu0 %v1090_v13 }
  0xd7   : > { %1114 = vmatpush.msra.mxu0 %v1089_v14 }
  0xd9   : > { %1115 = vmatpush.msra.mxu0 %v1088_v15 }
  0xdb   : > { %1116 = vmatpush.msra.mxu0 %v1087_v16 }
  0xdd   : > { %1117 = vmatpush.msra.mxu0 %v1086_v17 }
 0x131   : > { %v1082_v21 = vpop.permute.xlu0 %1081 }
 0x132   : > { %vm1083_vm0 = vcmp.eq.s32.totalorder %v1082_v21, %v1079_v20 }
 0x133   : > { %3611 = vmatmul.msk.f32.vlgmr.msra.gmra.mxu0 %vm1083_vm0, %v4630_v22 }
 0x1b0   : > { %v1119_v26 = vpop.f32.mrf.mxu0 }
 0x1b1   : > { %v1122_v28 = vmul.f32 5.656854, %v1119_v26 }
 0x1b3   : > { %v5113_v29 = vadd.f32 %v1123_v27, %v1122_v28 }
 0x1b5   : > { %3612 = vmatmul.msk.f32.vlgmr.msra.gmra.mxu1 %vm1136_vm1, %v5113_v29 }
 0x232   : > { %v1157_v31 = vpop.f32.mrf.mxu1 }
 0x233   : > { %v5117_v32 = vadd.f32 %v3929_v30, %v1157_v31 }
 0x235   : > { %1208 = vrot.lane.b32.xlu2 %v5117_v32, %s4631_s9  ;;  %1165 = vrot.lane.b32.xlu0 %v5117_v32, %s4632_s17 }
 0x23d   : > { %1236 = vrot.lane.b32.xlu2 %v5117_v32, %s5693_s20  ;;  %1234 = vrot.lane.b32.xlu0 %v5117_v32, %s4634_s22 }
 0x245   : > { %1278 = vrot.lane.b32.xlu0 %v5117_v32, %s5690_s3 }
 0x24d   : > { %1350 = vrot.lane.b32.xlu0 %v5117_v32, %s5691_s27 }
 0x255   : > { %1446 = vrot.lane.b32.xlu0 %v5117_v32, %s4637_s18 }
 0x25d   : > { %1444 = vrot.lane.b32.xlu0 %v5117_v32, %s4638_s4 }
 0x28f   : > { %v1209_v33 = vpop.permute.xlu2 %1208 }
 0x290   : > { %1229 = vmatpush.msra.mxu3 %v1209_v33 }
 0x297   : > { %v1237_v34 = vpop.permute.xlu2 %1236 }
 0x298   : > { %3616 = vmatpush.xpose.msk.msrb.mxu3 %vm1167_vm2, %v1237_v34 }
 0x2a7   : > { %v1166_v35 = vpop.permute.xlu0 %1165 }
 0x2a8   : > { %3613 = vmatpush.xpose.msk.msra.mxu2 %vm1167_vm2, %v1166_v35 }
 0x2ab   : > { %3614 = vmatmul.msk.f32.vlgmr.msra.gmra.mxu2 %vm1167_vm2, %v5117_v32 }
 0x2af   : > { %v1235_v36 = vpop.permute.xlu0 %1234 }
 0x2b7   : > { %v1279_v37 = vpop.permute.xlu0 %1278 }
 0x2b8   : > { %1299 = vmatpush.msrb.mxu2 %v1279_v37 }
 0x2bf   : > { %v1351_v3 = vpop.permute.xlu0 %1350 }
 0x2c7   : > { %v1447_v9 = vpop.permute.xlu0 %1446 }
 0x2cf   : > { %v1445_v10 = vpop.permute.xlu0 %1444 }
 0x32e   : > { %v1189_v38 = vpop.f32.mrf.mxu2 }
 0x32f   : > { %v1192_v40 = vmul.f32 0.35355338, %v1189_v38 }
 0x331   : > { %v1193_v41 = vadd.f32 %v1192_v40, %v5141_v39 }
 0x333   : > { %v1194_v42 = vsel %vm1167_vm2, %v1193_v41, -inf }
 0x334   : > { %1195 = vmax.xlane.f32.xlu1 %v1194_v42 }
 0x3a7   : > { %v1196_v43 = vpop.xlane.xlu1 %1195 }
 0x3a8   : > { %v1197_v44 = vsub.f32 %v1193_v41, %v1196_v43 }
 0x3aa   : > { %v1198_v45 = vmul.f32 1.442695, %v1197_v44 }
 0x3ac   : > { %3957 = vpow2.f32 %v1198_v45 }
 0x3b2   : > { %v3958_v46 = vpop.eup %3957 }
 0x3b3   : > { %v1200_v47 = vsel %vm1167_vm2, %v3958_v46, 0.0 }
 0x3b4   : > { %1201 = vadd.xlane.f32.xlu1 %v1200_v47  ;;  %v1162_v47 = vld [vmem:[%s5767_s28 + $0x10] sm:$0xff] }
 0x427   : > { %v1202_v48 = vpop.xlane.xlu1 %1201 }
 0x428   : > { %3959 = vrcp.f32 %v1202_v48 }
 0x42e   : > { %v3960_v49 = vpop.eup %3959 }
 0x42f   : > { %v1204_v50 = vmul.f32 %v3960_v49, %v1202_v48  ;;  %v1163_v48 = vld [vmem:[%s5767_s28 + $0x18] sm:$0xff] }
 0x431   : > { %v1205_v51 = vsub.f32 2.0, %v1204_v50 }
 0x433   : > { %v1206_v52 = vmul.f32 %v3960_v49, %v1205_v51 }
 0x435   : > { %v1207_v53 = vmul.f32 %v3958_v46, %v1206_v52 }
 0x437   : > { %3615 = vmatmul.msk.f32.vlgmr.msra.gmra.mxu3 %vm1167_vm2, %v1207_v53 }
 0x438   : > { %1345 = vmatpush.msra.mxu3 %v1160_v54 }
 0x43f   : > { %3617 = vmatmul.msk.f32.vlgmr.msrb.gmra.mxu3 %vm1167_vm2, %v1235_v36 }
 0x440   : > { %1438 = vmatpush.msrb.mxu3 %v1162_v47 }
 0x4ba   : > { %v1231_v55 = vpop.f32.mrf.mxu3 }
 0x4bb   : > { %3620 = vmatmul.msk.f32.vlgmr.msra.gmra.mxu3 %vm1167_vm2, %v1231_v55 }
 0x4bc   : > { %1532 = vmatpush.msra.mxu3 %v1163_v48 }
 0x4c2   : > { %v1259_v56 = vpop.f32.mrf.mxu3 }
 0x4c3   : > { %v1262_v57 = vmul.f32 0.35355338, %v1259_v56 }
 0x4c5   : > { %v1263_v58 = vadd.f32 %v1262_v57, %v5141_v39 }
 0x4c7   : > { %v1264_v59 = vsel %vm1167_vm2, %v1263_v58, -inf }
 0x4c8   : > { %1265 = vmax.xlane.f32.xlu1 %v1264_v59 }
 0x4e1   : > { %1352 = vrot.lane.b32.xlu1 %v5117_v32, %s4639_s26 }
 0x53b   : > { %v1266_v60 = vpop.xlane.xlu1 %1265 }
 0x53c   : > { %v1267_v61 = vsub.f32 %v1263_v58, %v1266_v60  ;;  %v3930_v58 = vld [vmem:[#allocation11] ss:$0 sm:$0xff] }
 0x53e   : > { %v1268_v62 = vmul.f32 1.442695, %v1267_v61  ;;  %v1347_v52 = vpop.f32.mrf.mxu3 }
 0x540   : > { %3961 = vpow2.f32 %v1268_v62  ;;  %v4642_v62 = vmov 32.0  }
 0x546   : > { %v3962_v63 = vpop.eup %3961 }
 0x547   : > { %v1270_v0 = vsel %vm1167_vm2, %v3962_v63, 0.0 }
 0x548   : > { %1271 = vadd.xlane.f32.xlu2 %v1270_v0 }
 0x553   : > { %v1353_v1 = vpop.permute.xlu1 %1352 }
 0x554   : > { %3621 = vmatpush.xpose.msk.msra.mxu2 %vm1167_vm2, %v1353_v1 }
 0x5bb   : > { %v1272_v2 = vpop.xlane.xlu2 %1271 }
 0x5bc   : > { %3963 = vrcp.f32 %v1272_v2 }
 0x5c2   : > { %v3964_v4 = vpop.eup %3963 }
 0x5c3   : > { %v1274_v5 = vmul.f32 %v3964_v4, %v1272_v2 }
 0x5c5   : > { %v1275_v6 = vsub.f32 2.0, %v1274_v5 }
 0x5c7   : > { %v1276_v7 = vmul.f32 %v3964_v4, %v1275_v6 }
 0x5c9   : > { %v1277_v8 = vmul.f32 %v3962_v63, %v1276_v7 }
 0x5cb   : > { %3618 = vmatmul.msk.f32.vlgmr.msrb.gmra.mxu2 %vm1167_vm2, %v1277_v8 }
 0x5cc   : > { %3625 = vmatpush.xpose.msk.msrb.mxu2 %vm1167_vm2, %v1447_v9  ;;  %v1617_v9 = vld [vmem:[%s5649_s12 + $0x18] sm:$0xff] }
 0x5d3   : > { %3622 = vmatmul.msk.f32.vlgmr.msra.gmra.mxu2 %vm1167_vm2, %v1351_v3 }
 0x5db   : > { %3626 = vmatmul.msk.f32.vlgmr.msrb.gmra.mxu2 %vm1167_vm2, %v1445_v10  ;;  %v1616_v10 = vld [vmem:[%s5649_s12 + $0x10] sm:$0xff] }
 0x64e   : > { %v1301_v12 = vpop.f32.mrf.mxu2 }
 0x64f   : > { %3619 = vmatmul.msk.f32.vlgmr.msrb.gmra.mxu1 %vm1167_vm2, %v1301_v12  ;;  %v1614_v12 = vld [vmem:[%s5649_s12] sm:$0xff] }
 0x656   : > { %v1375_v13 = vpop.f32.mrf.mxu2 }
 0x657   : > { %v1378_v14 = vmul.f32 0.35355338, %v1375_v13  ;;  %v5206_v13 = vld [vmem:[%s908_s19] sm:$0xff] }
 0x659   : > { %v1379_v15 = vadd.f32 %v1378_v14, %v5141_v39  ;;  %v1586_v14 = vld [vmem:[%s5647_s10 + $0x18] sm:$0xff] }
 0x65a   : > { %1606 = vmatpush.msra.mxu2 %v1586_v14 }
 0x65b   : > { %v1380_v16 = vsel %vm1167_vm2, %v1379_v15, -inf }
 0x65c   : > { %1381 = vmax.xlane.f32.xlu1 %v1380_v16  ;;  %v1584_v16 = vld [vmem:[%s5647_s10 + $0x8] sm:$0xff] }
 0x65e   : > { %v1469_v17 = vpop.f32.mrf.mxu2 }
 0x65f   : > { %v1472_v18 = vmul.f32 0.35355338, %v1469_v17  ;;  %v1583_v17 = vld [vmem:[%s5647_s10] sm:$0xff] }
 0x661   : > { %v1473_v19 = vadd.f32 %v1472_v18, %v5141_v39 }
 0x663   : > { %v1474_v20 = vsel %vm1167_vm2, %v1473_v19, -inf }
 0x664   : > { %1475 = vmax.xlane.f32.xlu0 %v1474_v20 }
 0x675   : > { %1488 = vrot.lane.b32.xlu1 %v5117_v32, %s5688_s7 }
 0x6cc   : > { %v1324_v49 = vpop.f32.mrf.mxu1 }
 0x6cd   : > { %v1348_v54 = vadd.f32 %v1347_v52, %v1324_v49  ;;  %v1645_v52 = vld [vmem:[#allocation16] sm:$0xff] }
 0x6cf   : > { %v1382_v21 = vpop.xlane.xlu1 %1381 }
 0x6d0   : > { %v1383_v22 = vsub.f32 %v1379_v15, %v1382_v21  ;;  %v1585_v15 = vld [vmem:[%s5647_s10 + $0x10] sm:$0xff] }
 0x6d1   : > { %1607 = vmatpush.msra.mxu2 %v1585_v15 }
 0x6d2   : > { %v1384_v23 = vmul.f32 1.442695, %v1383_v22 }
 0x6d3   : > { %1608 = vmatpush.msra.mxu2 %v1584_v16 }
 0x6d4   : > { %3965 = vpow2.f32 %v1384_v23 }
 0x6d5   : > { %1609 = vmatpush.msra.mxu2 %v1583_v17 }
 0x6d7   : > { %v1476_v24 = vpop.xlane.xlu0 %1475 }
 0x6d8   : > { %v1477_v25 = vsub.f32 %v1473_v19, %v1476_v24 }
 0x6da   : > { %v3966_v26 = vpop.eup %3965  ;;  %v1478_v27 = vmul.f32 1.442695, %v1477_v25 }
 0x6db   : > { %v1386_v28 = vsel %vm1167_vm2, %v3966_v26, 0.0 }
 0x6dc   : > { %3967 = vpow2.f32 %v1478_v27  ;;  %1387 = vadd.xlane.f32.xlu2 %v1386_v28  ;;  %v3931_v27 = vld [vmem:[#allocation22] ss:$0 sm:$0xff] }
 0x6e2   : > { %v3968_v30 = vpop.eup %3967 }
 0x6e3   : > { %v1480_v31 = vsel %vm1167_vm2, %v3968_v30, 0.0 }
 0x6e4   : > { %1481 = vadd.xlane.f32.xlu2 %v1480_v31  ;;  %v3932_v31 = vld [vmem:[#allocation23] ss:$0 sm:$0xff] }
 0x6e7   : > { %v1489_v44 = vpop.permute.xlu1 %1488 }
 0x6fc   : > { %1394 = vrot.lane.b32.xlu2 %v5117_v32, %s5689_s23 }
 0x74f   : > { %v1388_v33 = vpop.xlane.xlu2 %1387 }
 0x750   : > { %3969 = vrcp.f32 %v1388_v33 }
 0x756   : > { %v3970_v34 = vpop.eup %3969 }
 0x757   : > { %v1390_v35 = vmul.f32 %v3970_v34, %v1388_v33  ;;  %v1482_v36 = vpop.xlane.xlu2 %1481 }
 0x758   : > { %3971 = vrcp.f32 %v1482_v36 }
 0x759   : > { %v1391_v37 = vsub.f32 2.0, %v1390_v35  ;;  %3973 = vrcp.f32 %v4642_v62  ;;  %v3933_v35 = vld [vmem:[#allocation14] ss:$0 sm:$0xff] }
 0x75b   : > { %v1392_v38 = vmul.f32 %v3970_v34, %v1391_v37 }
 0x75d   : > { %v1393_v41 = vmul.f32 %v3966_v26, %v1392_v38  ;;  %v3934_v38 = vld [vmem:[#allocation13] ss:$0 sm:$0xff] }
 0x75e   : > { %v3972_v40 = vpop.eup %3971 }
 0x75f   : > { %v1484_v42 = vmul.f32 %v3972_v40, %v1482_v36  ;;  %v1395_v43 = vpop.permute.xlu2 %1394  ;;  %v3974_v63 = vpop.eup %3973 }
 0x760   : > { %1415 = vmatpush.msra.mxu1 %v1395_v43  ;;  %v1550_v0 = vmul.f32 32.0, %v3974_v63  ;;  %vm1554_vm3 = vweird.f32 %v3974_v63  ;;  %v5242_v43 = vld [vmem:[%s927_s6] ss:$0 sm:$0xff]  ;;  %s5769_s6 = sld [smem:[#allocation61_spill]] }
 0x761   : > { %v1485_v45 = vsub.f32 2.0, %v1484_v42  ;;  %3623 = vmatmul.msk.f32.vlgmr.msra.gmra.mxu1 %vm1167_vm2, %v1393_v41 }
 0x762   : > { %1509 = vmatpush.msrb.mxu1 %v1489_v44  ;;  %v1551_v1 = vsub.f32 1.0, %v1550_v0 }
 0x763   : > { %v1486_v46 = vmul.f32 %v3972_v40, %v1485_v45 }
 0x764   : > { %v1552_v2 = vmul.f32 %v3974_v63, %v1551_v1 }
 0x765   : > { %v1487_v32 = vmul.f32 %v3968_v30, %v1486_v46 }
 0x766   : > { %v1553_v3 = vadd.f32 %v3974_v63, %v1552_v2  ;;  %s5770_s15 = smov %s5769_s6 }
 0x768   : > { %v5188_v4 = vsel %vm1554_vm3, %v3974_v63, %v1553_v3 }
 0x769   : > { %3627 = vmatmul.msk.f32.vlgmr.msrb.gmra.mxu1 %vm1167_vm2, %v1487_v32 }
 0x7de   : > { %v1417_v50 = vpop.f32.mrf.mxu1 }
 0x7df   : > { %3624 = vmatmul.msk.f32.vlgmr.msrb.gmra.mxu3 %vm1167_vm2, %v1417_v50 }
 0x7e0   : > { %1637 = vmatpush.msrb.mxu3 %v1617_v9 }
 0x7e2   : > { %1638 = vmatpush.msrb.mxu3 %v1616_v10 }
 0x7e4   : > { %1639 = vmatpush.msrb.mxu3 %v1615_v11 }
 0x7e6   : > { %v1511_v51 = vpop.f32.mrf.mxu1  ;;  %1640 = vmatpush.msrb.mxu3 %v1614_v12 }
 0x7e7   : > { %3628 = vmatmul.msk.f32.vlgmr.msra.gmra.mxu3 %vm1167_vm2, %v1511_v51 }
 0x7ef   : > { %3630 = vmatmul.msk.f32.vlgmr.msrb.gmra.mxu3 %vm1136_vm1, %v5206_v13 }
 0x862   : > { %v1440_v53 = vpop.f32.mrf.mxu3 }
 0x863   : > { %v1443_v55 = vadd.f32 %v1440_v53, %v1348_v54 }
 0x86a   : > { %v1534_v56 = vpop.f32.mrf.mxu3 }
 0x86b   : > { %v1537_v57 = vadd.f32 %v1534_v56, %v1443_v55 }
 0x86d   : > { %v1538_v59 = vadd.f32 %v1537_v57, %v5113_v29 }
 0x86f   : > { %v1543_v60 = vadd.f32 %v3930_v58, %v1538_v59 }
 0x871   : > { %v1546_v61 = vsel %vm1136_vm1, %v1543_v60, 0.0 }
 0x872   : > { %1547 = vadd.xlane.f32.xlu2 %v1546_v61  ;;  %v1642_v36 = vpop.f32.mrf.mxu3 }
 0x873   : > { %v5227_v37 = vadd.f32 %v3933_v35, %v1642_v36 }
 0x875   : > { %1694 = vrot.lane.b32.xlu1 %v5227_v37, %s4632_s17  ;;  %3631 = vmatpush.xpose.msk.msra.mxu1 %vm1167_vm2, %v5227_v37 }
 0x8e5   : > { %v1548_v5 = vpop.xlane.xlu2 %1547 }
 0x8e6   : > { %v1556_v6 = vmul.f32 %v5188_v4, %v1548_v5 }
 0x8e7   : > { %v1695_v42 = vpop.permute.xlu1 %1694 }
 0x8e8   : > { %v1557_v7 = vsub.f32 %v1543_v60, %v1556_v6  ;;  %1715 = vmatpush.msra.mxu3 %v1695_v42 }
 0x8ea   : > { %v1558_v29 = vmul.f32 %v1557_v7, %v1557_v7  ;;  %1831 = vmatpush.msrb.mxu3 %v1645_v52 }
 0x8ec   : > { %v1559_v8 = vsel %vm1136_vm1, %v1558_v29, 0.0 }
 0x8ed   : > { %1560 = vadd.xlane.f32.xlu0 %v1559_v8 }
 0x960   : > { %v1561_v18 = vpop.xlane.xlu0 %1560 }
 0x961   : > { %v1562_v19 = vmul.f32 %v1561_v18, %v5188_v4 }
 0x963   : > { %v1563_v20 = vadd.f32 1e-05, %v1562_v19 }
 0x965   : > { %3975 = vrsqrt.f32 %v1563_v20  ;;  %vm1570_vm5 = vweird.f32 %v1563_v20 }
 0x96b   : > { %v3976_v21 = vpop.eup %3975 }
 0x96c   : > { %v1565_v22 = vmul.f32 %v3976_v21, %v1563_v20  ;;  %vm1571_vm4 = vweird.f32 %v3976_v21 }
 0x96d   : > { %vm1572_vm6 = vmor %vm1570_vm5, %vm1571_vm4 }
 0x96e   : > { %v1566_v23 = vmul.f32 %v3976_v21, %v1565_v22 }
 0x970   : > { %v1567_v24 = vmul.f32 0.5, %v1566_v23 }
 0x972   : > { %v1568_v25 = vsub.f32 1.5, %v1567_v24 }
 0x974   : > { %v1569_v26 = vmul.f32 %v3976_v21, %v1568_v25 }
 0x976   : > { %v1573_v28 = vsel %vm1572_vm6, %v3976_v21, %v1569_v26 }
 0x977   : > { %v1574_v30 = vmul.f32 %v1573_v28, %v1557_v7 }
 0x979   : > { %v1578_v33 = vmul.f32 %v3931_v27, %v1574_v30 }
 0x97b   : > { %v5223_v34 = vadd.f32 %v3932_v31, %v1578_v33 }
 0x97d   : > { %3629 = vmatmul.msk.f32.vlgmr.msra.gmra.mxu2 %vm1136_vm1, %v5223_v34 }
 0xa00   : > { %v1611_v40 = vpop.f32.mrf.mxu2 }
 0xa01   : > { %v1612_v41 = vadd.f32 %v3934_v38, %v1611_v40 }
 0xa03   : > { %1930 = vrot.lane.b32.xlu2 %v1612_v41, %s4638_s4  ;;  %1720 = vrot.lane.b32.xlu1 %v1612_v41, %s4634_s22 }
 0xa04   : > { %3632 = vmatmul.msk.f32.vlgmr.msra.gmra.mxu1 %vm1167_vm2, %v1612_v41 }
 0xa0b   : > { %1932 = vrot.lane.b32.xlu1 %v5227_v37, %s4638_s4 }
 0xa13   : > { %1838 = vrot.lane.b32.xlu1 %v5227_v37, %s5691_s27 }
 0xa5d   : > { %v1931_v2 = vpop.permute.xlu2 %1930 }
 0xa75   : > { %v1721_v53 = vpop.permute.xlu1 %1720 }
 0xa7d   : > { %v1933_v57 = vpop.permute.xlu1 %1932 }
 0xa81   : > { %v1672_v44 = vpop.f32.mrf.mxu1 }
 0xa82   : > { %v1675_v45 = vmul.f32 0.35355338, %v1672_v44 }
 0xa84   : > { %v1679_v46 = vadd.f32 %v5242_v43, %v1675_v45 }
 0xa85   : > { %v1839_v62 = vpop.permute.xlu1 %1838 }
 0xa86   : > { %v1680_v32 = vsel %vm1167_vm2, %v1679_v46, -inf }
 0xa87   : > { %1681 = vmax.xlane.f32.xlu0 %v1680_v32 }
 0xafa   : > { %v1682_v47 = vpop.xlane.xlu0 %1681 }
 0xafb   : > { %v1683_v48 = vsub.f32 %v1679_v46, %v1682_v47 }
 0xafd   : > { %v1684_v49 = vmul.f32 1.442695, %v1683_v48 }
 0xaff   : > { %3977 = vpow2.f32 %v1684_v49 }
 0xb05   : > { %v3978_v50 = vpop.eup %3977 }
 0xb06   : > { %v1686_v51 = vsel %vm1167_vm2, %v3978_v50, 0.0 }
 0xb07   : > { %1687 = vadd.xlane.f32.xlu0 %v1686_v51 }
 0xb1b   : > { %1722 = vrot.lane.b32.xlu0 %v5227_v37, %s4634_s22 }
 0xb23   : > { %1836 = vrot.lane.b32.xlu0 %v1612_v41, %s5691_s27 }
 0xb7a   : > { %v1688_v54 = vpop.xlane.xlu0 %1687 }
 0xb7b   : > { %3979 = vrcp.f32 %v1688_v54 }
 0xb81   : > { %v3980_v55 = vpop.eup %3979 }
 0xb82   : > { %v1690_v56 = vmul.f32 %v3980_v55, %v1688_v54 }
 0xb84   : > { %v1691_v58 = vsub.f32 2.0, %v1690_v56  ;;  %v1646_v56 = vld [vmem:[#allocation16 + $0x8] sm:$0xff] }
 0xb85   : > { %1808 = vmatpush.msrb.mxu1 %v1646_v56 }
 0xb86   : > { %v1692_v59 = vmul.f32 %v3980_v55, %v1691_v58  ;;  %v1647_v58 = vld [vmem:[#allocation16 + $0x10] sm:$0xff] }
 0xb87   : > { %1924 = vmatpush.msra.mxu1 %v1647_v58 }
 0xb88   : > { %v5250_v60 = vmul.f32 %v3978_v50, %v1692_v59 }
 0xb8a   : > { %3633 = vmatmul.msk.f32.vlgmr.msra.gmra.mxu3 %vm1167_vm2, %v5250_v60 }
 0xb8b   : > { %3643 = vmatpush.xpose.msk.msra.mxu3 %vm1167_vm2, %v1933_v57  ;;  %v1648_v57 = vld [vmem:[#allocation16 + $0x18] sm:$0xff] }
 0xb8d   : > { %v1723_v61 = vpop.permute.xlu0 %1722 }
 0xb8e   : > { %3634 = vmatpush.xpose.msk.msrb.mxu2 %vm1167_vm2, %v1723_v61 }
 0xb91   : > { %3635 = vmatmul.msk.f32.vlgmr.msrb.gmra.mxu2 %vm1167_vm2, %v1721_v53 }
 0xb92   : > { %3639 = vmatpush.xpose.msk.msra.mxu2 %vm1167_vm2, %v1839_v62 }
 0xb95   : > { %v1837_v63 = vpop.permute.xlu0 %1836 }
 0xb99   : > { %3640 = vmatmul.msk.f32.vlgmr.msra.gmra.mxu2 %vm1167_vm2, %v1837_v63 }
 0xc0d   : > { %v1717_v0 = vpop.f32.mrf.mxu3 }
 0xc0e   : > { %3638 = vmatmul.msk.f32.vlgmr.msrb.gmra.mxu3 %vm1167_vm2, %v1717_v0 }
 0xc14   : > { %v1745_v1 = vpop.f32.mrf.mxu2 }
 0xc15   : > { %v1748_v3 = vmul.f32 0.35355338, %v1745_v1 }
 0xc16   : > { %3644 = vmatmul.msk.f32.vlgmr.msra.gmra.mxu3 %vm1167_vm2, %v1931_v2 }
 0xc17   : > { %v1749_v5 = vadd.f32 %v5242_v43, %v1748_v3 }
 0xc19   : > { %v1750_v6 = vsel %vm1167_vm2, %v1749_v5, -inf }
 0xc1a   : > { %1751 = vmax.xlane.f32.xlu1 %v1750_v6  ;;  %v3936_v6 = vld [vmem:[#allocation17] ss:$0 sm:$0xff] }
 0xc1c   : > { %v1861_v7 = vpop.f32.mrf.mxu2 }
 0xc1d   : > { %v1864_v29 = vmul.f32 0.35355338, %v1861_v7 }
 0xc1f   : > { %v1865_v8 = vadd.f32 %v5242_v43, %v1864_v29 }
 0xc21   : > { %v1866_v9 = vsel %vm1167_vm2, %v1865_v8, -inf }
 0xc22   : > { %1867 = vmax.xlane.f32.xlu2 %v1866_v9 }
 0xc3a   : > { %1974 = vrot.lane.b32.xlu2 %v5227_v37, %s4637_s18 }
 0xc8d   : > { %v1752_v10 = vpop.xlane.xlu1 %1751 }
 0xc8e   : > { %v1753_v11 = vsub.f32 %v1749_v5, %v1752_v10 }
 0xc90   : > { %v1754_v12 = vmul.f32 1.442695, %v1753_v11 }
 0xc91   : > { %v5267_v14 = vpop.f32.mrf.mxu3 }
 0xc92   : > { %3981 = vpow2.f32 %v1754_v12 }
 0xc95   : > { %v1868_v15 = vpop.xlane.xlu2 %1867 }
 0xc96   : > { %v1869_v16 = vsub.f32 %v1865_v8, %v1868_v15 }
 0xc98   : > { %v3982_v17 = vpop.eup %3981  ;;  %v1870_v18 = vmul.f32 1.442695, %v1869_v16  ;;  %v2080_v16 = vld [vmem:[%s5768_s14 + $0x8] sm:$0xff] }
 0xc99   : > { %v1955_v19 = vpop.f32.mrf.mxu3  ;;  %v1756_v20 = vsel %vm1167_vm2, %v3982_v17, 0.0 }
 0xc9a   : > { %3983 = vpow2.f32 %v1870_v18  ;;  %v1958_v21 = vmul.f32 0.35355338, %v1955_v19  ;;  %1757 = vadd.xlane.f32.xlu1 %v1756_v20  ;;  %v2118_v18 = vld [vmem:[%s5769_s6 + $0x38] sm:$0xff]  ;;  %v2117_v19 = vld [vmem:[%s5770_s15 + $0x30] sm:$0xff]  ;;  %v2116_v20 = vld [vmem:[%s5770_s15 + $0x28] sm:$0xff]  ;;  %s4645_s6 = smov 24  }
 0xc9b   : > { %2135 = vmatpush.msrb.mxu3 %v2118_v18  ;;  %v3943_v18 = vld [vmem:[#allocation10 + $0x1] ss:$0 sm:$0xff] }
 0xc9c   : > { %v1959_v22 = vadd.f32 %v5242_v43, %v1958_v21 }
 0xc9d   : > { %v1975_v23 = vpop.permute.xlu2 %1974  ;;  %2136 = vmatpush.msrb.mxu3 %v2117_v19 }
 0xc9e   : > { %1995 = vmatpush.msrb.mxu2 %v1975_v23  ;;  %v1960_v24 = vsel %vm1167_vm2, %v1959_v22, -inf  ;;  %v2115_v23 = vld [vmem:[%s5770_s15 + $0x20] sm:$0xff] }
 0xc9f   : > { %1961 = vmax.xlane.f32.xlu0 %v1960_v24  ;;  %2137 = vmatpush.msrb.mxu3 %v2116_v20 }
 0xca0   : > { %v3984_v25 = vpop.eup %3983 }
 0xca1   : > { %v1872_v26 = vsel %vm1167_vm2, %v3984_v25, 0.0  ;;  %2138 = vmatpush.msrb.mxu3 %v2115_v23 }
 0xca2   : > { %1873 = vadd.xlane.f32.xlu1 %v1872_v26 }
 0xcbb   : > { %1880 = vrot.lane.b32.xlu1 %v5227_v37, %s4639_s26 }
 0xd0d   : > { %v1758_v35 = vpop.xlane.xlu1 %1757 }
 0xd12   : > { %v1962_v27 = vpop.xlane.xlu0 %1961 }
 0xd13   : > { %v1963_v28 = vsub.f32 %v1959_v22, %v1962_v27 }
 0xd15   : > { %v1964_v30 = vmul.f32 1.442695, %v1963_v28  ;;  %v1874_v38 = vpop.xlane.xlu1 %1873 }
 0xd17   : > { %3985 = vpow2.f32 %v1964_v30 }
 0xd18   : > { %3987 = vrcp.f32 %v1758_v35 }
 0xd1d   : > { %v3986_v31 = vpop.eup %3985 }
 0xd1e   : > { %v1966_v33 = vsel %vm1167_vm2, %v3986_v31, 0.0  ;;  %v3988_v40 = vpop.eup %3987 }
 0xd1f   : > { %1967 = vadd.xlane.f32.xlu0 %v1966_v33  ;;  %v1760_v42 = vmul.f32 %v3988_v40, %v1758_v35  ;;  %v3937_v35 = vld [vmem:[#allocation22 + $0x1] ss:$0 sm:$0xff] }
 0xd21   : > { %v1761_v46 = vsub.f32 2.0, %v1760_v42 }
 0xd23   : > { %v1762_v49 = vmul.f32 %v3988_v40, %v1761_v46  ;;  %v3938_v40 = vld [vmem:[#allocation23 + $0x1] ss:$0 sm:$0xff]  ;;  %v2111_v46 = vld [vmem:[%s5770_s15] sm:$0xff] }
 0xd2d   : > { %v1881_v53 = vpop.permute.xlu1 %1880 }
 0xd33   : > { %1764 = vrot.lane.b32.xlu0 %v5227_v37, %s5693_s20  ;;  %v5282_v37 = vmul.f32 %v3982_v17, %v1762_v49  ;;  %v2079_v17 = vld [vmem:[%s5768_s14] sm:$0xff] }
 0xd92   : > { %v1968_v36 = vpop.xlane.xlu0 %1967 }
 0xd93   : > { %3989 = vrcp.f32 %v1968_v36 }
 0xd94   : > { %3991 = vrcp.f32 %v1874_v38 }
 0xd99   : > { %v3990_v41 = vpop.eup %3989 }
 0xd9a   : > { %v1970_v44 = vmul.f32 %v3990_v41, %v1968_v36  ;;  %v3992_v32 = vpop.eup %3991 }
 0xd9b   : > { %v1876_v50 = vmul.f32 %v3992_v32, %v1874_v38 }
 0xd9c   : > { %v1971_v45 = vsub.f32 2.0, %v1970_v44  ;;  %v2113_v44 = vld [vmem:[%s5770_s15 + $0x10] sm:$0xff] }
 0xd9d   : > { %v1877_v51 = vsub.f32 2.0, %v1876_v50 }
 0xd9e   : > { %v1972_v47 = vmul.f32 %v3990_v41, %v1971_v45  ;;  %v2112_v45 = vld [vmem:[%s5770_s15 + $0x8] sm:$0xff] }
 0xd9f   : > { %v1878_v54 = vmul.f32 %v3992_v32, %v1877_v51  ;;  %v3939_v32 = vld [vmem:[#allocation19] ss:$0 sm:$0xff]  ;;  %v3940_v51 = vld [vmem:[#allocation20] ss:$0 sm:$0xff] }
 0xda0   : > { %v5278_v48 = vmul.f32 %v3986_v31, %v1972_v47 }
 0xda1   : > { %v5286_v55 = vmul.f32 %v3984_v25, %v1878_v54  ;;  %v2114_v25 = vld [vmem:[%s5770_s15 + $0x18] sm:$0xff] }
 0xda2   : > { %3645 = vmatmul.msk.f32.vlgmr.msrb.gmra.mxu2 %vm1167_vm2, %v5278_v48  ;;  %2139 = vmatpush.msrb.mxu3 %v2114_v25 }
 0xda4   : > { %2140 = vmatpush.msrb.mxu3 %v2113_v44 }
 0xda5   : > { %v1765_v52 = vpop.permute.xlu0 %1764 }
 0xda6   : > { %1785 = vmatpush.msrb.mxu0 %v1765_v52  ;;  %2141 = vmatpush.msrb.mxu3 %v2112_v45 }
 0xda7   : > { %3636 = vmatmul.msk.f32.vlgmr.msrb.gmra.mxu0 %vm1167_vm2, %v5282_v37 }
 0xda8   : > { %1901 = vmatpush.msra.mxu0 %v1881_v53  ;;  %2142 = vmatpush.msrb.mxu3 %v2111_v46 }
 0xdaa   : > { %2018 = vmatpush.msrb.mxu0 %v1648_v57 }
 0xdaf   : > { %3641 = vmatmul.msk.f32.vlgmr.msra.gmra.mxu0 %vm1167_vm2, %v5286_v55 }
 0xe24   : > { %v1787_v59 = vpop.f32.mrf.mxu0 }
 0xe25   : > { %3637 = vmatmul.msk.f32.vlgmr.msrb.gmra.mxu1 %vm1167_vm2, %v1787_v59  ;;  %v1997_v61 = vpop.f32.mrf.mxu2 }
 0xe26   : > { %3646 = vmatmul.msk.f32.vlgmr.msrb.gmra.mxu0 %vm1167_vm2, %v1997_v61 }
 0xe2c   : > { %v1903_v62 = vpop.f32.mrf.mxu0 }
 0xe2d   : > { %3642 = vmatmul.msk.f32.vlgmr.msra.gmra.mxu1 %vm1167_vm2, %v1903_v62 }
 0xea2   : > { %v1810_v63 = vpop.f32.mrf.mxu1 }
 0xea3   : > { %v1834_v0 = vadd.f32 %v5267_v14, %v1810_v63  ;;  %v2020_v3 = vpop.f32.mrf.mxu0  ;;  %v2082_v14 = vld [vmem:[%s5768_s14 + $0x18] sm:$0xff] }
 0xea4   : > { %2102 = vmatpush.msrb.mxu1 %v2082_v14  ;;  %v3652_v63 = vld [vmem:[%s5766_s16 + $0x38] sm:$0xff] }
 0xea5   : > { %2207 = vmatpush.msra.mxu2 %v3652_v63 }
 0xeaa   : > { %v1926_v1 = vpop.f32.mrf.mxu1 }
 0xeab   : > { %v1929_v2 = vadd.f32 %v1926_v1, %v1834_v0  ;;  %v3651_v0 = vld [vmem:[%s5766_s16 + $0x30] sm:$0xff]  ;;  %v3650_v1 = vld [vmem:[%s5766_s16 + $0x28] sm:$0xff] }
 0xeac   : > { %2208 = vmatpush.msra.mxu2 %v3651_v0 }
 0xead   : > { %v2023_v5 = vadd.f32 %v2020_v3, %v1929_v2  ;;  %v3649_v2 = vld [vmem:[%s5766_s16 + $0x20] sm:$0xff] }
 0xeae   : > { %2209 = vmatpush.msra.mxu2 %v3650_v1 }
 0xeaf   : > { %v2039_v7 = vadd.f32 %v2023_v5, %v5223_v34  ;;  %v2081_v34 = vld [vmem:[%s5768_s14 + $0x10] sm:$0xff] }
 0xeb0   : > { %2103 = vmatpush.msrb.mxu1 %v2081_v34  ;;  %2210 = vmatpush.msra.mxu2 %v3649_v2  ;;  %v3942_v34 = vld [vmem:[#allocation23 + $0x2] ss:$0 sm:$0xff] }
 0xeb1   : > { %v2044_v29 = vadd.f32 %v3936_v6, %v2039_v7 }
 0xeb2   : > { %2104 = vmatpush.msrb.mxu1 %v2080_v16 }
 0xeb3   : > { %v2049_v8 = vsel %vm1136_vm1, %v2044_v29, 0.0 }
 0xeb4   : > { %2050 = vadd.xlane.f32.xlu0 %v2049_v8  ;;  %2105 = vmatpush.msrb.mxu1 %v2079_v17 }
 0xf27   : > { %v2051_v9 = vpop.xlane.xlu0 %2050 }
 0xf28   : > { %v2052_v10 = vmul.f32 %v2051_v9, %v5188_v4 }
 0xf2a   : > { %v2053_v11 = vsub.f32 %v2044_v29, %v2052_v10 }
 0xf2c   : > { %v2054_v12 = vmul.f32 %v2053_v11, %v2053_v11 }
 0xf2e   : > { %v2055_v15 = vsel %vm1136_vm1, %v2054_v12, 0.0  ;;  %v3941_v12 = vld [vmem:[#allocation22 + $0x2] ss:$0 sm:$0xff] }
 0xf2f   : > { %2056 = vadd.xlane.f32.xlu2 %v2055_v15 }
 0xfa2   : > { %v2057_v21 = vpop.xlane.xlu2 %2056 }
 0xfa3   : > { %v2058_v22 = vmul.f32 %v2057_v21, %v5188_v4 }
 0xfa5   : > { %v2059_v24 = vadd.f32 1e-05, %v2058_v22 }
 0xfa7   : > { %3993 = vrsqrt.f32 %v2059_v24  ;;  %vm2066_vm8 = vweird.f32 %v2059_v24 }
 0xfad   : > { %v3994_v26 = vpop.eup %3993 }
 0xfae   : > { %v2061_v27 = vmul.f32 %v3994_v26, %v2059_v24  ;;  %vm2067_vm7 = vweird.f32 %v3994_v26 }
 0xfaf   : > { %vm2068_vm9 = vmor %vm2066_vm8, %vm2067_vm7 }
 0xfb0   : > { %v2062_v28 = vmul.f32 %v3994_v26, %v2061_v27 }
 0xfb2   : > { %v2063_v30 = vmul.f32 0.5, %v2062_v28 }
 0xfb4   : > { %v2064_v31 = vsub.f32 1.5, %v2063_v30 }
 0xfb6   : > { %v2065_v33 = vmul.f32 %v3994_v26, %v2064_v31 }
 0xfb8   : > { %v2069_v36 = vsel %vm2068_vm9, %v3994_v26, %v2065_v33  ;;  %v3654_v26 = vld [vmem:[%s5767_s28 + $0x20] sm:$0xff]  ;;  %vm2036_vm9 = vcmask 195584  }
 0xfb9   : > { %v2070_v38 = vmul.f32 %v2069_v36, %v2053_v11  ;;  %2400 = vmatpush.msra.mxu3 %v3654_v26 }
 0xfbb   : > { %v2074_v41 = vmul.f32 %v3937_v35, %v2070_v38 }
 0xfbd   : > { %v2078_v42 = vadd.f32 %v3938_v40, %v2074_v41 }
 0xfbf   : > { %3647 = vmatmul.msk.f32.vlgmr.msrb.gmra.mxu1 %vm1136_vm1, %v2078_v42 }
0x103c   : > { %v2107_v47 = vpop.f32.mrf.mxu1 }
0x103d   : > { %v2108_v49 = vadd.f32 %v3939_v32, %v2107_v47 }
0x103f   : > { %v2110_v50 = vmax.f32 %v2108_v49, 0.0 }
0x1041   : > { %3648 = vmatmul.msk.f32.vlgmr.msrb.gmra.mxu3 %vm2123_vm10, %v2110_v50 }
0x10c4   : > { %v2144_v52 = vpop.f32.mrf.mxu3 }
0x10c5   : > { %v2145_v53 = vadd.f32 %v3940_v51, %v2144_v52 }
0x10c7   : > { %v2147_v54 = vadd.f32 %v2145_v53, %v2078_v42 }
0x10c9   : > { %v2152_v56 = vsel %vm1136_vm1, %v2147_v54, 0.0 }
0x10ca   : > { %2153 = vadd.xlane.f32.xlu1 %v2152_v56 }
0x113d   : > { %v2154_v57 = vpop.xlane.xlu1 %2153 }
0x113e   : > { %v2155_v58 = vmul.f32 %v2154_v57, %v5188_v4 }
0x1140   : > { %v2156_v59 = vsub.f32 %v2147_v54, %v2155_v58 }
0x1142   : > { %v2157_v61 = vmul.f32 %v2156_v59, %v2156_v59 }
0x1144   : > { %v2158_v62 = vsel %vm1136_vm1, %v2157_v61, 0.0 }
0x1145   : > { %2159 = vadd.xlane.f32.xlu0 %v2158_v62 }
0x11b8   : > { %v2160_v3 = vpop.xlane.xlu0 %2159 }
0x11b9   : > { %v2161_v5 = vmul.f32 %v2160_v3, %v5188_v4 }
0x11bb   : > { %v2162_v6 = vadd.f32 1e-05, %v2161_v5 }
0x11bd   : > { %3995 = vrsqrt.f32 %v2162_v6  ;;  %vm2169_vm12 = vweird.f32 %v2162_v6 }
0x11c3   : > { %v3996_v7 = vpop.eup %3995 }
0x11c4   : > { %v2164_v29 = vmul.f32 %v3996_v7, %v2162_v6  ;;  %vm2170_vm11 = vweird.f32 %v3996_v7 }
0x11c5   : > { %vm2171_vm13 = vmor %vm2169_vm12, %vm2170_vm11 }
0x11c6   : > { %v2165_v8 = vmul.f32 %v3996_v7, %v2164_v29 }
0x11c8   : > { %v2166_v9 = vmul.f32 0.5, %v2165_v8 }
0x11ca   : > { %v2167_v10 = vsub.f32 1.5, %v2166_v9 }
0x11cc   : > { %v2168_v11 = vmul.f32 %v3996_v7, %v2167_v10 }
0x11ce   : > { %v2172_v15 = vsel %vm2171_vm13, %v3996_v7, %v2168_v11 }
0x11cf   : > { %v2173_v14 = vmul.f32 %v2172_v15, %v2156_v59 }
0x11d1   : > { %v2177_v16 = vmul.f32 %v3941_v12, %v2173_v14 }
0x11d3   : > { %v5353_v17 = vadd.f32 %v3942_v34, %v2177_v16 }
0x11d5   : > { %3653 = vmatmul.msk.f32.vlgmr.msra.gmra.mxu2 %vm1136_vm1, %v5353_v17 }
0x1258   : > { %v2212_v19 = vpop.f32.mrf.mxu2 }
0x1259   : > { %v5357_v20 = vadd.f32 %v3943_v18, %v2212_v19 }
0x125b   : > { %2221 = vrot.lane.b32.xlu2 %v5357_v20, %s4632_s17 }
0x1263   : > { %2289 = vrot.lane.b32.xlu2 %v5357_v20, %s4634_s22 }
0x126b   : > { %2499 = vrot.lane.b32.xlu2 %v5357_v20, %s4638_s4 }
0x12b5   : > { %v2222_v21 = vpop.permute.xlu2 %2221 }
0x12b6   : > { %3658 = vmatpush.xpose.msk.msra.mxu0 %vm1167_vm2, %v2222_v21 }
0x12b9   : > { %3659 = vmatmul.msk.f32.vlgmr.msra.gmra.mxu0 %vm1167_vm2, %v5357_v20 }
0x12bd   : > { %v2290_v47 = vpop.permute.xlu2 %2289 }
0x12c5   : > { %v2500_v51 = vpop.permute.xlu2 %2499 }
0x1336   : > { %v2244_v22 = vpop.f32.mrf.mxu0 }
0x1337   : > { %v2247_v23 = vmul.f32 0.35355338, %v2244_v22 }
0x1339   : > { %v2248_v24 = vadd.f32 %v2247_v23, %v5141_v39 }
0x133b   : > { %v2249_v25 = vsel %vm1167_vm2, %v2248_v24, -inf }
0x133c   : > { %2250 = vmax.xlane.f32.xlu0 %v2249_v25 }
0x1350   : > { %2263 = vrot.lane.b32.xlu0 %v5357_v20, %s4631_s9  ;;  %s5771_s9 = smov 88  }
0x1358   : > { %2501 = vrot.lane.b32.xlu0 %v5357_v20, %s4637_s18 }
0x1360   : > { %2407 = vrot.lane.b32.xlu0 %v5357_v20, %s4639_s26 }
0x13af   : > { %v2251_v27 = vpop.xlane.xlu0 %2250 }
0x13b0   : > { %v2252_v28 = vsub.f32 %v2248_v24, %v2251_v27 }
0x13b2   : > { %v2253_v30 = vmul.f32 1.442695, %v2252_v28 }
0x13b4   : > { %3997 = vpow2.f32 %v2253_v30 }
0x13ba   : > { %v3998_v31 = vpop.eup %3997 }
0x13bb   : > { %v2255_v33 = vsel %vm1167_vm2, %v3998_v31, 0.0 }
0x13bc   : > { %2256 = vadd.xlane.f32.xlu1 %v2255_v33 }
0x13c2   : > { %v2264_v35 = vpop.permute.xlu0 %2263 }
0x13c3   : > { %2284 = vmatpush.msra.mxu1 %v2264_v35 }
0x13ca   : > { %v2502_v36 = vpop.permute.xlu0 %2501 }
0x13cb   : > { %3670 = vmatpush.xpose.msk.msrb.mxu3 %vm1167_vm2, %v2502_v36  ;;  %v3655_v36 = vld [vmem:[%s5767_s28 + $0x28] sm:$0xff] }
0x13cc   : > { %2377 = vmatpush.msrb.mxu1 %v3655_v36 }
0x13d2   : > { %v2408_v32 = vpop.permute.xlu0 %2407 }
0x13d5   : > { %2291 = vrot.lane.b32.xlu1 %v5357_v20, %s5771_s9 }
0x13dd   : > { %2405 = vrot.lane.b32.xlu1 %v5357_v20, %s5772_s29 }
0x142f   : > { %v2257_v38 = vpop.xlane.xlu1 %2256 }
0x1430   : > { %3999 = vrcp.f32 %v2257_v38 }
0x1436   : > { %v4000_v40 = vpop.eup %3999 }
0x1437   : > { %v2259_v41 = vmul.f32 %v4000_v40, %v2257_v38 }
0x1439   : > { %v2260_v42 = vsub.f32 2.0, %v2259_v41 }
0x143b   : > { %v2261_v44 = vmul.f32 %v4000_v40, %v2260_v42  ;;  %v3656_v40 = vld [vmem:[%s5767_s28 + $0x30] sm:$0xff] }
0x143d   : > { %v2262_v45 = vmul.f32 %v3998_v31, %v2261_v44 }
0x143f   : > { %3660 = vmatmul.msk.f32.vlgmr.msra.gmra.mxu1 %vm1167_vm2, %v2262_v45 }
0x1440   : > { %2493 = vmatpush.msra.mxu1 %v3656_v40 }
0x1447   : > { %v2292_v46 = vpop.permute.xlu1 %2291 }
0x1448   : > { %3661 = vmatpush.xpose.msk.msrb.mxu2 %vm1167_vm2, %v2292_v46 }
0x144b   : > { %3662 = vmatmul.msk.f32.vlgmr.msrb.gmra.mxu2 %vm1167_vm2, %v2290_v47 }
0x144c   : > { %3666 = vmatpush.xpose.msk.msra.mxu2 %vm1167_vm2, %v2408_v32 }
0x144f   : > { %v2406_v49 = vpop.permute.xlu1 %2405 }
0x1453   : > { %3667 = vmatmul.msk.f32.vlgmr.msra.gmra.mxu2 %vm1167_vm2, %v2406_v49  ;;  %v3657_v49 = vld [vmem:[%s5767_s28 + $0x38] sm:$0xff] }
0x14bc   : > { %v2286_v50 = vpop.f32.mrf.mxu1 }
0x14bd   : > { %3665 = vmatmul.msk.f32.vlgmr.msra.gmra.mxu3 %vm1167_vm2, %v2286_v50 }
0x14c5   : > { %3671 = vmatmul.msk.f32.vlgmr.msrb.gmra.mxu3 %vm1167_vm2, %v2500_v51 }
0x14ce   : > { %v2314_v52 = vpop.f32.mrf.mxu2 }
0x14cf   : > { %v2317_v53 = vmul.f32 0.35355338, %v2314_v52 }
0x14d1   : > { %v2318_v54 = vadd.f32 %v2317_v53, %v5141_v39 }
0x14d3   : > { %v2319_v56 = vsel %vm1167_vm2, %v2318_v54, -inf }
0x14d4   : > { %2320 = vmax.xlane.f32.xlu2 %v2319_v56 }
0x14d6   : > { %v2430_v57 = vpop.f32.mrf.mxu2 }
0x14d7   : > { %v2433_v58 = vmul.f32 0.35355338, %v2430_v57 }
0x14d9   : > { %v2434_v59 = vadd.f32 %v2433_v58, %v5141_v39  ;;  %v3944_v58 = vld [vmem:[#allocation11 + $0x1] ss:$0 sm:$0xff] }
0x14db   : > { %v2435_v61 = vsel %vm1167_vm2, %v2434_v59, -inf }
0x14dc   : > { %2436 = vmax.xlane.f32.xlu1 %v2435_v61 }
0x1540   : > { %v5396_v62 = vpop.f32.mrf.mxu3 }
0x1547   : > { %v2321_v63 = vpop.xlane.xlu2 %2320 }
0x1548   : > { %v2322_v0 = vsub.f32 %v2318_v54, %v2321_v63  ;;  %v2524_v1 = vpop.f32.mrf.mxu3 }
0x1549   : > { %v2527_v2 = vmul.f32 0.35355338, %v2524_v1 }
0x154a   : > { %v2323_v3 = vmul.f32 1.442695, %v2322_v0  ;;  %v3682_v0 = vld [vmem:[%s5649_s12 + $0x38] sm:$0xff] }
0x154b   : > { %v2528_v5 = vadd.f32 %v2527_v2, %v5141_v39  ;;  %2689 = vmatpush.msra.mxu3 %v3682_v0 }
0x154c   : > { %4001 = vpow2.f32 %v2323_v3 }
0x154d   : > { %v2529_v6 = vsel %vm1167_vm2, %v2528_v5, -inf }
0x154e   : > { %2530 = vmax.xlane.f32.xlu0 %v2529_v6  ;;  %v3680_v6 = vld [vmem:[%s5649_s12 + $0x28] sm:$0xff] }
0x154f   : > { %v2437_v7 = vpop.xlane.xlu1 %2436 }
0x1550   : > { %v2438_v29 = vsub.f32 %v2434_v59, %v2437_v7  ;;  %v3679_v7 = vld [vmem:[%s5649_s12 + $0x20] sm:$0xff] }
0x1552   : > { %v4002_v8 = vpop.eup %4001  ;;  %v2439_v9 = vmul.f32 1.442695, %v2438_v29  ;;  %v3677_v29 = vld [vmem:[%s5647_s10 + $0x38] sm:$0xff] }
0x1553   : > { %v2325_v10 = vsel %vm1167_vm2, %v4002_v8, 0.0 }
0x1554   : > { %4003 = vpow2.f32 %v2439_v9  ;;  %2326 = vadd.xlane.f32.xlu2 %v2325_v10  ;;  %v3675_v9 = vld [vmem:[%s5647_s10 + $0x28] sm:$0xff]  ;;  %v3674_v10 = vld [vmem:[%s5647_s10 + $0x20] sm:$0xff] }
0x155a   : > { %v4004_v11 = vpop.eup %4003 }
0x155b   : > { %v2441_v12 = vsel %vm1167_vm2, %v4004_v11, 0.0 }
0x155c   : > { %2442 = vadd.xlane.f32.xlu1 %v2441_v12 }
0x156c   : > { %2333 = vrot.lane.b32.xlu2 %v5357_v20, %s5773_s21 }
0x1575   : > { %2449 = vrot.lane.b32.xlu1 %v5357_v20, %s5774_s1  ;;  %s3723_s1 = sshll.u32 %s4801_s8, 4 }
0x15c1   : > { %v2531_v39 = vpop.xlane.xlu0 %2530 }
0x15c2   : > { %v2532_v15 = vsub.f32 %v2528_v5, %v2531_v39 }
0x15c4   : > { %v2533_v14 = vmul.f32 1.442695, %v2532_v15 }
0x15c6   : > { %4005 = vpow2.f32 %v2533_v14 }
0x15c7   : > { %v2327_v34 = vpop.xlane.xlu2 %2326 }
0x15c8   : > { %4007 = vrcp.f32 %v2327_v34 }
0x15cc   : > { %v4006_v16 = vpop.eup %4005 }
0x15cd   : > { %v2535_v18 = vsel %vm1167_vm2, %v4006_v16, 0.0 }
0x15ce   : > { %v4008_v19 = vpop.eup %4007  ;;  %2536 = vadd.xlane.f32.xlu0 %v2535_v18 }
0x15cf   : > { %v2329_v21 = vmul.f32 %v4008_v19, %v2327_v34  ;;  %v2443_v22 = vpop.xlane.xlu1 %2442  ;;  %v2334_v23 = vpop.permute.xlu2 %2333 }
0x15d0   : > { %2354 = vmatpush.msrb.mxu0 %v2334_v23  ;;  %4009 = vrcp.f32 %v2443_v22  ;;  %v3946_v23 = vld [vmem:[#allocation23 + $0x3] ss:$0 sm:$0xff] }
0x15d1   : > { %v2330_v24 = vsub.f32 2.0, %v2329_v21 }
0x15d3   : > { %v2331_v25 = vmul.f32 %v4008_v19, %v2330_v24  ;;  %v3945_v19 = vld [vmem:[#allocation22 + $0x3] ss:$0 sm:$0xff] }
0x15d5   : > { %v2332_v26 = vmul.f32 %v4002_v8, %v2331_v25  ;;  %v3676_v8 = vld [vmem:[%s5647_s10 + $0x30] sm:$0xff] }
0x15d6   : > { %v4010_v27 = vpop.eup %4009 }
0x15d7   : > { %3663 = vmatmul.msk.f32.vlgmr.msrb.gmra.mxu0 %vm1167_vm2, %v2332_v26  ;;  %v2445_v28 = vmul.f32 %v4010_v27, %v2443_v22  ;;  %v3947_v26 = vld [vmem:[#allocation14 + $0x1] ss:$0 sm:$0xff] }
0x15d9   : > { %v2446_v30 = vsub.f32 2.0, %v2445_v28 }
0x15db   : > { %v2447_v31 = vmul.f32 %v4010_v27, %v2446_v30  ;;  %v3948_v30 = vld [vmem:[#allocation13 + $0x1] ss:$0 sm:$0xff] }
0x15dd   : > { %v2448_v33 = vmul.f32 %v4004_v11, %v2447_v31 }
0x15e2   : > { %2543 = vrot.lane.b32.xlu0 %v5357_v20, %s5775_s25 }
0x15e7   : > { %v2450_v35 = vpop.permute.xlu1 %2449 }
0x15e8   : > { %2470 = vmatpush.msra.mxu0 %v2450_v35 }
0x15e9   : > { %3668 = vmatmul.msk.f32.vlgmr.msra.gmra.mxu0 %vm1167_vm2, %v2448_v33 }
0x15ea   : > { %2587 = vmatpush.msrb.mxu0 %v3657_v49 }
0x1641   : > { %v2537_v38 = vpop.xlane.xlu0 %2536 }
0x1642   : > { %4011 = vrcp.f32 %v2537_v38 }
0x1648   : > { %v4012_v41 = vpop.eup %4011 }
0x1649   : > { %v2539_v20 = vmul.f32 %v4012_v41, %v2537_v38 }
0x164b   : > { %v2540_v42 = vsub.f32 2.0, %v2539_v20 }
0x164d   : > { %v2541_v44 = vmul.f32 %v4012_v41, %v2540_v42 }
0x164f   : > { %v2542_v45 = vmul.f32 %v4006_v16, %v2541_v44 }
0x1654   : > { %v2544_v46 = vpop.permute.xlu0 %2543  ;;  %v2356_v32 = vpop.f32.mrf.mxu0 }
0x1655   : > { %3664 = vmatmul.msk.f32.vlgmr.msrb.gmra.mxu1 %vm1167_vm2, %v2356_v32  ;;  %2564 = vmatpush.msrb.mxu2 %v2544_v46  ;;  %v2698_v32 = vld [vmem:[#allocation16 + $0x20] sm:$0xff] }
0x1656   : > { %3672 = vmatmul.msk.f32.vlgmr.msrb.gmra.mxu2 %vm1167_vm2, %v2542_v45  ;;  %2659 = vmatpush.msrb.mxu1 %v3677_v29 }
0x1658   : > { %2660 = vmatpush.msrb.mxu1 %v3676_v8 }
0x165a   : > { %2661 = vmatpush.msrb.mxu1 %v3675_v9 }
0x165c   : > { %2662 = vmatpush.msrb.mxu1 %v3674_v10 }
0x1666   : > { %v2472_v47 = vpop.f32.mrf.mxu0 }
0x1667   : > { %3669 = vmatmul.msk.f32.vlgmr.msra.gmra.mxu1 %vm1167_vm2, %v2472_v47 }
0x16d2   : > { %v2379_v51 = vpop.f32.mrf.mxu1 }
0x16d3   : > { %v2403_v53 = vadd.f32 %v5396_v62, %v2379_v51 }
0x16d9   : > { %v2566_v50 = vpop.f32.mrf.mxu2 }
0x16da   : > { %3673 = vmatmul.msk.f32.vlgmr.msrb.gmra.mxu0 %vm1167_vm2, %v2566_v50 }
0x16e4   : > { %v2495_v52 = vpop.f32.mrf.mxu1 }
0x16e5   : > { %v2498_v54 = vadd.f32 %v2495_v52, %v2403_v53 }
0x1757   : > { %v2589_v56 = vpop.f32.mrf.mxu0 }
0x1758   : > { %v2592_v57 = vadd.f32 %v2589_v56, %v2498_v54 }
0x175a   : > { %v2593_v59 = vadd.f32 %v2592_v57, %v5353_v17  ;;  %v3681_v17 = vld [vmem:[%s5649_s12 + $0x30] sm:$0xff] }
0x175b   : > { %2690 = vmatpush.msra.mxu3 %v3681_v17 }
0x175c   : > { %v2599_v61 = vadd.f32 %v3944_v58, %v2593_v59 }
0x175d   : > { %2691 = vmatpush.msra.mxu3 %v3680_v6 }
0x175e   : > { %v2604_v63 = vsel %vm1136_vm1, %v2599_v61, 0.0 }
0x175f   : > { %2605 = vadd.xlane.f32.xlu2 %v2604_v63  ;;  %2692 = vmatpush.msra.mxu3 %v3679_v7 }
0x1760   : > { %3683 = vmatmul.msk.f32.vlgmr.msra.gmra.mxu3 %vm1136_vm1, %v5206_v13 }
0x17d2   : > { %v2606_v1 = vpop.xlane.xlu2 %2605 }
0x17d3   : > { %v2607_v2 = vmul.f32 %v2606_v1, %v5188_v4 }
0x17d5   : > { %v2608_v3 = vsub.f32 %v2599_v61, %v2607_v2 }
0x17d7   : > { %v2609_v62 = vmul.f32 %v2608_v3, %v2608_v3 }
0x17d9   : > { %v2610_v5 = vsel %vm1136_vm1, %v2609_v62, 0.0 }
0x17da   : > { %2611 = vadd.xlane.f32.xlu0 %v2610_v5 }
0x17e3   : > { %v2694_v27 = vpop.f32.mrf.mxu3 }
0x17e4   : > { %v5460_v28 = vadd.f32 %v3947_v26, %v2694_v27 }
0x17e6   : > { %3684 = vmatpush.xpose.msk.msra.mxu2 %vm1167_vm2, %v5460_v28 }
0x17ee   : > { %2744 = vrot.lane.b32.xlu0 %v5460_v28, %s4632_s17  ;;  %s4643_s17 = smov 8  }
0x17f6   : > { %2888 = vrot.lane.b32.xlu0 %v5460_v28, %s5772_s29 }
0x184d   : > { %v2612_v13 = vpop.xlane.xlu0 %2611 }
0x184e   : > { %v2613_v11 = vmul.f32 %v2612_v13, %v5188_v4 }
0x1850   : > { %v2614_v12 = vadd.f32 1e-05, %v2613_v11 }
0x1852   : > { %4013 = vrsqrt.f32 %v2614_v12  ;;  %vm2621_vm15 = vweird.f32 %v2614_v12 }
0x1858   : > { %v4014_v39 = vpop.eup %4013 }
0x1859   : > { %v2616_v15 = vmul.f32 %v4014_v39, %v2614_v12  ;;  %vm2622_vm14 = vweird.f32 %v4014_v39 }
0x185a   : > { %vm2623_vm0 = vmor %vm2621_vm15, %vm2622_vm14 }
0x185b   : > { %v2617_v14 = vmul.f32 %v4014_v39, %v2616_v15 }
0x185d   : > { %v2618_v34 = vmul.f32 0.5, %v2617_v14 }
0x185f   : > { %v2619_v16 = vsub.f32 1.5, %v2618_v34 }
0x1860   : > { %v2745_v35 = vpop.permute.xlu0 %2744 }
0x1861   : > { %v2620_v18 = vmul.f32 %v4014_v39, %v2619_v16  ;;  %2765 = vmatpush.msra.mxu0 %v2745_v35 }
0x1863   : > { %v2624_v21 = vsel %vm2623_vm0, %v4014_v39, %v2620_v18  ;;  %2881 = vmatpush.msrb.mxu0 %v2698_v32 }
0x1864   : > { %v2625_v22 = vmul.f32 %v2624_v21, %v2608_v3 }
0x1866   : > { %v2629_v24 = vmul.f32 %v3945_v19, %v2625_v22 }
0x1868   : > { %v5456_v25 = vadd.f32 %v3946_v23, %v2629_v24  ;;  %v2889_v52 = vpop.permute.xlu0 %2888 }
0x186a   : > { %3678 = vmatmul.msk.f32.vlgmr.msrb.gmra.mxu1 %vm1136_vm1, %v5456_v25 }
0x18e7   : > { %v2664_v31 = vpop.f32.mrf.mxu1 }
0x18e8   : > { %v2665_v33 = vadd.f32 %v3948_v30, %v2664_v31 }
0x18ea   : > { %2886 = vrot.lane.b32.xlu0 %v2665_v33, %s5772_s29  ;;  %3685 = vmatmul.msk.f32.vlgmr.msra.gmra.mxu2 %vm1167_vm2, %v2665_v33  ;;  %s3273_s29 = scalar_lea.sflag [#allocation28], %s5006_s0 }
0x195c   : > { %v2887_v59 = vpop.permute.xlu0 %2886 }
0x196d   : > { %v2725_v36 = vpop.f32.mrf.mxu2 }
0x196e   : > { %v2728_v38 = vmul.f32 0.35355338, %v2725_v36 }
0x1970   : > { %v2729_v40 = vadd.f32 %v5242_v43, %v2728_v38 }
0x1972   : > { %v2730_v41 = vsel %vm1167_vm2, %v2729_v40, -inf }
0x1973   : > { %2731 = vmax.xlane.f32.xlu1 %v2730_v41 }
0x198c   : > { %2770 = vrot.lane.b32.xlu1 %v2665_v33, %s4634_s22 }
0x1994   : > { %2980 = vrot.lane.b32.xlu1 %v2665_v33, %s4638_s4 }
0x19e6   : > { %v2732_v20 = vpop.xlane.xlu1 %2731 }
0x19e7   : > { %v2733_v42 = vsub.f32 %v2729_v40, %v2732_v20 }
0x19e9   : > { %v2734_v44 = vmul.f32 1.442695, %v2733_v42 }
0x19eb   : > { %4015 = vpow2.f32 %v2734_v44 }
0x19f1   : > { %v4016_v45 = vpop.eup %4015 }
0x19f2   : > { %v2736_v46 = vsel %vm1167_vm2, %v4016_v45, 0.0 }
0x19f3   : > { %2737 = vadd.xlane.f32.xlu2 %v2736_v46  ;;  %v2699_v46 = vld [vmem:[#allocation16 + $0x28] sm:$0xff] }
0x19f4   : > { %2858 = vmatpush.msrb.mxu2 %v2699_v46  ;;  %v3953_v46 = vld [vmem:[#allocation20 + $0x1] ss:$0 sm:$0xff] }
0x19fe   : > { %v2771_v54 = vpop.permute.xlu1 %2770 }
0x1a06   : > { %v2981_v17 = vpop.permute.xlu1 %2980 }
0x1a0b   : > { %2772 = vrot.lane.b32.xlu2 %v5460_v28, %s4634_s22  ;;  %s4644_s22 = smov 16  }
0x1a13   : > { %2982 = vrot.lane.b32.xlu2 %v5460_v28, %s4638_s4  ;;  %s5777_s4 = sld [smem:[#allocation68_spill]] }
0x1a66   : > { %v2738_v47 = vpop.xlane.xlu2 %2737 }
0x1a67   : > { %4017 = vrcp.f32 %v2738_v47 }
0x1a6d   : > { %v4018_v49 = vpop.eup %4017 }
0x1a6e   : > { %v2740_v50 = vmul.f32 %v4018_v49, %v2738_v47  ;;  %v2773_v51 = vpop.permute.xlu2 %2772  ;;  %v2700_v47 = vld [vmem:[#allocation16 + $0x30] sm:$0xff] }
0x1a6f   : > { %3687 = vmatpush.xpose.msk.msra.mxu1 %vm1167_vm2, %v2773_v51  ;;  %2974 = vmatpush.msra.mxu2 %v2700_v47 }
0x1a70   : > { %v2741_v53 = vsub.f32 2.0, %v2740_v50 }
0x1a72   : > { %v2742_v56 = vmul.f32 %v4018_v49, %v2741_v53  ;;  %3688 = vmatmul.msk.f32.vlgmr.msra.gmra.mxu1 %vm1167_vm2, %v2771_v54 }
0x1a73   : > { %3692 = vmatpush.xpose.msk.msrb.mxu1 %vm1167_vm2, %v2889_v52 }
0x1a74   : > { %v5482_v57 = vmul.f32 %v4016_v45, %v2742_v56 }
0x1a76   : > { %v2983_v58 = vpop.permute.xlu2 %2982  ;;  %3686 = vmatmul.msk.f32.vlgmr.msra.gmra.mxu0 %vm1167_vm2, %v5482_v57 }
0x1a77   : > { %3696 = vmatpush.xpose.msk.msra.mxu0 %vm1167_vm2, %v2983_v58  ;;  %v2701_v58 = vld [vmem:[#allocation16 + $0x38] sm:$0xff] }
0x1a7a   : > { %3693 = vmatmul.msk.f32.vlgmr.msrb.gmra.mxu1 %vm1167_vm2, %v2887_v59 }
0x1aef   : > { %v2795_v61 = vpop.f32.mrf.mxu1 }
0x1af0   : > { %v2798_v63 = vmul.f32 0.35355338, %v2795_v61 }
0x1af2   : > { %v2799_v0 = vadd.f32 %v5242_v43, %v2798_v63 }
0x1af3   : > { %v2767_v1 = vpop.f32.mrf.mxu0 }
0x1af4   : > { %3691 = vmatmul.msk.f32.vlgmr.msrb.gmra.mxu0 %vm1167_vm2, %v2767_v1  ;;  %v2800_v2 = vsel %vm1167_vm2, %v2799_v0, -inf }
0x1af5   : > { %2801 = vmax.xlane.f32.xlu0 %v2800_v2 }
0x1af7   : > { %v2911_v3 = vpop.f32.mrf.mxu1 }
0x1af8   : > { %v2914_v62 = vmul.f32 0.35355338, %v2911_v3 }
0x1afa   : > { %v2915_v5 = vadd.f32 %v5242_v43, %v2914_v62  ;;  %v3949_v62 = vld [vmem:[#allocation17 + $0x1] ss:$0 sm:$0xff] }
0x1afc   : > { %3697 = vmatmul.msk.f32.vlgmr.msra.gmra.mxu0 %vm1167_vm2, %v2981_v17  ;;  %v2916_v6 = vsel %vm1167_vm2, %v2915_v5, -inf }
0x1afd   : > { %2917 = vmax.xlane.f32.xlu2 %v2916_v6 }
0x1b68   : > { %v2802_v7 = vpop.xlane.xlu0 %2801 }
0x1b69   : > { %v2803_v29 = vsub.f32 %v2799_v0, %v2802_v7 }
0x1b6b   : > { %v2804_v8 = vmul.f32 1.442695, %v2803_v29 }
0x1b6d   : > { %4019 = vpow2.f32 %v2804_v8 }
0x1b70   : > { %v2918_v9 = vpop.xlane.xlu2 %2917 }
0x1b71   : > { %v2919_v10 = vsub.f32 %v2915_v5, %v2918_v9  ;;  %v5494_v13 = vpop.f32.mrf.mxu0 }
0x1b73   : > { %v4020_v11 = vpop.eup %4019  ;;  %v2920_v12 = vmul.f32 1.442695, %v2919_v10 }
0x1b74   : > { %v2806_v39 = vsel %vm1167_vm2, %v4020_v11, 0.0 }
0x1b75   : > { %4021 = vpow2.f32 %v2920_v12  ;;  %2807 = vadd.xlane.f32.xlu2 %v2806_v39 }
0x1b79   : > { %v3005_v15 = vpop.f32.mrf.mxu0 }
0x1b7a   : > { %v3008_v14 = vmul.f32 0.35355338, %v3005_v15 }
0x1b7b   : > { %v4022_v34 = vpop.eup %4021 }
0x1b7c   : > { %v2922_v16 = vsel %vm1167_vm2, %v4022_v34, 0.0  ;;  %v3009_v18 = vadd.f32 %v5242_v43, %v3008_v14  ;;  %v3713_v14 = vld [vmem:[%s5770_s15 + $0x78] sm:$0xff] }
0x1b7d   : > { %2923 = vadd.xlane.f32.xlu0 %v2922_v16  ;;  %3188 = vmatpush.msrb.mxu0 %v3713_v14  ;;  %v3711_v16 = vld [vmem:[%s5770_s15 + $0x68] sm:$0xff] }
0x1b7e   : > { %v3010_v19 = vsel %vm1167_vm2, %v3009_v18, -inf }
0x1b7f   : > { %3011 = vmax.xlane.f32.xlu1 %v3010_v19  ;;  %v3709_v19 = vld [vmem:[%s5770_s15 + $0x58] sm:$0xff] }
0x1b91   : > { %2930 = vrot.lane.b32.xlu0 %v5460_v28, %s4639_s26  ;;  %s3298_s26 = scalar_lea.hbm %s5777_s4, %s3723_s1 }
0x1b98   : > { %2814 = vrot.lane.b32.xlu1 %v5460_v28, %s5771_s9  ;;  %s3301_s9 = sshll.u32 %s3298_s26, 4  ;;  %s3302_s9 = int_to_ptr.hbm [resolvable:$true] %s3301_s9 }
0x1b99   : > { %s4499_s20 = sshra.s32 %s3302_s9, 4  ;;  %s4500_s20 = int_to_ptr.hbm [resolvable:$true] %s4499_s20 }
0x1b9a   : > { %s4501_s27 = scalar_lea.hbm %s4500_s20, 16  ;;  %p4506_p2 = scmp.lt.s32.totalorder %s4500_s20, %s5777_s4 }
0x1b9b   : > { %p4502_p7 = scmp.ne.s32.totalorder %s4500_s20, %s4501_s27 }
0x1b9d   : > { %p4503_p9 = pnand %p4502_p7, %p4887_p5 }
0x1b9f   : > { %p4504_p0 = pneg %p4503_p9 }
0x1be8   : > { %v2808_v21 = vpop.xlane.xlu2 %2807 }
0x1be9   : > { %4023 = vrcp.f32 %v2808_v21 }
0x1bef   : > { %v4024_v27 = vpop.eup %4023 }
0x1bf0   : > { %v2924_v26 = vpop.xlane.xlu0 %2923  ;;  %v2810_v43 = vmul.f32 %v4024_v27, %v2808_v21 }
0x1bf2   : > { %v3012_v22 = vpop.xlane.xlu1 %3011  ;;  %v2811_v33 = vsub.f32 2.0, %v2810_v43 }
0x1bf3   : > { %v3013_v23 = vsub.f32 %v3009_v18, %v3012_v22  ;;  %v3710_v18 = vld [vmem:[%s5770_s15 + $0x60] sm:$0xff] }
0x1bf4   : > { %v2812_v36 = vmul.f32 %v4024_v27, %v2811_v33  ;;  %v3951_v33 = vld [vmem:[#allocation23 + $0x4] ss:$0 sm:$0xff] }
0x1bf5   : > { %v3014_v24 = vmul.f32 1.442695, %v3013_v23 }
0x1bf6   : > { %v2813_v40 = vmul.f32 %v4020_v11, %v2812_v36  ;;  %v3702_v11 = vld [vmem:[%s5768_s14 + $0x28] sm:$0xff] }
0x1bf7   : > { %4025 = vpow2.f32 %v3014_v24 }
0x1bf8   : > { %4027 = vrcp.f32 %v2924_v26 }
0x1bfd   : > { %v4026_v30 = vpop.eup %4025 }
0x1bfe   : > { %v3016_v31 = vsel %vm1167_vm2, %v4026_v30, 0.0  ;;  %v4028_v35 = vpop.eup %4027 }
0x1bff   : > { %3017 = vadd.xlane.f32.xlu2 %v3016_v31  ;;  %v2926_v38 = vmul.f32 %v4028_v35, %v2924_v26 }
0x1c01   : > { %v2927_v41 = vsub.f32 2.0, %v2926_v38  ;;  %v3708_v38 = vld [vmem:[%s5770_s15 + $0x50] sm:$0xff] }
0x1c03   : > { %v2931_v42 = vpop.permute.xlu0 %2930  ;;  %v2928_v44 = vmul.f32 %v4028_v35, %v2927_v41  ;;  %v3706_v41 = vld [vmem:[%s5770_s15 + $0x40] sm:$0xff] }
0x1c05   : > { %v2929_v45 = vmul.f32 %v4022_v34, %v2928_v44  ;;  %v3712_v34 = vld [vmem:[%s5770_s15 + $0x70] sm:$0xff] }
0x1c06   : > { %3189 = vmatpush.msrb.mxu0 %v3712_v34 }
0x1c08   : > { %3190 = vmatpush.msrb.mxu0 %v3711_v16 }
0x1c0a   : > { %v2815_v20 = vpop.permute.xlu1 %2814  ;;  %3191 = vmatpush.msrb.mxu0 %v3710_v18 }
0x1c0b   : > { %2835 = vmatpush.msrb.mxu3 %v2815_v20  ;;  %v3952_v20 = vld [vmem:[#allocation19 + $0x1] ss:$0 sm:$0xff] }
0x1c0c   : > { %3689 = vmatmul.msk.f32.vlgmr.msrb.gmra.mxu3 %vm1167_vm2, %v2813_v40  ;;  %3192 = vmatpush.msrb.mxu0 %v3709_v19 }
0x1c0d   : > { %2951 = vmatpush.msra.mxu3 %v2931_v42 }
0x1c0e   : > { %3193 = vmatpush.msrb.mxu0 %v3708_v38 }
0x1c0f   : > { %3068 = vmatpush.msrb.mxu3 %v2701_v58  ;;  %v3238_v58 = vld [vmem:[#allocation25 + $0x18] sm:$0xff] }
0x1c14   : > { %3694 = vmatmul.msk.f32.vlgmr.msra.gmra.mxu3 %vm1167_vm2, %v2929_v45 }
0x1c17   : > { %3024 = vrot.lane.b32.xlu2 %v5460_v28, %s4637_s18 }
0x1c72   : > { %v3018_v32 = vpop.xlane.xlu2 %3017 }
0x1c73   : > { %4029 = vrcp.f32 %v3018_v32 }
0x1c79   : > { %v4030_v49 = vpop.eup %4029 }
0x1c7a   : > { %v3020_v50 = vmul.f32 %v4030_v49, %v3018_v32  ;;  %v3025_v51 = vpop.permute.xlu2 %3024 }
0x1c7b   : > { %3045 = vmatpush.msra.mxu1 %v3025_v51 }
0x1c7c   : > { %v3021_v52 = vsub.f32 2.0, %v3020_v50 }
0x1c7d   : > { %3258 = vmatpush.msrb.mxu1 %v3238_v58 }
0x1c7e   : > { %v3022_v53 = vmul.f32 %v4030_v49, %v3021_v52 }
0x1c80   : > { %v5509_v54 = vmul.f32 %v4026_v30, %v3022_v53  ;;  %v3950_v30 = vld [vmem:[#allocation22 + $0x4] ss:$0 sm:$0xff] }
0x1c82   : > { %3698 = vmatmul.msk.f32.vlgmr.msra.gmra.mxu1 %vm1167_vm2, %v5509_v54 }
0x1c8f   : > { %v2837_v56 = vpop.f32.mrf.mxu3 }
0x1c90   : > { %3690 = vmatmul.msk.f32.vlgmr.msrb.gmra.mxu2 %vm1167_vm2, %v2837_v56 }
0x1c97   : > { %v2953_v28 = vpop.f32.mrf.mxu3 }
0x1c98   : > { %3695 = vmatmul.msk.f32.vlgmr.msra.gmra.mxu2 %vm1167_vm2, %v2953_v28 }
0x1cff   : > { %v3047_v59 = vpop.f32.mrf.mxu1 }
0x1d00   : > { %3699 = vmatmul.msk.f32.vlgmr.msrb.gmra.mxu3 %vm1167_vm2, %v3047_v59  ;;  %v3237_v59 = vld [vmem:[#allocation25 + $0x10] sm:$0xff] }
0x1d01   : > { %3259 = vmatpush.msrb.mxu1 %v3237_v59 }
0x1d13   : > { %v2860_v61 = vpop.f32.mrf.mxu2 }
0x1d14   : > { %v2884_v0 = vadd.f32 %v5494_v13, %v2860_v61  ;;  %v3703_v13 = vld [vmem:[%s5768_s14 + $0x30] sm:$0xff] }
0x1d15   : > { %v3236_v61 = vld [vmem:[#allocation25 + $0x8] sm:$0xff] }
0x1d16   : > { %3260 = vmatpush.msrb.mxu1 %v3236_v61 }
0x1d1b   : > { %v2976_v63 = vpop.f32.mrf.mxu2 }
0x1d1c   : > { %v2979_v1 = vadd.f32 %v2976_v63, %v2884_v0 }
0x1d83   : > { %v3070_v2 = vpop.f32.mrf.mxu3 }
0x1d84   : > { %v3073_v3 = vadd.f32 %v3070_v2, %v2979_v1 }
0x1d86   : > { %v3088_v5 = vadd.f32 %v3073_v3, %v5456_v25  ;;  %v3704_v25 = vld [vmem:[%s5768_s14 + $0x38] sm:$0xff] }
0x1d87   : > { %3154 = vmatpush.msrb.mxu2 %v3704_v25 }
0x1d88   : > { %v3094_v17 = vadd.f32 %v3949_v62, %v3088_v5 }
0x1d89   : > { %3155 = vmatpush.msrb.mxu2 %v3703_v13 }
0x1d8a   : > { %v3099_v6 = vsel %vm1136_vm1, %v3094_v17, 0.0 }
0x1d8b   : > { %3100 = vadd.xlane.f32.xlu1 %v3099_v6  ;;  %3156 = vmatpush.msrb.mxu2 %v3702_v11 }
0x1dfe   : > { %v3101_v7 = vpop.xlane.xlu1 %3100 }
0x1dff   : > { %v3102_v29 = vmul.f32 %v3101_v7, %v5188_v4  ;;  %v3954_v7 = vld [vmem:[#allocation22 + $0x5] ss:$0 sm:$0xff] }
0x1e01   : > { %v3103_v8 = vsub.f32 %v3094_v17, %v3102_v29 }
0x1e03   : > { %v3104_v9 = vmul.f32 %v3103_v8, %v3103_v8 }
0x1e05   : > { %v3105_v10 = vsel %vm1136_vm1, %v3104_v9, 0.0 }
0x1e06   : > { %3106 = vadd.xlane.f32.xlu0 %v3105_v10 }
0x1e1a   : > { %2024 = vrot.lane.b32.xlu0 %v5282_v37, %s4643_s17  ;;  %v3701_v37 = vld [vmem:[%s5768_s14 + $0x20] sm:$0xff] }
0x1e1b   : > { %3157 = vmatpush.msrb.mxu2 %v3701_v37 }
0x1e22   : > { %3074 = vrot.lane.b32.xlu0 %v2813_v40, %s4643_s17  ;;  %v3707_v40 = vld [vmem:[%s5770_s15 + $0x48] sm:$0xff] }
0x1e23   : > { %3194 = vmatpush.msrb.mxu0 %v3707_v40 }
0x1e25   : > { %3195 = vmatpush.msrb.mxu0 %v3706_v41 }
0x1e2a   : > { %3077 = vrot.lane.b32.xlu0 %v2929_v45, %s4644_s22 }
0x1e79   : > { %v3107_v12 = vpop.xlane.xlu0 %3106 }
0x1e7a   : > { %v3108_v39 = vmul.f32 %v3107_v12, %v5188_v4 }
0x1e7c   : > { %v3109_v15 = vadd.f32 1e-05, %v3108_v39 }
0x1e7e   : > { %4031 = vrsqrt.f32 %v3109_v15  ;;  %vm3116_vm4 = vweird.f32 %v3109_v15 }
0x1e84   : > { %v4032_v21 = vpop.eup %4031 }
0x1e85   : > { %v3111_v22 = vmul.f32 %v4032_v21, %v3109_v15  ;;  %vm3117_vm3 = vweird.f32 %v4032_v21 }
0x1e86   : > { %vm3118_vm5 = vmor %vm3116_vm4, %vm3117_vm3 }
0x1e87   : > { %v3112_v23 = vmul.f32 %v4032_v21, %v3111_v22 }
0x1e89   : > { %v3113_v24 = vmul.f32 0.5, %v3112_v23 }
0x1e8b   : > { %v3114_v26 = vsub.f32 1.5, %v3113_v24 }
0x1e8c   : > { %v2025_v2 = vpop.permute.xlu0 %2024 }
0x1e8d   : > { %v3115_v27 = vmul.f32 %v4032_v21, %v3114_v26  ;;  %v2033_v9 = vsel %vm1167_vm2, %v5250_v60, %v2025_v2 }
0x1e8f   : > { %v3119_v43 = vsel %vm3118_vm5, %v4032_v21, %v3115_v27 }
0x1e90   : > { %v3120_v31 = vmul.f32 %v3119_v43, %v3103_v8 }
0x1e92   : > { %v3124_v35 = vmul.f32 %v3950_v30, %v3120_v31 }
0x1e94   : > { %v3128_v36 = vadd.f32 %v3951_v33, %v3124_v35  ;;  %v3075_v17 = vpop.permute.xlu0 %3074 }
0x1e95   : > { %v3083_v60 = vsel %vm1167_vm2, %v5482_v57, %v3075_v17 }
0x1e96   : > { %3705 = vmatmul.msk.f32.vlgmr.msrb.gmra.mxu2 %vm1136_vm1, %v3128_v36 }
0x1e9c   : > { %v3078_v39 = vpop.permute.xlu0 %3077 }
0x1f19   : > { %v3159_v42 = vpop.f32.mrf.mxu2 }
0x1f1a   : > { %v3160_v44 = vadd.f32 %v3952_v20, %v3159_v42 }
0x1f1c   : > { %v3162_v45 = vmax.f32 %v3160_v44, 0.0 }
0x1f1e   : > { %3714 = vmatmul.msk.f32.vlgmr.msrb.gmra.mxu0 %vm2123_vm10, %v3162_v45  ;;  %vm2034_vm10 = vcmask 130048  }
0x1f1f   : > { %v3084_v15 = vsel %vm2034_vm10, %v3083_v60, %v3078_v39 }
0x1f9b   : > { %v3197_v32 = vpop.f32.mrf.mxu0 }
0x1f9c   : > { %v3198_v47 = vadd.f32 %v3953_v46, %v3197_v32 }
0x1f9e   : > { %v3200_v49 = vadd.f32 %v3198_v47, %v3128_v36 }
0x1fa0   : > { %v3205_v50 = vsel %vm1136_vm1, %v3200_v49, 0.0 }
0x1fa1   : > { %3206 = vadd.xlane.f32.xlu2 %v3205_v50 }
0x1fb9   : > { %2030 = vrot.lane.b32.xlu2 %v5278_v48, %s4645_s6  ;;  %v3235_v48 = vld [vmem:[#allocation25] sm:$0xff] }
0x1fba   : > { %3261 = vmatpush.msrb.mxu1 %v3235_v48 }
0x2014   : > { %v3207_v51 = vpop.xlane.xlu2 %3206 }
0x2015   : > { %v3208_v52 = vmul.f32 %v3207_v51, %v5188_v4 }
0x2017   : > { %v3209_v53 = vsub.f32 %v3200_v49, %v3208_v52 }
0x2019   : > { %v3210_v56 = vmul.f32 %v3209_v53, %v3209_v53 }
0x201b   : > { %v3211_v28 = vsel %vm1136_vm1, %v3210_v56, 0.0 }
0x201c   : > { %3212 = vadd.xlane.f32.xlu1 %v3211_v28  ;;  %v2031_v25 = vpop.permute.xlu2 %2030 }
0x2035   : > { %2027 = vrot.lane.b32.xlu1 %v5286_v55, %s4644_s22  ;;  %s3608_s22 = sshll.u32 %s5006_s0, 4 }
0x2036   : > { %s1072_s21 = scalar_lea.vmem [#allocation27], %s3608_s22 }
0x2037   : > { %s3299_s25 = sshll.u32 %s1072_s21, 4  ;;  %s3300_s25 = int_to_ptr.vmem [resolvable:$true] %s3299_s25 }
0x203d   : > { %3080 = vrot.lane.b32.xlu1 %v5509_v54, %s4645_s6  ;;  %s4505_s6 = scalar_lea.hbm %s5777_s4, 32 }
0x203e   : > { %p4507_p1 = scmp.lt.s32.totalorder %s4505_s6, %s4501_s27 }
0x2040   : > { %p4508_p12 = por %p4507_p1, %p4506_p2 }
0x2042   : > { %p4509_p8 = pnand %p4508_p12, %p4504_p0 }
0x208f   : > { %v3213_v63 = vpop.xlane.xlu1 %3212 }
0x2090   : > { %v3214_v0 = vmul.f32 %v3213_v63, %v5188_v4  ;;  %v3955_v4 = vld [vmem:[#allocation23 + $0x5] ss:$0 sm:$0xff] }
0x2092   : > { %v3215_v1 = vadd.f32 1e-05, %v3214_v0 }
0x2094   : > { %4033 = vrsqrt.f32 %v3215_v1  ;;  %vm3222_vm7 = vweird.f32 %v3215_v1 }
0x209a   : > { %v4034_v3 = vpop.eup %4033 }
0x209b   : > { %v3217_v62 = vmul.f32 %v4034_v3, %v3215_v1  ;;  %vm3223_vm6 = vweird.f32 %v4034_v3 }
0x209c   : > { %vm3224_vm8 = vmor %vm3222_vm7, %vm3223_vm6 }
0x209d   : > { %v3218_v55 = vmul.f32 %v4034_v3, %v3217_v62 }
0x209f   : > { %v3219_v5 = vmul.f32 0.5, %v3218_v55 }
0x20a1   : > { %v3220_v54 = vsub.f32 1.5, %v3219_v5 }
0x20a3   : > { %v3221_v6 = vmul.f32 %v4034_v3, %v3220_v54 }
0x20a5   : > { %v3225_v29 = vsel %vm3224_vm8, %v4034_v3, %v3221_v6 }
0x20a6   : > { %v3226_v8 = vmul.f32 %v3225_v29, %v3209_v53 }
0x20a7   : > { %v2028_v10 = vpop.permute.xlu1 %2027 }
0x20a8   : > { %v3230_v13 = vmul.f32 %v3954_v7, %v3226_v8  ;;  %v2035_v11 = vsel %vm2034_vm10, %v2033_v9, %v2028_v10 }
0x20a9   : > { %v2037_v37 = vsel %vm2036_vm9, %v2035_v11, %v2031_v25 }
0x20aa   : > { %2038 = vst.msk [vmem:[%s1072_s21] sm:$0xff] %vm1136_vm1, %v2037_v37  ;;  %v3234_v12 = vadd.f32 %v3955_v4, %v3230_v13 }
0x20ac   : > { %3715 = vmatmul.msk.f32.vlgmr.msrb.gmra.mxu1 %vm1136_vm1, %v3234_v12 }
0x20af   : > { %v3081_v14 = vpop.permute.xlu1 %3080 }
0x20b0   : > { %v3085_v34 = vsel %vm2036_vm9, %v3084_v15, %v3081_v14 }
0x20b1   : > { %3700 = vst.msk [vmem:[%s1072_s21 + $0x8] sm:$0xff] %vm1136_vm1, %v3085_v34 }
0x20b2   : > { %4512 = shalt.err (!%p4509_p8)
}
0x20b3   : > { %s4646_s21 = smov 128   ;;  %s3718_s7 = sshll.u32 %s4801_s8, 3 }
0x20b4   : > { %3779 = dma.vmem_to_hbm [thread:$0]  (%p4887_p5), %s3300_s25, 256, %s3302_s9, %s3273_s29, %s4646_s21, %s4646_s21, %s4643_s17  }
0x20b5   : > { %s5778_s23 = sld [smem:[#allocation67_spill]]  ;;  %s1065_s6 = scalar_lea.vmem [#allocation26], %s5009_s13 }
0x20b6   : > { %s5779_s27 = sld [smem:[#allocation66_spill]]  ;;  %s3285_s1 = sshll.u32 %s1065_s6, 4  ;;  %s3286_s1 = int_to_ptr.vmem [resolvable:$true] %s3285_s1 }
0x20b7   : > { %s3268_s5 = scalar_lea.sflag [#allocation4], %s5006_s0 }
0x20bb   : > { %s3283_s19 = scalar_lea.hbm %s5778_s23, %s3718_s7  ;;  %s4533_s29 = scalar_lea.hbm %s5778_s23, 16 }
0x20bc   : > { %v3956_v57 = vld [vmem:[%s5779_s27] ss:$0 sm:$0xff]  ;;  %s3287_s4 = sshll.u32 %s3283_s19, 4  ;;  %s3288_s4 = int_to_ptr.hbm [resolvable:$true] %s3287_s4 }
0x20bd   : > { %s4527_s17 = sshra.s32 %s3288_s4, 4  ;;  %s4528_s17 = int_to_ptr.hbm [resolvable:$true] %s4527_s17 }
0x20be   : > { %s4529_s8 = scalar_lea.hbm %s4528_s17, 8  ;;  %p4534_p13 = scmp.lt.s32.totalorder %s4528_s17, %s5778_s23 }
0x20bf   : > { %p4530_p6 = scmp.ne.s32.totalorder %s4528_s17, %s4529_s8  ;;  %p4535_p3 = scmp.lt.s32.totalorder %s4533_s29, %s4529_s8 }
0x20c1   : > { %p4531_p10 = pnand %p4530_p6, %p4887_p5  ;;  %p4536_p7 = por %p4535_p3, %p4534_p13 }
0x20c3   : > { %p4532_p11 = pneg %p4531_p10 }
0x20c5   : > { %p4537_p9 = pnand %p4536_p7, %p4532_p11 }
0x2129   : > { %v3263_v16 = vpop.f32.mrf.mxu1 }
0x212a   : > { %v3264_v18 = vadd.f32 %v3956_v57, %v3263_v16 }
0x212c   : > { %3266 = vst [vmem:[%s1065_s6] sm:$0xff] %v3264_v18 }
0x212d   : > { %4540 = shalt.err (!%p4537_p9)
}
0x212e   : > { %3778 = dma.vmem_to_hbm [thread:$0]  (%p4887_p5), %s3286_s1, 128, %s3288_s4, %s3268_s5  }
0x212f PF: > { %s5780_s0 = sld [smem:[#allocation39_spill]]  ;;  %p5782_p0 = scmp.ge.s32.totalorder %s4611_s30, 2 }
0x2131   : > { %p3830_p2 = pnand %p5782_p0, %p4891_p4 }
0x2133   : > { %p3831_p1 = pneg %p3830_p2 }
0x2135   : > { %s3316_s18 = sand.u32 1, %s5780_s0  }
0x2136   : > { %s3317_s26 = scalar_lea.sflag [#allocation4], %s3316_s18 }
0x2137   : > { %4590 = dma.done.wait (%p3831_p1), %s3317_s26, 128  }
0x2138   : > { %4592 = vsyncadd (%p3831_p1), %s3317_s26, 4294967168  ;;  %s3327_s19 = scalar_lea.sflag [#allocation28], %s3316_s18 }
0x2139   : > { %4594 = dma.done.wait (%p3831_p1), %s3327_s19, 256  }
0x213a   : > { %4596 = vsyncadd (%p3831_p1), %s3327_s19, 4294967040  ;;  %s5783_s30 = sld [smem:[#allocation41_spill]]  ;;  %s5786_s29 = smov %s4603_s2 }
0x213b   : > { %s5784_s22 = sld [smem:[#allocation40_spill]] }
0x213c   : > { %s5785_s6 = sld [smem:[#allocation42_spill]] }
0x2140   : > { %p51_p5 = scmp.ge.s32.totalorder %s5783_s30, 4  }
0x2141   : > { %s5787_s2 = smov %s5784_s22 }
0x2142   :  { %53 = sbr.rel (!%p51_p5) target bundleno = 40 (0x28), region = 278 }
0x2147   :  { %3333 = vsyncpa [#allocation3], 1 }
0x2148   :  { %3335 = vsyncpa [#allocation3 + $0x1], 1 }
0x2149   :  { %3336 = vsyncpa [#allocation6], 1 }
0x214a   :  { %3338 = vsyncpa [#allocation6 + $0x1], 1 }
0x214b   :  { %3339 = vsyncpa [#allocation9], 1 }
0x214c   :  { %3340 = vsyncpa [#allocation12], 1 }
0x214d   :  { %3341 = vsyncpa [#allocation15], 1 }
0x214e   :  { %3342 = vsyncpa [#allocation18], 1 }
0x214f   :  { %3343 = vsyncpa [#allocation21], 1 }
0x2150   :  { %3344 = vsyncpa [#allocation24], 1 }
0x2151   :  { %3345 = vsyncpa [#allocation4], 1 }
0x2152   :  { %3347 = vsyncpa [#allocation4 + $0x1], 1 }
0x2153   :  { %3348 = vsyncpa [#allocation28], 1 }
0x2154   :  { %3350 = vsyncpa [#allocation28 + $0x1], 1 }

</bundles_post_ra>
